<compile_context>
chip_gen: v5e
topology: v5e:2x2
jax: 0.10.0
libtpu: 0.0.40
codegen_flags: <defaults>
</compile_context>

<pallas_src>
import jax
import jax.numpy as jnp
from jax.experimental import pallas as pl
from jax.experimental.pallas import tpu as pltpu


# ------------------------------ fused kernel --------------------------------

_NPL = 9  # refs per layer: h0f, c0f, h0b, c0b, ucat, bcat, wcat, wy, by


def _make_encoder_kernel(num_layers, seq_len, batch_p, h_dims):
    T, Bp = seq_len, batch_p

    def kernel(*refs):
        x_ref = refs[0]
        y_ref = refs[1 + _NPL * num_layers]
        hlast_ref = refs[2 + _NPL * num_layers]
        h_scr = refs[3 + _NPL * num_layers]          # (T*Bp, 2*Hmax) f32 scratch

        x = x_ref[...]                               # (T*Bp, Din0), f32
        for l in range(num_layers):
            (h0f_ref, c0f_ref, h0b_ref, c0b_ref,
             ucat_ref, bcat_ref, wcat_ref,
             wy_ref, by_ref) = refs[1 + _NPL * l: 1 + _NPL * (l + 1)]
            H = h_dims[l]

            # --- hoisted input projection: one large bf16 MXU matmul,
            #     bias folded in.  Columns [0,4H) feed fwd, [4H,8H) feed bwd.
            xu = jnp.dot(x.astype(jnp.bfloat16), ucat_ref[...],
                         preferred_element_type=jnp.float32) + bcat_ref[...]

            wcat = wcat_ref[...]                     # (2H, 8H) bf16, blockdiag(Wf, Wb)
            hf, cf = h0f_ref[...], c0f_ref[...]      # f32 state
            hb, cb = h0b_ref[...], c0b_ref[...]

            # fused fwd/bwd scan over time, fully unrolled (T static & small)
            for j in range(T):
                tt = T - 1 - j
                hcat = jnp.concatenate([hf, hb], axis=-1).astype(jnp.bfloat16)
                g = jnp.dot(hcat, wcat, preferred_element_type=jnp.float32)  # (Bp, 8H)
                gf = g[:, 0:4 * H] + xu[j * Bp:(j + 1) * Bp, 0:4 * H]
                gb = g[:, 4 * H:8 * H] + xu[tt * Bp:(tt + 1) * Bp, 4 * H:8 * H]

                # gate order: f, i, o, c  -> one sigmoid + one tanh per direction
                sf = jax.nn.sigmoid(gf[:, 0:3 * H])
                ctf = jnp.tanh(gf[:, 3 * H:4 * H])
                cf = sf[:, 0:H] * cf + sf[:, H:2 * H] * ctf
                hf = sf[:, 2 * H:3 * H] * jnp.tanh(cf)

                sb = jax.nn.sigmoid(gb[:, 0:3 * H])
                ctb = jnp.tanh(gb[:, 3 * H:4 * H])
                cb = sb[:, 0:H] * cb + sb[:, H:2 * H] * ctb
                hb = sb[:, 2 * H:3 * H] * jnp.tanh(cb)

                # h-history scratch: fwd into lanes [0,H), bwd into [H,2H)
                h_scr[j * Bp:(j + 1) * Bp, 0:H] = hf
                h_scr[tt * Bp:(tt + 1) * Bp, H:2 * H] = hb

            # --- bulk output dense: ONE (T*Bp, 2H) @ (2H, Dout) bf16 matmul
            h_all = h_scr[:, 0:2 * H].astype(jnp.bfloat16)
            x = jnp.dot(h_all, wy_ref[...],
                        preferred_element_type=jnp.float32) + by_ref[...]

            if l == num_layers - 1:
                # torch returns concat(h_fwd[T-1], h_bwd[T-1]) of the last layer,
                # which is exactly the last Bp-row chunk of the history scratch.
                hlast_ref[...] = h_scr[(T - 1) * Bp:T * Bp, 0:2 * H]

        y_ref[...] = x                               # lane-dense (Dout padded to 128)

    return kernel


def seq2seq_encoder_forward(src, embed_table, layers, states):
    """src: (B, T) int tokens -> ((B, T, Dout), (B, 2*H_last))."""
    B, T = src.shape
    Bp = ((B + 7) // 8) * 8                          # pad batch to sublane width
    h_dims = [st["h0f"].shape[-1] for st in states]
    Hmax = max(h_dims)
    LANE = 128

    src_embed = jnp.take(embed_table, src.astype(jnp.int32), axis=0)  # (B, T, E)
    x = jnp.transpose(src_embed, (1, 0, 2))                           # (T, B, E)
    x = jnp.pad(x, ((0, 0), (0, Bp - B), (0, 0)))                     # (T, Bp, E)
    x = x.reshape(T * Bp, x.shape[-1])                                # time-major flat

    def pad_b(a):
        return jnp.pad(a, ((0, Bp - B), (0, 0)))

    num_layers = len(layers)
    Dout = layers[-1]["wy"].shape[-1]
    Dpad = ((Dout + LANE - 1) // LANE) * LANE

    args = [x]
    for li, (p, st) in enumerate(zip(layers, states)):
        H = h_dims[li]
        ucat = jnp.concatenate([p["uf"], p["ub"]], axis=1).astype(jnp.bfloat16)  # (Din, 8H)
        bcat = jnp.concatenate([p["bf"], p["bb"]], axis=1)                       # (1, 8H) f32
        wcat = jnp.zeros((2 * H, 8 * H), jnp.float32)
        wcat = wcat.at[0:H, 0:4 * H].set(p["wf"])
        wcat = wcat.at[H:2 * H, 4 * H:8 * H].set(p["wb"]).astype(jnp.bfloat16)   # blockdiag
        wy, by = p["wy"], p["by"]
        if li == num_layers - 1:
            wy = jnp.pad(wy, ((0, 0), (0, Dpad - Dout)))                          # lane-dense out
            by = jnp.pad(by, ((0, 0), (0, Dpad - Dout)))
        args += [pad_b(st["h0f"]), pad_b(st["c0f"]),
                 pad_b(st["h0b"]), pad_b(st["c0b"]),
                 ucat, bcat, wcat, wy.astype(jnp.bfloat16), by]

    Hl = h_dims[-1]
    kernel = _make_encoder_kernel(num_layers, T, Bp, h_dims)
    vmem = lambda: pl.BlockSpec(memory_space=pltpu.MemorySpace.VMEM)

    # generation-aware VMEM budget (v7x: 64 MiB, v5e/v6e: 128 MiB physical)
    try:
        cap = pltpu.get_tpu_info().vmem_capacity_bytes
        vmem_limit = min(int(cap * 3 // 4), 100 * 1024 * 1024)
    except Exception:  # pragma: no cover - conservative fallback
        vmem_limit = 32 * 1024 * 1024

    y_flat, hlast = pl.pallas_call(
        kernel,
        out_shape=(jax.ShapeDtypeStruct((T * Bp, Dpad), jnp.float32),
                   jax.ShapeDtypeStruct((Bp, 2 * Hl), jnp.float32)),
        in_specs=[vmem() for _ in args],
        out_specs=(vmem(), vmem()),
        scratch_shapes=[pltpu.VMEM((T * Bp, 2 * Hmax), jnp.float32)],
        compiler_params=pltpu.CompilerParams(vmem_limit_bytes=vmem_limit),
    )(*args)

    y = y_flat[:, :Dout].reshape(T, Bp, Dout)[:, :B, :]
    return jnp.transpose(y, (1, 0, 2)), hlast[:B]


# ----------------------- parameter construction (glue) -----------------------

def _linear_params(key, out_dim, in_dim):
    kw, kb = jax.random.split(key)
    bound = 1.0 / jnp.sqrt(in_dim)
    w = jax.random.uniform(kw, (out_dim, in_dim), jnp.float32, -bound, bound)
    b = jax.random.uniform(kb, (out_dim,), jnp.float32, -bound, bound)
    return w, b


def _lstm_cell_params(key, h_dim, in_dim):
    # Torch cell has 8 Linears: wf/uf, wi/ui, wo/uo, wc/uc.  Gate order: f,i,o,c.
    keys = jax.random.split(key, 8)
    ws, us, bws, bus = [], [], [], []
    for g in range(4):
        w, bw = _linear_params(keys[2 * g], h_dim, h_dim)       # w*_dense: (H, H)
        u, bu = _linear_params(keys[2 * g + 1], h_dim, in_dim)  # u*_dense: (H, Din)
        ws.append(w.T)          # (H, H)
        us.append(u.T)          # (Din, H)
        bws.append(bw)
        bus.append(bu)
    W = jnp.concatenate(ws, axis=1)                              # (H, 4H)
    U = jnp.concatenate(us, axis=1)                              # (Din, 4H)
    b = jnp.concatenate([bw + bu for bw, bu in zip(bws, bus)])   # (4H,)
    return W, U, b.reshape(1, -1)


def build_encoder_params(key, config_dict):
    num_layers = config_dict["model"]["num_layers"]
    h_dims = list(config_dict["model"]["encoder_h_dim"])
    x_dims = list(config_dict["model"]["encoder_x_dim"]) + [2 * h_dims[-1]]
    vocab = config_dict["dataset"]["num_src_vocab"]
    embed_dim = config_dict["model"]["embed_dim"]

    key, ek = jax.random.split(key)
    embed_table = jax.random.normal(ek, (vocab, embed_dim), jnp.float32)

    layers = []
    for i in range(num_layers):
        h, din, dout = h_dims[i], x_dims[i], x_dims[i + 1]
        key, kf, kb, ky = jax.random.split(key, 4)
        Wf, Uf, bf = _lstm_cell_params(kf, h, din)
        Wb, Ub, bb = _lstm_cell_params(kb, h, din)
        Wy, by = _linear_params(ky, dout, 2 * h)
        layers.append(dict(wf=Wf, uf=Uf, bf=bf,
                           wb=Wb, ub=Ub, bb=bb,
                           wy=Wy.T, by=by.reshape(1, -1)))
    return embed_table, layers, h_dims


def build_hidden_states(key, batch, h_dims):
    states = []
    for h in h_dims:
        bound = jnp.sqrt(6.0 / h)   # kaiming_uniform_ bound for (B, h), fan_in = h
        key, *ks = jax.random.split(key, 5)
        states.append(dict(
            h0f=jax.random.uniform(ks[0], (batch, h), jnp.float32, -bound, bound),
            c0f=jax.random.uniform(ks[1], (batch, h), jnp.float32, -bound, bound),
            h0b=jax.random.uniform(ks[2], (batch, h), jnp.float32, -bound, bound),
            c0b=jax.random.uniform(ks[3], (batch, h), jnp.float32, -bound, bound),
        ))
    return states


# -------------------------- pure-JAX reference check -------------------------

def _ref_cell(h, c, x, W, U, b, H):
    g = h @ W + x @ U + b
    f = jax.nn.sigmoid(g[:, :H]); i = jax.nn.sigmoid(g[:, H:2 * H])
    o = jax.nn.sigmoid(g[:, 2 * H:3 * H]); cb = jnp.tanh(g[:, 3 * H:])
    c = f * c + i * cb
    return o * jnp.tanh(c), c


def seq2seq_encoder_reference(src, embed_table, layers, states):
    src_embed = jnp.take(embed_table, src.astype(jnp.int32), axis=0)
    x = jnp.transpose(src_embed, (1, 0, 2))
    T = x.shape[0]
    hlast = None
    for p, st in zip(layers, states):
        H = st["h0f"].shape[-1]
        hf, cf = st["h0f"], st["c0f"]
        hb, cb_ = st["h0b"], st["c0b"]
        hfs, hbs = [None] * T, [None] * T
        for j in range(T):
            hf, cf = _ref_cell(hf, cf, x[j], p["wf"], p["uf"], p["bf"], H)
            hfs[j] = hf
            hb, cb_ = _ref_cell(hb, cb_, x[T - j - 1], p["wb"], p["ub"], p["bb"], H)
            hbs[T - j - 1] = hb
        ys = []
        for w in range(T):
            hcat = jnp.concatenate([hfs[w], hbs[w]], axis=-1)
            ys.append(hcat @ p["wy"] + p["by"])
            hlast = hcat
        x = jnp.stack(ys, axis=0)
    return jnp.transpose(x, (1, 0, 2)), hlast


if __name__ == "__main__":
    config_dict = {
        "dataset": {"seq_len": 8, "num_src_vocab": 20},
        "model": {"num_layers": 2,
                  "encoder_h_dim": [32, 32],
                  "encoder_x_dim": [16, 32],   # x_dims[0] == embed_dim
                  "embed_dim": 16},
    }
    batch = 4
    seq_len = config_dict["dataset"]["seq_len"]

    key = jax.random.PRNGKey(0)
    k_src, k_par, k_hid = jax.random.split(key, 3)

    src = jax.random.randint(k_src, (batch, seq_len), 0,
                             config_dict["dataset"]["num_src_vocab"], dtype=jnp.int32)
    embed_table, layers, h_dims = build_encoder_params(k_par, config_dict)
    states = build_hidden_states(k_hid, batch, h_dims)

    y, ht = seq2seq_encoder_forward(src, embed_table, layers, states)
    y = jax.block_until_ready(y)
    ht = jax.block_until_ready(ht)

    # sanity: shapes match torch semantics
    assert y.shape == (batch, seq_len, 2 * h_dims[-1]), y.shape
    assert ht.shape == (batch, 2 * h_dims[-1]), ht.shape

    # numerical check against pure-JAX f32 reference (kernel uses bf16 MXU
    # operands with f32 accumulation/state, so allow bf16-level tolerance).
    y_ref, ht_ref = seq2seq_encoder_reference(src, embed_table, layers, states)
    assert jnp.allclose(y, y_ref, atol=3e-2, rtol=3e-2), "y mismatch"
    assert jnp.allclose(ht, ht_ref, atol=3e-2, rtol=3e-2), "ht mismatch"

    print("KERNEL_OK")
</pallas_src>

<mosaic_0001>
module attributes {stable_mosaic.version = 11 : i64} {
  func.func @kernel(%arg0: memref<64x16xf32, #tpu.memory_space<vmem>>, %arg1: memref<8x32xf32, #tpu.memory_space<vmem>>, %arg2: memref<8x32xf32, #tpu.memory_space<vmem>>, %arg3: memref<8x32xf32, #tpu.memory_space<vmem>>, %arg4: memref<8x32xf32, #tpu.memory_space<vmem>>, %arg5: memref<16x256xbf16, #tpu.memory_space<vmem>>, %arg6: memref<1x256xf32, #tpu.memory_space<vmem>>, %arg7: memref<64x256xbf16, #tpu.memory_space<vmem>>, %arg8: memref<64x32xbf16, #tpu.memory_space<vmem>>, %arg9: memref<1x32xf32, #tpu.memory_space<vmem>>, %arg10: memref<8x32xf32, #tpu.memory_space<vmem>>, %arg11: memref<8x32xf32, #tpu.memory_space<vmem>>, %arg12: memref<8x32xf32, #tpu.memory_space<vmem>>, %arg13: memref<8x32xf32, #tpu.memory_space<vmem>>, %arg14: memref<32x256xbf16, #tpu.memory_space<vmem>>, %arg15: memref<1x256xf32, #tpu.memory_space<vmem>>, %arg16: memref<64x256xbf16, #tpu.memory_space<vmem>>, %arg17: memref<64x128xbf16, #tpu.memory_space<vmem>>, %arg18: memref<1x128xf32, #tpu.memory_space<vmem>>, %arg19: memref<64x128xf32, #tpu.memory_space<vmem>>, %arg20: memref<8x64xf32, #tpu.memory_space<vmem>>, %arg21: memref<64x64xf32, #tpu.memory_space<vmem>>) attributes {dimension_semantics = [], scalar_prefetch = 0 : i64, scratch_operands = 1 : i64, tpu.core_type = #tpu.core_type<tc>} {
    %c0 = arith.constant 0 : index
    %c0_0 = arith.constant 0 : index
    %0 = vector.load %arg0[%c0, %c0_0] : memref<64x16xf32, #tpu.memory_space<vmem>>, vector<64x16xf32>
    %1 = arith.truncf %0 : vector<64x16xf32> to vector<64x16xbf16>
    %c0_1 = arith.constant 0 : index
    %c0_2 = arith.constant 0 : index
    %2 = vector.load %arg5[%c0_1, %c0_2] : memref<16x256xbf16, #tpu.memory_space<vmem>>, vector<16x256xbf16>
    %cst = arith.constant dense<0.000000e+00> : vector<64x256xf32>
    %3 = tpu.matmul %1, %2, %cst {dimension_numbers = #tpu.dot_dimension_numbers<[1], [0], [0], [1], [0, 0, 1, 1], [], []>} : vector<64x16xbf16>, vector<16x256xbf16>, vector<64x256xf32> -> vector<64x256xf32>
    %c0_3 = arith.constant 0 : index
    %c0_4 = arith.constant 0 : index
    %4 = vector.load %arg6[%c0_3, %c0_4] : memref<1x256xf32, #tpu.memory_space<vmem>>, vector<1x256xf32>
    %5 = vector.broadcast %4 : vector<1x256xf32> to vector<64x256xf32>
    %6 = arith.addf %3, %5 : vector<64x256xf32>
    %c0_5 = arith.constant 0 : index
    %c0_6 = arith.constant 0 : index
    %7 = vector.load %arg7[%c0_5, %c0_6] : memref<64x256xbf16, #tpu.memory_space<vmem>>, vector<64x256xbf16>
    %c0_7 = arith.constant 0 : index
    %c0_8 = arith.constant 0 : index
    %8 = vector.load %arg1[%c0_7, %c0_8] : memref<8x32xf32, #tpu.memory_space<vmem>>, vector<8x32xf32>
    %c0_9 = arith.constant 0 : index
    %c0_10 = arith.constant 0 : index
    %9 = vector.load %arg2[%c0_9, %c0_10] : memref<8x32xf32, #tpu.memory_space<vmem>>, vector<8x32xf32>
    %c0_11 = arith.constant 0 : index
    %c0_12 = arith.constant 0 : index
    %10 = vector.load %arg3[%c0_11, %c0_12] : memref<8x32xf32, #tpu.memory_space<vmem>>, vector<8x32xf32>
    %c0_13 = arith.constant 0 : index
    %c0_14 = arith.constant 0 : index
    %11 = vector.load %arg4[%c0_13, %c0_14] : memref<8x32xf32, #tpu.memory_space<vmem>>, vector<8x32xf32>
    %12 = tpu.concatenate %8, %10 in 1 : vector<8x32xf32>, vector<8x32xf32> -> vector<8x64xf32>
    %13 = arith.truncf %12 : vector<8x64xf32> to vector<8x64xbf16>
    %cst_15 = arith.constant dense<0.000000e+00> : vector<8x256xf32>
    %14 = tpu.matmul %13, %7, %cst_15 {dimension_numbers = #tpu.dot_dimension_numbers<[1], [0], [0], [1], [0, 0, 1, 1], [], []>} : vector<8x64xbf16>, vector<64x256xbf16>, vector<8x256xf32> -> vector<8x256xf32>
    %15 = vector.extract_strided_slice %14 {offsets = [0, 0], sizes = [8, 128], strides = [1, 1]} : vector<8x256xf32> to vector<8x128xf32>
    %16 = vector.extract_strided_slice %6 {offsets = [0, 0], sizes = [8, 128], strides = [1, 1]} : vector<64x256xf32> to vector<8x128xf32>
    %17 = arith.addf %15, %16 : vector<8x128xf32>
    %18 = vector.extract_strided_slice %14 {offsets = [0, 128], sizes = [8, 128], strides = [1, 1]} : vector<8x256xf32> to vector<8x128xf32>
    %19 = vector.extract_strided_slice %6 {offsets = [56, 128], sizes = [8, 128], strides = [1, 1]} : vector<64x256xf32> to vector<8x128xf32>
    %20 = arith.addf %18, %19 : vector<8x128xf32>
    %21 = vector.extract_strided_slice %17 {offsets = [0, 0], sizes = [8, 96], strides = [1, 1]} : vector<8x128xf32> to vector<8x96xf32>
    %22 = arith.negf %21 : vector<8x96xf32>
    %23 = math.exp %22 : vector<8x96xf32>
    %cst_16 = arith.constant 1.000000e+00 : f32
    %24 = vector.broadcast %cst_16 : f32 to vector<8x96xf32>
    %25 = arith.addf %24, %23 : vector<8x96xf32>
    %26 = arith.divf %24, %25 : vector<8x96xf32>
    %27 = vector.extract_strided_slice %17 {offsets = [0, 96], sizes = [8, 32], strides = [1, 1]} : vector<8x128xf32> to vector<8x32xf32>
    %28 = math.tanh %27 : vector<8x32xf32>
    %29 = vector.extract_strided_slice %26 {offsets = [0, 0], sizes = [8, 32], strides = [1, 1]} : vector<8x96xf32> to vector<8x32xf32>
    %30 = arith.mulf %29, %9 : vector<8x32xf32>
    %31 = vector.extract_strided_slice %26 {offsets = [0, 32], sizes = [8, 32], strides = [1, 1]} : vector<8x96xf32> to vector<8x32xf32>
    %32 = arith.mulf %31, %28 : vector<8x32xf32>
    %33 = arith.addf %30, %32 : vector<8x32xf32>
    %34 = vector.extract_strided_slice %26 {offsets = [0, 64], sizes = [8, 32], strides = [1, 1]} : vector<8x96xf32> to vector<8x32xf32>
    %35 = math.tanh %33 : vector<8x32xf32>
    %36 = arith.mulf %34, %35 : vector<8x32xf32>
    %37 = vector.extract_strided_slice %20 {offsets = [0, 0], sizes = [8, 96], strides = [1, 1]} : vector<8x128xf32> to vector<8x96xf32>
    %38 = arith.negf %37 : vector<8x96xf32>
    %39 = math.exp %38 : vector<8x96xf32>
    %cst_17 = arith.constant 1.000000e+00 : f32
    %40 = vector.broadcast %cst_17 : f32 to vector<8x96xf32>
    %41 = arith.addf %40, %39 : vector<8x96xf32>
    %42 = arith.divf %40, %41 : vector<8x96xf32>
    %43 = vector.extract_strided_slice %20 {offsets = [0, 96], sizes = [8, 32], strides = [1, 1]} : vector<8x128xf32> to vector<8x32xf32>
    %44 = math.tanh %43 : vector<8x32xf32>
    %45 = vector.extract_strided_slice %42 {offsets = [0, 0], sizes = [8, 32], strides = [1, 1]} : vector<8x96xf32> to vector<8x32xf32>
    %46 = arith.mulf %45, %11 : vector<8x32xf32>
    %47 = vector.extract_strided_slice %42 {offsets = [0, 32], sizes = [8, 32], strides = [1, 1]} : vector<8x96xf32> to vector<8x32xf32>
    %48 = arith.mulf %47, %44 : vector<8x32xf32>
    %49 = arith.addf %46, %48 : vector<8x32xf32>
    %50 = vector.extract_strided_slice %42 {offsets = [0, 64], sizes = [8, 32], strides = [1, 1]} : vector<8x96xf32> to vector<8x32xf32>
    %51 = math.tanh %49 : vector<8x32xf32>
    %52 = arith.mulf %50, %51 : vector<8x32xf32>
    %c0_18 = arith.constant 0 : index
    %c0_19 = arith.constant 0 : index
    %53 = vector.load %arg21[%c0_18, %c0_19] : memref<64x64xf32, #tpu.memory_space<vmem>>, vector<8x32xf32>
    tpu.vector_store %arg21[%c0_18, %c0_19], %36 {strides = array<i32>} : memref<64x64xf32, #tpu.memory_space<vmem>>, vector<8x32xf32>,
    %c56 = arith.constant 56 : index
    %c32 = arith.constant 32 : index
    %54 = vector.load %arg21[%c56, %c32] : memref<64x64xf32, #tpu.memory_space<vmem>>, vector<8x32xf32>
    tpu.vector_store %arg21[%c56, %c32], %52 {strides = array<i32>} : memref<64x64xf32, #tpu.memory_space<vmem>>, vector<8x32xf32>,
    %55 = tpu.concatenate %36, %52 in 1 : vector<8x32xf32>, vector<8x32xf32> -> vector<8x64xf32>
    %56 = arith.truncf %55 : vector<8x64xf32> to vector<8x64xbf16>
    %cst_20 = arith.constant dense<0.000000e+00> : vector<8x256xf32>
    %57 = tpu.matmul %56, %7, %cst_20 {dimension_numbers = #tpu.dot_dimension_numbers<[1], [0], [0], [1], [0, 0, 1, 1], [], []>} : vector<8x64xbf16>, vector<64x256xbf16>, vector<8x256xf32> -> vector<8x256xf32>
    %58 = vector.extract_strided_slice %57 {offsets = [0, 0], sizes = [8, 128], strides = [1, 1]} : vector<8x256xf32> to vector<8x128xf32>
    %59 = vector.extract_strided_slice %6 {offsets = [8, 0], sizes = [8, 128], strides = [1, 1]} : vector<64x256xf32> to vector<8x128xf32>
    %60 = arith.addf %58, %59 : vector<8x128xf32>
    %61 = vector.extract_strided_slice %57 {offsets = [0, 128], sizes = [8, 128], strides = [1, 1]} : vector<8x256xf32> to vector<8x128xf32>
    %62 = vector.extract_strided_slice %6 {offsets = [48, 128], sizes = [8, 128], strides = [1, 1]} : vector<64x256xf32> to vector<8x128xf32>
    %63 = arith.addf %61, %62 : vector<8x128xf32>
    %64 = vector.extract_strided_slice %60 {offsets = [0, 0], sizes = [8, 96], strides = [1, 1]} : vector<8x128xf32> to vector<8x96xf32>
    %65 = arith.negf %64 : vector<8x96xf32>
    %66 = math.exp %65 : vector<8x96xf32>
    %cst_21 = arith.constant 1.000000e+00 : f32
    %67 = vector.broadcast %cst_21 : f32 to vector<8x96xf32>
    %68 = arith.addf %67, %66 : vector<8x96xf32>
    %69 = arith.divf %67, %68 : vector<8x96xf32>
    %70 = vector.extract_strided_slice %60 {offsets = [0, 96], sizes = [8, 32], strides = [1, 1]} : vector<8x128xf32> to vector<8x32xf32>
    %71 = math.tanh %70 : vector<8x32xf32>
    %72 = vector.extract_strided_slice %69 {offsets = [0, 0], sizes = [8, 32], strides = [1, 1]} : vector<8x96xf32> to vector<8x32xf32>
    %73 = arith.mulf %72, %33 : vector<8x32xf32>
    %74 = vector.extract_strided_slice %69 {offsets = [0, 32], sizes = [8, 32], strides = [1, 1]} : vector<8x96xf32> to vector<8x32xf32>
    %75 = arith.mulf %74, %71 : vector<8x32xf32>
    %76 = arith.addf %73, %75 : vector<8x32xf32>
    %77 = vector.extract_strided_slice %69 {offsets = [0, 64], sizes = [8, 32], strides = [1, 1]} : vector<8x96xf32> to vector<8x32xf32>
    %78 = math.tanh %76 : vector<8x32xf32>
    %79 = arith.mulf %77, %78 : vector<8x32xf32>
    %80 = vector.extract_strided_slice %63 {offsets = [0, 0], sizes = [8, 96], strides = [1, 1]} : vector<8x128xf32> to vector<8x96xf32>
    %81 = arith.negf %80 : vector<8x96xf32>
    %82 = math.exp %81 : vector<8x96xf32>
    %cst_22 = arith.constant 1.000000e+00 : f32
    %83 = vector.broadcast %cst_22 : f32 to vector<8x96xf32>
    %84 = arith.addf %83, %82 : vector<8x96xf32>
    %85 = arith.divf %83, %84 : vector<8x96xf32>
    %86 = vector.extract_strided_slice %63 {offsets = [0, 96], sizes = [8, 32], strides = [1, 1]} : vector<8x128xf32> to vector<8x32xf32>
    %87 = math.tanh %86 : vector<8x32xf32>
    %88 = vector.extract_strided_slice %85 {offsets = [0, 0], sizes = [8, 32], strides = [1, 1]} : vector<8x96xf32> to vector<8x32xf32>
    %89 = arith.mulf %88, %49 : vector<8x32xf32>
    %90 = vector.extract_strided_slice %85 {offsets = [0, 32], sizes = [8, 32], strides = [1, 1]} : vector<8x96xf32> to vector<8x32xf32>
    %91 = arith.mulf %90, %87 : vector<8x32xf32>
    %92 = arith.addf %89, %91 : vector<8x32xf32>
    %93 = vector.extract_strided_slice %85 {offsets = [0, 64], sizes = [8, 32], strides = [1, 1]} : vector<8x96xf32> to vector<8x32xf32>
    %94 = math.tanh %92 : vector<8x32xf32>
    %95 = arith.mulf %93, %94 : vector<8x32xf32>
    %c8 = arith.constant 8 : index
    %c0_23 = arith.constant 0 : index
    %96 = vector.load %arg21[%c8, %c0_23] : memref<64x64xf32, #tpu.memory_space<vmem>>, vector<8x32xf32>
    tpu.vector_store %arg21[%c8, %c0_23], %79 {strides = array<i32>} : memref<64x64xf32, #tpu.memory_space<vmem>>, vector<8x32xf32>,
    %c48 = arith.constant 48 : index
    %c32_24 = arith.constant 32 : index
    %97 = vector.load %arg21[%c48, %c32_24] : memref<64x64xf32, #tpu.memory_space<vmem>>, vector<8x32xf32>
    tpu.vector_store %arg21[%c48, %c32_24], %95 {strides = array<i32>} : memref<64x64xf32, #tpu.memory_space<vmem>>, vector<8x32xf32>,
    %98 = tpu.concatenate %79, %95 in 1 : vector<8x32xf32>, vector<8x32xf32> -> vector<8x64xf32>
    %99 = arith.truncf %98 : vector<8x64xf32> to vector<8x64xbf16>
    %cst_25 = arith.constant dense<0.000000e+00> : vector<8x256xf32>
    %100 = tpu.matmul %99, %7, %cst_25 {dimension_numbers = #tpu.dot_dimension_numbers<[1], [0], [0], [1], [0, 0, 1, 1], [], []>} : vector<8x64xbf16>, vector<64x256xbf16>, vector<8x256xf32> -> vector<8x256xf32>
    %101 = vector.extract_strided_slice %100 {offsets = [0, 0], sizes = [8, 128], strides = [1, 1]} : vector<8x256xf32> to vector<8x128xf32>
    %102 = vector.extract_strided_slice %6 {offsets = [16, 0], sizes = [8, 128], strides = [1, 1]} : vector<64x256xf32> to vector<8x128xf32>
    %103 = arith.addf %101, %102 : vector<8x128xf32>
    %104 = vector.extract_strided_slice %100 {offsets = [0, 128], sizes = [8, 128], strides = [1, 1]} : vector<8x256xf32> to vector<8x128xf32>
    %105 = vector.extract_strided_slice %6 {offsets = [40, 128], sizes = [8, 128], strides = [1, 1]} : vector<64x256xf32> to vector<8x128xf32>
    %106 = arith.addf %104, %105 : vector<8x128xf32>
    %107 = vector.extract_strided_slice %103 {offsets = [0, 0], sizes = [8, 96], strides = [1, 1]} : vector<8x128xf32> to vector<8x96xf32>
    %108 = arith.negf %107 : vector<8x96xf32>
    %109 = math.exp %108 : vector<8x96xf32>
    %cst_26 = arith.constant 1.000000e+00 : f32
    %110 = vector.broadcast %cst_26 : f32 to vector<8x96xf32>
    %111 = arith.addf %110, %109 : vector<8x96xf32>
    %112 = arith.divf %110, %111 : vector<8x96xf32>
    %113 = vector.extract_strided_slice %103 {offsets = [0, 96], sizes = [8, 32], strides = [1, 1]} : vector<8x128xf32> to vector<8x32xf32>
    %114 = math.tanh %113 : vector<8x32xf32>
    %115 = vector.extract_strided_slice %112 {offsets = [0, 0], sizes = [8, 32], strides = [1, 1]} : vector<8x96xf32> to vector<8x32xf32>
    %116 = arith.mulf %115, %76 : vector<8x32xf32>
    %117 = vector.extract_strided_slice %112 {offsets = [0, 32], sizes = [8, 32], strides = [1, 1]} : vector<8x96xf32> to vector<8x32xf32>
    %118 = arith.mulf %117, %114 : vector<8x32xf32>
    %119 = arith.addf %116, %118 : vector<8x32xf32>
    %120 = vector.extract_strided_slice %112 {offsets = [0, 64], sizes = [8, 32], strides = [1, 1]} : vector<8x96xf32> to vector<8x32xf32>
    %121 = math.tanh %119 : vector<8x32xf32>
    %122 = arith.mulf %120, %121 : vector<8x32xf32>
    %123 = vector.extract_strided_slice %106 {offsets = [0, 0], sizes = [8, 96], strides = [1, 1]} : vector<8x128xf32> to vector<8x96xf32>
    %124 = arith.negf %123 : vector<8x96xf32>
    %125 = math.exp %124 : vector<8x96xf32>
    %cst_27 = arith.constant 1.000000e+00 : f32
    %126 = vector.broadcast %cst_27 : f32 to vector<8x96xf32>
    %127 = arith.addf %126, %125 : vector<8x96xf32>
    %128 = arith.divf %126, %127 : vector<8x96xf32>
    %129 = vector.extract_strided_slice %106 {offsets = [0, 96], sizes = [8, 32], strides = [1, 1]} : vector<8x128xf32> to vector<8x32xf32>
    %130 = math.tanh %129 : vector<8x32xf32>
    %131 = vector.extract_strided_slice %128 {offsets = [0, 0], sizes = [8, 32], strides = [1, 1]} : vector<8x96xf32> to vector<8x32xf32>
    %132 = arith.mulf %131, %92 : vector<8x32xf32>
    %133 = vector.extract_strided_slice %128 {offsets = [0, 32], sizes = [8, 32], strides = [1, 1]} : vector<8x96xf32> to vector<8x32xf32>
    %134 = arith.mulf %133, %130 : vector<8x32xf32>
    %135 = arith.addf %132, %134 : vector<8x32xf32>
    %136 = vector.extract_strided_slice %128 {offsets = [0, 64], sizes = [8, 32], strides = [1, 1]} : vector<8x96xf32> to vector<8x32xf32>
    %137 = math.tanh %135 : vector<8x32xf32>
    %138 = arith.mulf %136, %137 : vector<8x32xf32>
    %c16 = arith.constant 16 : index
    %c0_28 = arith.constant 0 : index
    %139 = vector.load %arg21[%c16, %c0_28] : memref<64x64xf32, #tpu.memory_space<vmem>>, vector<8x32xf32>
    tpu.vector_store %arg21[%c16, %c0_28], %122 {strides = array<i32>} : memref<64x64xf32, #tpu.memory_space<vmem>>, vector<8x32xf32>,
    %c40 = arith.constant 40 : index
    %c32_29 = arith.constant 32 : index
    %140 = vector.load %arg21[%c40, %c32_29] : memref<64x64xf32, #tpu.memory_space<vmem>>, vector<8x32xf32>
    tpu.vector_store %arg21[%c40, %c32_29], %138 {strides = array<i32>} : memref<64x64xf32, #tpu.memory_space<vmem>>, vector<8x32xf32>,
    %141 = tpu.concatenate %122, %138 in 1 : vector<8x32xf32>, vector<8x32xf32> -> vector<8x64xf32>
    %142 = arith.truncf %141 : vector<8x64xf32> to vector<8x64xbf16>
    %cst_30 = arith.constant dense<0.000000e+00> : vector<8x256xf32>
    %143 = tpu.matmul %142, %7, %cst_30 {dimension_numbers = #tpu.dot_dimension_numbers<[1], [0], [0], [1], [0, 0, 1, 1], [], []>} : vector<8x64xbf16>, vector<64x256xbf16>, vector<8x256xf32> -> vector<8x256xf32>
    %144 = vector.extract_strided_slice %143 {offsets = [0, 0], sizes = [8, 128], strides = [1, 1]} : vector<8x256xf32> to vector<8x128xf32>
    %145 = vector.extract_strided_slice %6 {offsets = [24, 0], sizes = [8, 128], strides = [1, 1]} : vector<64x256xf32> to vector<8x128xf32>
    %146 = arith.addf %144, %145 : vector<8x128xf32>
    %147 = vector.extract_strided_slice %143 {offsets = [0, 128], sizes = [8, 128], strides = [1, 1]} : vector<8x256xf32> to vector<8x128xf32>
    %148 = vector.extract_strided_slice %6 {offsets = [32, 128], sizes = [8, 128], strides = [1, 1]} : vector<64x256xf32> to vector<8x128xf32>
    %149 = arith.addf %147, %148 : vector<8x128xf32>
    %150 = vector.extract_strided_slice %146 {offsets = [0, 0], sizes = [8, 96], strides = [1, 1]} : vector<8x128xf32> to vector<8x96xf32>
    %151 = arith.negf %150 : vector<8x96xf32>
    %152 = math.exp %151 : vector<8x96xf32>
    %cst_31 = arith.constant 1.000000e+00 : f32
    %153 = vector.broadcast %cst_31 : f32 to vector<8x96xf32>
    %154 = arith.addf %153, %152 : vector<8x96xf32>
    %155 = arith.divf %153, %154 : vector<8x96xf32>
    %156 = vector.extract_strided_slice %146 {offsets = [0, 96], sizes = [8, 32], strides = [1, 1]} : vector<8x128xf32> to vector<8x32xf32>
    %157 = math.tanh %156 : vector<8x32xf32>
    %158 = vector.extract_strided_slice %155 {offsets = [0, 0], sizes = [8, 32], strides = [1, 1]} : vector<8x96xf32> to vector<8x32xf32>
    %159 = arith.mulf %158, %119 : vector<8x32xf32>
    %160 = vector.extract_strided_slice %155 {offsets = [0, 32], sizes = [8, 32], strides = [1, 1]} : vector<8x96xf32> to vector<8x32xf32>
    %161 = arith.mulf %160, %157 : vector<8x32xf32>
    %162 = arith.addf %159, %161 : vector<8x32xf32>
    %163 = vector.extract_strided_slice %155 {offsets = [0, 64], sizes = [8, 32], strides = [1, 1]} : vector<8x96xf32> to vector<8x32xf32>
    %164 = math.tanh %162 : vector<8x32xf32>
    %165 = arith.mulf %163, %164 : vector<8x32xf32>
    %166 = vector.extract_strided_slice %149 {offsets = [0, 0], sizes = [8, 96], strides = [1, 1]} : vector<8x128xf32> to vector<8x96xf32>
    %167 = arith.negf %166 : vector<8x96xf32>
    %168 = math.exp %167 : vector<8x96xf32>
    %cst_32 = arith.constant 1.000000e+00 : f32
    %169 = vector.broadcast %cst_32 : f32 to vector<8x96xf32>
    %170 = arith.addf %169, %168 : vector<8x96xf32>
    %171 = arith.divf %169, %170 : vector<8x96xf32>
    %172 = vector.extract_strided_slice %149 {offsets = [0, 96], sizes = [8, 32], strides = [1, 1]} : vector<8x128xf32> to vector<8x32xf32>
    %173 = math.tanh %172 : vector<8x32xf32>
    %174 = vector.extract_strided_slice %171 {offsets = [0, 0], sizes = [8, 32], strides = [1, 1]} : vector<8x96xf32> to vector<8x32xf32>
    %175 = arith.mulf %174, %135 : vector<8x32xf32>
    %176 = vector.extract_strided_slice %171 {offsets = [0, 32], sizes = [8, 32], strides = [1, 1]} : vector<8x96xf32> to vector<8x32xf32>
    %177 = arith.mulf %176, %173 : vector<8x32xf32>
    %178 = arith.addf %175, %177 : vector<8x32xf32>
    %179 = vector.extract_strided_slice %171 {offsets = [0, 64], sizes = [8, 32], strides = [1, 1]} : vector<8x96xf32> to vector<8x32xf32>
    %180 = math.tanh %178 : vector<8x32xf32>
    %181 = arith.mulf %179, %180 : vector<8x32xf32>
    %c24 = arith.constant 24 : index
    %c0_33 = arith.constant 0 : index
    %182 = vector.load %arg21[%c24, %c0_33] : memref<64x64xf32, #tpu.memory_space<vmem>>, vector<8x32xf32>
    tpu.vector_store %arg21[%c24, %c0_33], %165 {strides = array<i32>} : memref<64x64xf32, #tpu.memory_space<vmem>>, vector<8x32xf32>,
    %c32_34 = arith.constant 32 : index
    %c32_35 = arith.constant 32 : index
    %183 = vector.load %arg21[%c32_34, %c32_35] : memref<64x64xf32, #tpu.memory_space<vmem>>, vector<8x32xf32>
    tpu.vector_store %arg21[%c32_34, %c32_35], %181 {strides = array<i32>} : memref<64x64xf32, #tpu.memory_space<vmem>>, vector<8x32xf32>,
    %184 = tpu.concatenate %165, %181 in 1 : vector<8x32xf32>, vector<8x32xf32> -> vector<8x64xf32>
    %185 = arith.truncf %184 : vector<8x64xf32> to vector<8x64xbf16>
    %cst_36 = arith.constant dense<0.000000e+00> : vector<8x256xf32>
    %186 = tpu.matmul %185, %7, %cst_36 {dimension_numbers = #tpu.dot_dimension_numbers<[1], [0], [0], [1], [0, 0, 1, 1], [], []>} : vector<8x64xbf16>, vector<64x256xbf16>, vector<8x256xf32> -> vector<8x256xf32>
    %187 = vector.extract_strided_slice %186 {offsets = [0, 0], sizes = [8, 128], strides = [1, 1]} : vector<8x256xf32> to vector<8x128xf32>
    %188 = vector.extract_strided_slice %6 {offsets = [32, 0], sizes = [8, 128], strides = [1, 1]} : vector<64x256xf32> to vector<8x128xf32>
    %189 = arith.addf %187, %188 : vector<8x128xf32>
    %190 = vector.extract_strided_slice %186 {offsets = [0, 128], sizes = [8, 128], strides = [1, 1]} : vector<8x256xf32> to vector<8x128xf32>
    %191 = vector.extract_strided_slice %6 {offsets = [24, 128], sizes = [8, 128], strides = [1, 1]} : vector<64x256xf32> to vector<8x128xf32>
    %192 = arith.addf %190, %191 : vector<8x128xf32>
    %193 = vector.extract_strided_slice %189 {offsets = [0, 0], sizes = [8, 96], strides = [1, 1]} : vector<8x128xf32> to vector<8x96xf32>
    %194 = arith.negf %193 : vector<8x96xf32>
    %195 = math.exp %194 : vector<8x96xf32>
    %cst_37 = arith.constant 1.000000e+00 : f32
    %196 = vector.broadcast %cst_37 : f32 to vector<8x96xf32>
    %197 = arith.addf %196, %195 : vector<8x96xf32>
    %198 = arith.divf %196, %197 : vector<8x96xf32>
    %199 = vector.extract_strided_slice %189 {offsets = [0, 96], sizes = [8, 32], strides = [1, 1]} : vector<8x128xf32> to vector<8x32xf32>
    %200 = math.tanh %199 : vector<8x32xf32>
    %201 = vector.extract_strided_slice %198 {offsets = [0, 0], sizes = [8, 32], strides = [1, 1]} : vector<8x96xf32> to vector<8x32xf32>
    %202 = arith.mulf %201, %162 : vector<8x32xf32>
    %203 = vector.extract_strided_slice %198 {offsets = [0, 32], sizes = [8, 32], strides = [1, 1]} : vector<8x96xf32> to vector<8x32xf32>
    %204 = arith.mulf %203, %200 : vector<8x32xf32>
    %205 = arith.addf %202, %204 : vector<8x32xf32>
    %206 = vector.extract_strided_slice %198 {offsets = [0, 64], sizes = [8, 32], strides = [1, 1]} : vector<8x96xf32> to vector<8x32xf32>
    %207 = math.tanh %205 : vector<8x32xf32>
    %208 = arith.mulf %206, %207 : vector<8x32xf32>
    %209 = vector.extract_strided_slice %192 {offsets = [0, 0], sizes = [8, 96], strides = [1, 1]} : vector<8x128xf32> to vector<8x96xf32>
    %210 = arith.negf %209 : vector<8x96xf32>
    %211 = math.exp %210 : vector<8x96xf32>
    %cst_38 = arith.constant 1.000000e+00 : f32
    %212 = vector.broadcast %cst_38 : f32 to vector<8x96xf32>
    %213 = arith.addf %212, %211 : vector<8x96xf32>
    %214 = arith.divf %212, %213 : vector<8x96xf32>
    %215 = vector.extract_strided_slice %192 {offsets = [0, 96], sizes = [8, 32], strides = [1, 1]} : vector<8x128xf32> to vector<8x32xf32>
    %216 = math.tanh %215 : vector<8x32xf32>
    %217 = vector.extract_strided_slice %214 {offsets = [0, 0], sizes = [8, 32], strides = [1, 1]} : vector<8x96xf32> to vector<8x32xf32>
    %218 = arith.mulf %217, %178 : vector<8x32xf32>
    %219 = vector.extract_strided_slice %214 {offsets = [0, 32], sizes = [8, 32], strides = [1, 1]} : vector<8x96xf32> to vector<8x32xf32>
    %220 = arith.mulf %219, %216 : vector<8x32xf32>
    %221 = arith.addf %218, %220 : vector<8x32xf32>
    %222 = vector.extract_strided_slice %214 {offsets = [0, 64], sizes = [8, 32], strides = [1, 1]} : vector<8x96xf32> to vector<8x32xf32>
    %223 = math.tanh %221 : vector<8x32xf32>
    %224 = arith.mulf %222, %223 : vector<8x32xf32>
    %c32_39 = arith.constant 32 : index
    %c0_40 = arith.constant 0 : index
    %225 = vector.load %arg21[%c32_39, %c0_40] : memref<64x64xf32, #tpu.memory_space<vmem>>, vector<8x32xf32>
    tpu.vector_store %arg21[%c32_39, %c0_40], %208 {strides = array<i32>} : memref<64x64xf32, #tpu.memory_space<vmem>>, vector<8x32xf32>,
    %c24_41 = arith.constant 24 : index
    %c32_42 = arith.constant 32 : index
    %226 = vector.load %arg21[%c24_41, %c32_42] : memref<64x64xf32, #tpu.memory_space<vmem>>, vector<8x32xf32>
    tpu.vector_store %arg21[%c24_41, %c32_42], %224 {strides = array<i32>} : memref<64x64xf32, #tpu.memory_space<vmem>>, vector<8x32xf32>,
    %227 = tpu.concatenate %208, %224 in 1 : vector<8x32xf32>, vector<8x32xf32> -> vector<8x64xf32>
    %228 = arith.truncf %227 : vector<8x64xf32> to vector<8x64xbf16>
    %cst_43 = arith.constant dense<0.000000e+00> : vector<8x256xf32>
    %229 = tpu.matmul %228, %7, %cst_43 {dimension_numbers = #tpu.dot_dimension_numbers<[1], [0], [0], [1], [0, 0, 1, 1], [], []>} : vector<8x64xbf16>, vector<64x256xbf16>, vector<8x256xf32> -> vector<8x256xf32>
    %230 = vector.extract_strided_slice %229 {offsets = [0, 0], sizes = [8, 128], strides = [1, 1]} : vector<8x256xf32> to vector<8x128xf32>
    %231 = vector.extract_strided_slice %6 {offsets = [40, 0], sizes = [8, 128], strides = [1, 1]} : vector<64x256xf32> to vector<8x128xf32>
    %232 = arith.addf %230, %231 : vector<8x128xf32>
    %233 = vector.extract_strided_slice %229 {offsets = [0, 128], sizes = [8, 128], strides = [1, 1]} : vector<8x256xf32> to vector<8x128xf32>
    %234 = vector.extract_strided_slice %6 {offsets = [16, 128], sizes = [8, 128], strides = [1, 1]} : vector<64x256xf32> to vector<8x128xf32>
    %235 = arith.addf %233, %234 : vector<8x128xf32>
    %236 = vector.extract_strided_slice %232 {offsets = [0, 0], sizes = [8, 96], strides = [1, 1]} : vector<8x128xf32> to vector<8x96xf32>
    %237 = arith.negf %236 : vector<8x96xf32>
    %238 = math.exp %237 : vector<8x96xf32>
    %cst_44 = arith.constant 1.000000e+00 : f32
    %239 = vector.broadcast %cst_44 : f32 to vector<8x96xf32>
    %240 = arith.addf %239, %238 : vector<8x96xf32>
    %241 = arith.divf %239, %240 : vector<8x96xf32>
    %242 = vector.extract_strided_slice %232 {offsets = [0, 96], sizes = [8, 32], strides = [1, 1]} : vector<8x128xf32> to vector<8x32xf32>
    %243 = math.tanh %242 : vector<8x32xf32>
    %244 = vector.extract_strided_slice %241 {offsets = [0, 0], sizes = [8, 32], strides = [1, 1]} : vector<8x96xf32> to vector<8x32xf32>
    %245 = arith.mulf %244, %205 : vector<8x32xf32>
    %246 = vector.extract_strided_slice %241 {offsets = [0, 32], sizes = [8, 32], strides = [1, 1]} : vector<8x96xf32> to vector<8x32xf32>
    %247 = arith.mulf %246, %243 : vector<8x32xf32>
    %248 = arith.addf %245, %247 : vector<8x32xf32>
    %249 = vector.extract_strided_slice %241 {offsets = [0, 64], sizes = [8, 32], strides = [1, 1]} : vector<8x96xf32> to vector<8x32xf32>
    %250 = math.tanh %248 : vector<8x32xf32>
    %251 = arith.mulf %249, %250 : vector<8x32xf32>
    %252 = vector.extract_strided_slice %235 {offsets = [0, 0], sizes = [8, 96], strides = [1, 1]} : vector<8x128xf32> to vector<8x96xf32>
    %253 = arith.negf %252 : vector<8x96xf32>
    %254 = math.exp %253 : vector<8x96xf32>
    %cst_45 = arith.constant 1.000000e+00 : f32
    %255 = vector.broadcast %cst_45 : f32 to vector<8x96xf32>
    %256 = arith.addf %255, %254 : vector<8x96xf32>
    %257 = arith.divf %255, %256 : vector<8x96xf32>
    %258 = vector.extract_strided_slice %235 {offsets = [0, 96], sizes = [8, 32], strides = [1, 1]} : vector<8x128xf32> to vector<8x32xf32>
    %259 = math.tanh %258 : vector<8x32xf32>
    %260 = vector.extract_strided_slice %257 {offsets = [0, 0], sizes = [8, 32], strides = [1, 1]} : vector<8x96xf32> to vector<8x32xf32>
    %261 = arith.mulf %260, %221 : vector<8x32xf32>
    %262 = vector.extract_strided_slice %257 {offsets = [0, 32], sizes = [8, 32], strides = [1, 1]} : vector<8x96xf32> to vector<8x32xf32>
    %263 = arith.mulf %262, %259 : vector<8x32xf32>
    %264 = arith.addf %261, %263 : vector<8x32xf32>
    %265 = vector.extract_strided_slice %257 {offsets = [0, 64], sizes = [8, 32], strides = [1, 1]} : vector<8x96xf32> to vector<8x32xf32>
    %266 = math.tanh %264 : vector<8x32xf32>
    %267 = arith.mulf %265, %266 : vector<8x32xf32>
    %c40_46 = arith.constant 40 : index
    %c0_47 = arith.constant 0 : index
    %268 = vector.load %arg21[%c40_46, %c0_47] : memref<64x64xf32, #tpu.memory_space<vmem>>, vector<8x32xf32>
    tpu.vector_store %arg21[%c40_46, %c0_47], %251 {strides = array<i32>} : memref<64x64xf32, #tpu.memory_space<vmem>>, vector<8x32xf32>,
    %c16_48 = arith.constant 16 : index
    %c32_49 = arith.constant 32 : index
    %269 = vector.load %arg21[%c16_48, %c32_49] : memref<64x64xf32, #tpu.memory_space<vmem>>, vector<8x32xf32>
    tpu.vector_store %arg21[%c16_48, %c32_49], %267 {strides = array<i32>} : memref<64x64xf32, #tpu.memory_space<vmem>>, vector<8x32xf32>,
    %270 = tpu.concatenate %251, %267 in 1 : vector<8x32xf32>, vector<8x32xf32> -> vector<8x64xf32>
    %271 = arith.truncf %270 : vector<8x64xf32> to vector<8x64xbf16>
    %cst_50 = arith.constant dense<0.000000e+00> : vector<8x256xf32>
    %272 = tpu.matmul %271, %7, %cst_50 {dimension_numbers = #tpu.dot_dimension_numbers<[1], [0], [0], [1], [0, 0, 1, 1], [], []>} : vector<8x64xbf16>, vector<64x256xbf16>, vector<8x256xf32> -> vector<8x256xf32>
    %273 = vector.extract_strided_slice %272 {offsets = [0, 0], sizes = [8, 128], strides = [1, 1]} : vector<8x256xf32> to vector<8x128xf32>
    %274 = vector.extract_strided_slice %6 {offsets = [48, 0], sizes = [8, 128], strides = [1, 1]} : vector<64x256xf32> to vector<8x128xf32>
    %275 = arith.addf %273, %274 : vector<8x128xf32>
    %276 = vector.extract_strided_slice %272 {offsets = [0, 128], sizes = [8, 128], strides = [1, 1]} : vector<8x256xf32> to vector<8x128xf32>
    %277 = vector.extract_strided_slice %6 {offsets = [8, 128], sizes = [8, 128], strides = [1, 1]} : vector<64x256xf32> to vector<8x128xf32>
    %278 = arith.addf %276, %277 : vector<8x128xf32>
    %279 = vector.extract_strided_slice %275 {offsets = [0, 0], sizes = [8, 96], strides = [1, 1]} : vector<8x128xf32> to vector<8x96xf32>
    %280 = arith.negf %279 : vector<8x96xf32>
    %281 = math.exp %280 : vector<8x96xf32>
    %cst_51 = arith.constant 1.000000e+00 : f32
    %282 = vector.broadcast %cst_51 : f32 to vector<8x96xf32>
    %283 = arith.addf %282, %281 : vector<8x96xf32>
    %284 = arith.divf %282, %283 : vector<8x96xf32>
    %285 = vector.extract_strided_slice %275 {offsets = [0, 96], sizes = [8, 32], strides = [1, 1]} : vector<8x128xf32> to vector<8x32xf32>
    %286 = math.tanh %285 : vector<8x32xf32>
    %287 = vector.extract_strided_slice %284 {offsets = [0, 0], sizes = [8, 32], strides = [1, 1]} : vector<8x96xf32> to vector<8x32xf32>
    %288 = arith.mulf %287, %248 : vector<8x32xf32>
    %289 = vector.extract_strided_slice %284 {offsets = [0, 32], sizes = [8, 32], strides = [1, 1]} : vector<8x96xf32> to vector<8x32xf32>
    %290 = arith.mulf %289, %286 : vector<8x32xf32>
    %291 = arith.addf %288, %290 : vector<8x32xf32>
    %292 = vector.extract_strided_slice %284 {offsets = [0, 64], sizes = [8, 32], strides = [1, 1]} : vector<8x96xf32> to vector<8x32xf32>
    %293 = math.tanh %291 : vector<8x32xf32>
    %294 = arith.mulf %292, %293 : vector<8x32xf32>
    %295 = vector.extract_strided_slice %278 {offsets = [0, 0], sizes = [8, 96], strides = [1, 1]} : vector<8x128xf32> to vector<8x96xf32>
    %296 = arith.negf %295 : vector<8x96xf32>
    %297 = math.exp %296 : vector<8x96xf32>
    %cst_52 = arith.constant 1.000000e+00 : f32
    %298 = vector.broadcast %cst_52 : f32 to vector<8x96xf32>
    %299 = arith.addf %298, %297 : vector<8x96xf32>
    %300 = arith.divf %298, %299 : vector<8x96xf32>
    %301 = vector.extract_strided_slice %278 {offsets = [0, 96], sizes = [8, 32], strides = [1, 1]} : vector<8x128xf32> to vector<8x32xf32>
    %302 = math.tanh %301 : vector<8x32xf32>
    %303 = vector.extract_strided_slice %300 {offsets = [0, 0], sizes = [8, 32], strides = [1, 1]} : vector<8x96xf32> to vector<8x32xf32>
    %304 = arith.mulf %303, %264 : vector<8x32xf32>
    %305 = vector.extract_strided_slice %300 {offsets = [0, 32], sizes = [8, 32], strides = [1, 1]} : vector<8x96xf32> to vector<8x32xf32>
    %306 = arith.mulf %305, %302 : vector<8x32xf32>
    %307 = arith.addf %304, %306 : vector<8x32xf32>
    %308 = vector.extract_strided_slice %300 {offsets = [0, 64], sizes = [8, 32], strides = [1, 1]} : vector<8x96xf32> to vector<8x32xf32>
    %309 = math.tanh %307 : vector<8x32xf32>
    %310 = arith.mulf %308, %309 : vector<8x32xf32>
    %c48_53 = arith.constant 48 : index
    %c0_54 = arith.constant 0 : index
    %311 = vector.load %arg21[%c48_53, %c0_54] : memref<64x64xf32, #tpu.memory_space<vmem>>, vector<8x32xf32>
    tpu.vector_store %arg21[%c48_53, %c0_54], %294 {strides = array<i32>} : memref<64x64xf32, #tpu.memory_space<vmem>>, vector<8x32xf32>,
    %c8_55 = arith.constant 8 : index
    %c32_56 = arith.constant 32 : index
    %312 = vector.load %arg21[%c8_55, %c32_56] : memref<64x64xf32, #tpu.memory_space<vmem>>, vector<8x32xf32>
    tpu.vector_store %arg21[%c8_55, %c32_56], %310 {strides = array<i32>} : memref<64x64xf32, #tpu.memory_space<vmem>>, vector<8x32xf32>,
    %313 = tpu.concatenate %294, %310 in 1 : vector<8x32xf32>, vector<8x32xf32> -> vector<8x64xf32>
    %314 = arith.truncf %313 : vector<8x64xf32> to vector<8x64xbf16>
    %cst_57 = arith.constant dense<0.000000e+00> : vector<8x256xf32>
    %315 = tpu.matmul %314, %7, %cst_57 {dimension_numbers = #tpu.dot_dimension_numbers<[1], [0], [0], [1], [0, 0, 1, 1], [], []>} : vector<8x64xbf16>, vector<64x256xbf16>, vector<8x256xf32> -> vector<8x256xf32>
    %316 = vector.extract_strided_slice %315 {offsets = [0, 0], sizes = [8, 128], strides = [1, 1]} : vector<8x256xf32> to vector<8x128xf32>
    %317 = vector.extract_strided_slice %6 {offsets = [56, 0], sizes = [8, 128], strides = [1, 1]} : vector<64x256xf32> to vector<8x128xf32>
    %318 = arith.addf %316, %317 : vector<8x128xf32>
    %319 = vector.extract_strided_slice %315 {offsets = [0, 128], sizes = [8, 128], strides = [1, 1]} : vector<8x256xf32> to vector<8x128xf32>
    %320 = vector.extract_strided_slice %6 {offsets = [0, 128], sizes = [8, 128], strides = [1, 1]} : vector<64x256xf32> to vector<8x128xf32>
    %321 = arith.addf %319, %320 : vector<8x128xf32>
    %322 = vector.extract_strided_slice %318 {offsets = [0, 0], sizes = [8, 96], strides = [1, 1]} : vector<8x128xf32> to vector<8x96xf32>
    %323 = arith.negf %322 : vector<8x96xf32>
    %324 = math.exp %323 : vector<8x96xf32>
    %cst_58 = arith.constant 1.000000e+00 : f32
    %325 = vector.broadcast %cst_58 : f32 to vector<8x96xf32>
    %326 = arith.addf %325, %324 : vector<8x96xf32>
    %327 = arith.divf %325, %326 : vector<8x96xf32>
    %328 = vector.extract_strided_slice %318 {offsets = [0, 96], sizes = [8, 32], strides = [1, 1]} : vector<8x128xf32> to vector<8x32xf32>
    %329 = math.tanh %328 : vector<8x32xf32>
    %330 = vector.extract_strided_slice %327 {offsets = [0, 0], sizes = [8, 32], strides = [1, 1]} : vector<8x96xf32> to vector<8x32xf32>
    %331 = arith.mulf %330, %291 : vector<8x32xf32>
    %332 = vector.extract_strided_slice %327 {offsets = [0, 32], sizes = [8, 32], strides = [1, 1]} : vector<8x96xf32> to vector<8x32xf32>
    %333 = arith.mulf %332, %329 : vector<8x32xf32>
    %334 = arith.addf %331, %333 : vector<8x32xf32>
    %335 = vector.extract_strided_slice %327 {offsets = [0, 64], sizes = [8, 32], strides = [1, 1]} : vector<8x96xf32> to vector<8x32xf32>
    %336 = math.tanh %334 : vector<8x32xf32>
    %337 = arith.mulf %335, %336 : vector<8x32xf32>
    %338 = vector.extract_strided_slice %321 {offsets = [0, 0], sizes = [8, 96], strides = [1, 1]} : vector<8x128xf32> to vector<8x96xf32>
    %339 = arith.negf %338 : vector<8x96xf32>
    %340 = math.exp %339 : vector<8x96xf32>
    %cst_59 = arith.constant 1.000000e+00 : f32
    %341 = vector.broadcast %cst_59 : f32 to vector<8x96xf32>
    %342 = arith.addf %341, %340 : vector<8x96xf32>
    %343 = arith.divf %341, %342 : vector<8x96xf32>
    %344 = vector.extract_strided_slice %321 {offsets = [0, 96], sizes = [8, 32], strides = [1, 1]} : vector<8x128xf32> to vector<8x32xf32>
    %345 = math.tanh %344 : vector<8x32xf32>
    %346 = vector.extract_strided_slice %343 {offsets = [0, 0], sizes = [8, 32], strides = [1, 1]} : vector<8x96xf32> to vector<8x32xf32>
    %347 = arith.mulf %346, %307 : vector<8x32xf32>
    %348 = vector.extract_strided_slice %343 {offsets = [0, 32], sizes = [8, 32], strides = [1, 1]} : vector<8x96xf32> to vector<8x32xf32>
    %349 = arith.mulf %348, %345 : vector<8x32xf32>
    %350 = arith.addf %347, %349 : vector<8x32xf32>
    %351 = vector.extract_strided_slice %343 {offsets = [0, 64], sizes = [8, 32], strides = [1, 1]} : vector<8x96xf32> to vector<8x32xf32>
    %352 = math.tanh %350 : vector<8x32xf32>
    %353 = arith.mulf %351, %352 : vector<8x32xf32>
    %c56_60 = arith.constant 56 : index
    %c0_61 = arith.constant 0 : index
    %354 = vector.load %arg21[%c56_60, %c0_61] : memref<64x64xf32, #tpu.memory_space<vmem>>, vector<8x32xf32>
    tpu.vector_store %arg21[%c56_60, %c0_61], %337 {strides = array<i32>} : memref<64x64xf32, #tpu.memory_space<vmem>>, vector<8x32xf32>,
    %c0_62 = arith.constant 0 : index
    %c32_63 = arith.constant 32 : index
    %355 = vector.load %arg21[%c0_62, %c32_63] : memref<64x64xf32, #tpu.memory_space<vmem>>, vector<8x32xf32>
    tpu.vector_store %arg21[%c0_62, %c32_63], %353 {strides = array<i32>} : memref<64x64xf32, #tpu.memory_space<vmem>>, vector<8x32xf32>,
    %c0_64 = arith.constant 0 : index
    %c0_65 = arith.constant 0 : index
    %356 = vector.load %arg21[%c0_64, %c0_65] : memref<64x64xf32, #tpu.memory_space<vmem>>, vector<64x64xf32>
    %357 = arith.truncf %356 : vector<64x64xf32> to vector<64x64xbf16>
    %c0_66 = arith.constant 0 : index
    %c0_67 = arith.constant 0 : index
    %358 = vector.load %arg8[%c0_66, %c0_67] : memref<64x32xbf16, #tpu.memory_space<vmem>>, vector<64x32xbf16>
    %cst_68 = arith.constant dense<0.000000e+00> : vector<64x32xf32>
    %359 = tpu.matmul %357, %358, %cst_68 {dimension_numbers = #tpu.dot_dimension_numbers<[1], [0], [0], [1], [0, 0, 1, 1], [], []>} : vector<64x64xbf16>, vector<64x32xbf16>, vector<64x32xf32> -> vector<64x32xf32>
    %c0_69 = arith.constant 0 : index
    %c0_70 = arith.constant 0 : index
    %360 = vector.load %arg9[%c0_69, %c0_70] : memref<1x32xf32, #tpu.memory_space<vmem>>, vector<1x32xf32>
    %361 = vector.broadcast %360 : vector<1x32xf32> to vector<64x32xf32>
    %362 = arith.addf %359, %361 : vector<64x32xf32>
    %363 = arith.truncf %362 : vector<64x32xf32> to vector<64x32xbf16>
    %c0_71 = arith.constant 0 : index
    %c0_72 = arith.constant 0 : index
    %364 = vector.load %arg14[%c0_71, %c0_72] : memref<32x256xbf16, #tpu.memory_space<vmem>>, vector<32x256xbf16>
    %cst_73 = arith.constant dense<0.000000e+00> : vector<64x256xf32>
    %365 = tpu.matmul %363, %364, %cst_73 {dimension_numbers = #tpu.dot_dimension_numbers<[1], [0], [0], [1], [0, 0, 1, 1], [], []>} : vector<64x32xbf16>, vector<32x256xbf16>, vector<64x256xf32> -> vector<64x256xf32>
    %c0_74 = arith.constant 0 : index
    %c0_75 = arith.constant 0 : index
    %366 = vector.load %arg15[%c0_74, %c0_75] : memref<1x256xf32, #tpu.memory_space<vmem>>, vector<1x256xf32>
    %367 = vector.broadcast %366 : vector<1x256xf32> to vector<64x256xf32>
    %368 = arith.addf %365, %367 : vector<64x256xf32>
    %c0_76 = arith.constant 0 : index
    %c0_77 = arith.constant 0 : index
    %369 = vector.load %arg16[%c0_76, %c0_77] : memref<64x256xbf16, #tpu.memory_space<vmem>>, vector<64x256xbf16>
    %c0_78 = arith.constant 0 : index
    %c0_79 = arith.constant 0 : index
    %370 = vector.load %arg10[%c0_78, %c0_79] : memref<8x32xf32, #tpu.memory_space<vmem>>, vector<8x32xf32>
    %c0_80 = arith.constant 0 : index
    %c0_81 = arith.constant 0 : index
    %371 = vector.load %arg11[%c0_80, %c0_81] : memref<8x32xf32, #tpu.memory_space<vmem>>, vector<8x32xf32>
    %c0_82 = arith.constant 0 : index
    %c0_83 = arith.constant 0 : index
    %372 = vector.load %arg12[%c0_82, %c0_83] : memref<8x32xf32, #tpu.memory_space<vmem>>, vector<8x32xf32>
    %c0_84 = arith.constant 0 : index
    %c0_85 = arith.constant 0 : index
    %373 = vector.load %arg13[%c0_84, %c0_85] : memref<8x32xf32, #tpu.memory_space<vmem>>, vector<8x32xf32>
    %374 = tpu.concatenate %370, %372 in 1 : vector<8x32xf32>, vector<8x32xf32> -> vector<8x64xf32>
    %375 = arith.truncf %374 : vector<8x64xf32> to vector<8x64xbf16>
    %cst_86 = arith.constant dense<0.000000e+00> : vector<8x256xf32>
    %376 = tpu.matmul %375, %369, %cst_86 {dimension_numbers = #tpu.dot_dimension_numbers<[1], [0], [0], [1], [0, 0, 1, 1], [], []>} : vector<8x64xbf16>, vector<64x256xbf16>, vector<8x256xf32> -> vector<8x256xf32>
    %377 = vector.extract_strided_slice %376 {offsets = [0, 0], sizes = [8, 128], strides = [1, 1]} : vector<8x256xf32> to vector<8x128xf32>
    %378 = vector.extract_strided_slice %368 {offsets = [0, 0], sizes = [8, 128], strides = [1, 1]} : vector<64x256xf32> to vector<8x128xf32>
    %379 = arith.addf %377, %378 : vector<8x128xf32>
    %380 = vector.extract_strided_slice %376 {offsets = [0, 128], sizes = [8, 128], strides = [1, 1]} : vector<8x256xf32> to vector<8x128xf32>
    %381 = vector.extract_strided_slice %368 {offsets = [56, 128], sizes = [8, 128], strides = [1, 1]} : vector<64x256xf32> to vector<8x128xf32>
    %382 = arith.addf %380, %381 : vector<8x128xf32>
    %383 = vector.extract_strided_slice %379 {offsets = [0, 0], sizes = [8, 96], strides = [1, 1]} : vector<8x128xf32> to vector<8x96xf32>
    %384 = arith.negf %383 : vector<8x96xf32>
    %385 = math.exp %384 : vector<8x96xf32>
    %cst_87 = arith.constant 1.000000e+00 : f32
    %386 = vector.broadcast %cst_87 : f32 to vector<8x96xf32>
    %387 = arith.addf %386, %385 : vector<8x96xf32>
    %388 = arith.divf %386, %387 : vector<8x96xf32>
    %389 = vector.extract_strided_slice %379 {offsets = [0, 96], sizes = [8, 32], strides = [1, 1]} : vector<8x128xf32> to vector<8x32xf32>
    %390 = math.tanh %389 : vector<8x32xf32>
    %391 = vector.extract_strided_slice %388 {offsets = [0, 0], sizes = [8, 32], strides = [1, 1]} : vector<8x96xf32> to vector<8x32xf32>
    %392 = arith.mulf %391, %371 : vector<8x32xf32>
    %393 = vector.extract_strided_slice %388 {offsets = [0, 32], sizes = [8, 32], strides = [1, 1]} : vector<8x96xf32> to vector<8x32xf32>
    %394 = arith.mulf %393, %390 : vector<8x32xf32>
    %395 = arith.addf %392, %394 : vector<8x32xf32>
    %396 = vector.extract_strided_slice %388 {offsets = [0, 64], sizes = [8, 32], strides = [1, 1]} : vector<8x96xf32> to vector<8x32xf32>
    %397 = math.tanh %395 : vector<8x32xf32>
    %398 = arith.mulf %396, %397 : vector<8x32xf32>
    %399 = vector.extract_strided_slice %382 {offsets = [0, 0], sizes = [8, 96], strides = [1, 1]} : vector<8x128xf32> to vector<8x96xf32>
    %400 = arith.negf %399 : vector<8x96xf32>
    %401 = math.exp %400 : vector<8x96xf32>
    %cst_88 = arith.constant 1.000000e+00 : f32
    %402 = vector.broadcast %cst_88 : f32 to vector<8x96xf32>
    %403 = arith.addf %402, %401 : vector<8x96xf32>
    %404 = arith.divf %402, %403 : vector<8x96xf32>
    %405 = vector.extract_strided_slice %382 {offsets = [0, 96], sizes = [8, 32], strides = [1, 1]} : vector<8x128xf32> to vector<8x32xf32>
    %406 = math.tanh %405 : vector<8x32xf32>
    %407 = vector.extract_strided_slice %404 {offsets = [0, 0], sizes = [8, 32], strides = [1, 1]} : vector<8x96xf32> to vector<8x32xf32>
    %408 = arith.mulf %407, %373 : vector<8x32xf32>
    %409 = vector.extract_strided_slice %404 {offsets = [0, 32], sizes = [8, 32], strides = [1, 1]} : vector<8x96xf32> to vector<8x32xf32>
    %410 = arith.mulf %409, %406 : vector<8x32xf32>
    %411 = arith.addf %408, %410 : vector<8x32xf32>
    %412 = vector.extract_strided_slice %404 {offsets = [0, 64], sizes = [8, 32], strides = [1, 1]} : vector<8x96xf32> to vector<8x32xf32>
    %413 = math.tanh %411 : vector<8x32xf32>
    %414 = arith.mulf %412, %413 : vector<8x32xf32>
    %c0_89 = arith.constant 0 : index
    %c0_90 = arith.constant 0 : index
    %415 = vector.load %arg21[%c0_89, %c0_90] : memref<64x64xf32, #tpu.memory_space<vmem>>, vector<8x32xf32>
    tpu.vector_store %arg21[%c0_89, %c0_90], %398 {strides = array<i32>} : memref<64x64xf32, #tpu.memory_space<vmem>>, vector<8x32xf32>,
    %c56_91 = arith.constant 56 : index
    %c32_92 = arith.constant 32 : index
    %416 = vector.load %arg21[%c56_91, %c32_92] : memref<64x64xf32, #tpu.memory_space<vmem>>, vector<8x32xf32>
    tpu.vector_store %arg21[%c56_91, %c32_92], %414 {strides = array<i32>} : memref<64x64xf32, #tpu.memory_space<vmem>>, vector<8x32xf32>,
    %417 = tpu.concatenate %398, %414 in 1 : vector<8x32xf32>, vector<8x32xf32> -> vector<8x64xf32>
    %418 = arith.truncf %417 : vector<8x64xf32> to vector<8x64xbf16>
    %cst_93 = arith.constant dense<0.000000e+00> : vector<8x256xf32>
    %419 = tpu.matmul %418, %369, %cst_93 {dimension_numbers = #tpu.dot_dimension_numbers<[1], [0], [0], [1], [0, 0, 1, 1], [], []>} : vector<8x64xbf16>, vector<64x256xbf16>, vector<8x256xf32> -> vector<8x256xf32>
    %420 = vector.extract_strided_slice %419 {offsets = [0, 0], sizes = [8, 128], strides = [1, 1]} : vector<8x256xf32> to vector<8x128xf32>
    %421 = vector.extract_strided_slice %368 {offsets = [8, 0], sizes = [8, 128], strides = [1, 1]} : vector<64x256xf32> to vector<8x128xf32>
    %422 = arith.addf %420, %421 : vector<8x128xf32>
    %423 = vector.extract_strided_slice %419 {offsets = [0, 128], sizes = [8, 128], strides = [1, 1]} : vector<8x256xf32> to vector<8x128xf32>
    %424 = vector.extract_strided_slice %368 {offsets = [48, 128], sizes = [8, 128], strides = [1, 1]} : vector<64x256xf32> to vector<8x128xf32>
    %425 = arith.addf %423, %424 : vector<8x128xf32>
    %426 = vector.extract_strided_slice %422 {offsets = [0, 0], sizes = [8, 96], strides = [1, 1]} : vector<8x128xf32> to vector<8x96xf32>
    %427 = arith.negf %426 : vector<8x96xf32>
    %428 = math.exp %427 : vector<8x96xf32>
    %cst_94 = arith.constant 1.000000e+00 : f32
    %429 = vector.broadcast %cst_94 : f32 to vector<8x96xf32>
    %430 = arith.addf %429, %428 : vector<8x96xf32>
    %431 = arith.divf %429, %430 : vector<8x96xf32>
    %432 = vector.extract_strided_slice %422 {offsets = [0, 96], sizes = [8, 32], strides = [1, 1]} : vector<8x128xf32> to vector<8x32xf32>
    %433 = math.tanh %432 : vector<8x32xf32>
    %434 = vector.extract_strided_slice %431 {offsets = [0, 0], sizes = [8, 32], strides = [1, 1]} : vector<8x96xf32> to vector<8x32xf32>
    %435 = arith.mulf %434, %395 : vector<8x32xf32>
    %436 = vector.extract_strided_slice %431 {offsets = [0, 32], sizes = [8, 32], strides = [1, 1]} : vector<8x96xf32> to vector<8x32xf32>
    %437 = arith.mulf %436, %433 : vector<8x32xf32>
    %438 = arith.addf %435, %437 : vector<8x32xf32>
    %439 = vector.extract_strided_slice %431 {offsets = [0, 64], sizes = [8, 32], strides = [1, 1]} : vector<8x96xf32> to vector<8x32xf32>
    %440 = math.tanh %438 : vector<8x32xf32>
    %441 = arith.mulf %439, %440 : vector<8x32xf32>
    %442 = vector.extract_strided_slice %425 {offsets = [0, 0], sizes = [8, 96], strides = [1, 1]} : vector<8x128xf32> to vector<8x96xf32>
    %443 = arith.negf %442 : vector<8x96xf32>
    %444 = math.exp %443 : vector<8x96xf32>
    %cst_95 = arith.constant 1.000000e+00 : f32
    %445 = vector.broadcast %cst_95 : f32 to vector<8x96xf32>
    %446 = arith.addf %445, %444 : vector<8x96xf32>
    %447 = arith.divf %445, %446 : vector<8x96xf32>
    %448 = vector.extract_strided_slice %425 {offsets = [0, 96], sizes = [8, 32], strides = [1, 1]} : vector<8x128xf32> to vector<8x32xf32>
    %449 = math.tanh %448 : vector<8x32xf32>
    %450 = vector.extract_strided_slice %447 {offsets = [0, 0], sizes = [8, 32], strides = [1, 1]} : vector<8x96xf32> to vector<8x32xf32>
    %451 = arith.mulf %450, %411 : vector<8x32xf32>
    %452 = vector.extract_strided_slice %447 {offsets = [0, 32], sizes = [8, 32], strides = [1, 1]} : vector<8x96xf32> to vector<8x32xf32>
    %453 = arith.mulf %452, %449 : vector<8x32xf32>
    %454 = arith.addf %451, %453 : vector<8x32xf32>
    %455 = vector.extract_strided_slice %447 {offsets = [0, 64], sizes = [8, 32], strides = [1, 1]} : vector<8x96xf32> to vector<8x32xf32>
    %456 = math.tanh %454 : vector<8x32xf32>
    %457 = arith.mulf %455, %456 : vector<8x32xf32>
    %c8_96 = arith.constant 8 : index
    %c0_97 = arith.constant 0 : index
    %458 = vector.load %arg21[%c8_96, %c0_97] : memref<64x64xf32, #tpu.memory_space<vmem>>, vector<8x32xf32>
    tpu.vector_store %arg21[%c8_96, %c0_97], %441 {strides = array<i32>} : memref<64x64xf32, #tpu.memory_space<vmem>>, vector<8x32xf32>,
    %c48_98 = arith.constant 48 : index
    %c32_99 = arith.constant 32 : index
    %459 = vector.load %arg21[%c48_98, %c32_99] : memref<64x64xf32, #tpu.memory_space<vmem>>, vector<8x32xf32>
    tpu.vector_store %arg21[%c48_98, %c32_99], %457 {strides = array<i32>} : memref<64x64xf32, #tpu.memory_space<vmem>>, vector<8x32xf32>,
    %460 = tpu.concatenate %441, %457 in 1 : vector<8x32xf32>, vector<8x32xf32> -> vector<8x64xf32>
    %461 = arith.truncf %460 : vector<8x64xf32> to vector<8x64xbf16>
    %cst_100 = arith.constant dense<0.000000e+00> : vector<8x256xf32>
    %462 = tpu.matmul %461, %369, %cst_100 {dimension_numbers = #tpu.dot_dimension_numbers<[1], [0], [0], [1], [0, 0, 1, 1], [], []>} : vector<8x64xbf16>, vector<64x256xbf16>, vector<8x256xf32> -> vector<8x256xf32>
    %463 = vector.extract_strided_slice %462 {offsets = [0, 0], sizes = [8, 128], strides = [1, 1]} : vector<8x256xf32> to vector<8x128xf32>
    %464 = vector.extract_strided_slice %368 {offsets = [16, 0], sizes = [8, 128], strides = [1, 1]} : vector<64x256xf32> to vector<8x128xf32>
    %465 = arith.addf %463, %464 : vector<8x128xf32>
    %466 = vector.extract_strided_slice %462 {offsets = [0, 128], sizes = [8, 128], strides = [1, 1]} : vector<8x256xf32> to vector<8x128xf32>
    %467 = vector.extract_strided_slice %368 {offsets = [40, 128], sizes = [8, 128], strides = [1, 1]} : vector<64x256xf32> to vector<8x128xf32>
    %468 = arith.addf %466, %467 : vector<8x128xf32>
    %469 = vector.extract_strided_slice %465 {offsets = [0, 0], sizes = [8, 96], strides = [1, 1]} : vector<8x128xf32> to vector<8x96xf32>
    %470 = arith.negf %469 : vector<8x96xf32>
    %471 = math.exp %470 : vector<8x96xf32>
    %cst_101 = arith.constant 1.000000e+00 : f32
    %472 = vector.broadcast %cst_101 : f32 to vector<8x96xf32>
    %473 = arith.addf %472, %471 : vector<8x96xf32>
    %474 = arith.divf %472, %473 : vector<8x96xf32>
    %475 = vector.extract_strided_slice %465 {offsets = [0, 96], sizes = [8, 32], strides = [1, 1]} : vector<8x128xf32> to vector<8x32xf32>
    %476 = math.tanh %475 : vector<8x32xf32>
    %477 = vector.extract_strided_slice %474 {offsets = [0, 0], sizes = [8, 32], strides = [1, 1]} : vector<8x96xf32> to vector<8x32xf32>
    %478 = arith.mulf %477, %438 : vector<8x32xf32>
    %479 = vector.extract_strided_slice %474 {offsets = [0, 32], sizes = [8, 32], strides = [1, 1]} : vector<8x96xf32> to vector<8x32xf32>
    %480 = arith.mulf %479, %476 : vector<8x32xf32>
    %481 = arith.addf %478, %480 : vector<8x32xf32>
    %482 = vector.extract_strided_slice %474 {offsets = [0, 64], sizes = [8, 32], strides = [1, 1]} : vector<8x96xf32> to vector<8x32xf32>
    %483 = math.tanh %481 : vector<8x32xf32>
    %484 = arith.mulf %482, %483 : vector<8x32xf32>
    %485 = vector.extract_strided_slice %468 {offsets = [0, 0], sizes = [8, 96], strides = [1, 1]} : vector<8x128xf32> to vector<8x96xf32>
    %486 = arith.negf %485 : vector<8x96xf32>
    %487 = math.exp %486 : vector<8x96xf32>
    %cst_102 = arith.constant 1.000000e+00 : f32
    %488 = vector.broadcast %cst_102 : f32 to vector<8x96xf32>
    %489 = arith.addf %488, %487 : vector<8x96xf32>
    %490 = arith.divf %488, %489 : vector<8x96xf32>
    %491 = vector.extract_strided_slice %468 {offsets = [0, 96], sizes = [8, 32], strides = [1, 1]} : vector<8x128xf32> to vector<8x32xf32>
    %492 = math.tanh %491 : vector<8x32xf32>
    %493 = vector.extract_strided_slice %490 {offsets = [0, 0], sizes = [8, 32], strides = [1, 1]} : vector<8x96xf32> to vector<8x32xf32>
    %494 = arith.mulf %493, %454 : vector<8x32xf32>
    %495 = vector.extract_strided_slice %490 {offsets = [0, 32], sizes = [8, 32], strides = [1, 1]} : vector<8x96xf32> to vector<8x32xf32>
    %496 = arith.mulf %495, %492 : vector<8x32xf32>
    %497 = arith.addf %494, %496 : vector<8x32xf32>
    %498 = vector.extract_strided_slice %490 {offsets = [0, 64], sizes = [8, 32], strides = [1, 1]} : vector<8x96xf32> to vector<8x32xf32>
    %499 = math.tanh %497 : vector<8x32xf32>
    %500 = arith.mulf %498, %499 : vector<8x32xf32>
    %c16_103 = arith.constant 16 : index
    %c0_104 = arith.constant 0 : index
    %501 = vector.load %arg21[%c16_103, %c0_104] : memref<64x64xf32, #tpu.memory_space<vmem>>, vector<8x32xf32>
    tpu.vector_store %arg21[%c16_103, %c0_104], %484 {strides = array<i32>} : memref<64x64xf32, #tpu.memory_space<vmem>>, vector<8x32xf32>,
    %c40_105 = arith.constant 40 : index
    %c32_106 = arith.constant 32 : index
    %502 = vector.load %arg21[%c40_105, %c32_106] : memref<64x64xf32, #tpu.memory_space<vmem>>, vector<8x32xf32>
    tpu.vector_store %arg21[%c40_105, %c32_106], %500 {strides = array<i32>} : memref<64x64xf32, #tpu.memory_space<vmem>>, vector<8x32xf32>,
    %503 = tpu.concatenate %484, %500 in 1 : vector<8x32xf32>, vector<8x32xf32> -> vector<8x64xf32>
    %504 = arith.truncf %503 : vector<8x64xf32> to vector<8x64xbf16>
    %cst_107 = arith.constant dense<0.000000e+00> : vector<8x256xf32>
    %505 = tpu.matmul %504, %369, %cst_107 {dimension_numbers = #tpu.dot_dimension_numbers<[1], [0], [0], [1], [0, 0, 1, 1], [], []>} : vector<8x64xbf16>, vector<64x256xbf16>, vector<8x256xf32> -> vector<8x256xf32>
    %506 = vector.extract_strided_slice %505 {offsets = [0, 0], sizes = [8, 128], strides = [1, 1]} : vector<8x256xf32> to vector<8x128xf32>
    %507 = vector.extract_strided_slice %368 {offsets = [24, 0], sizes = [8, 128], strides = [1, 1]} : vector<64x256xf32> to vector<8x128xf32>
    %508 = arith.addf %506, %507 : vector<8x128xf32>
    %509 = vector.extract_strided_slice %505 {offsets = [0, 128], sizes = [8, 128], strides = [1, 1]} : vector<8x256xf32> to vector<8x128xf32>
    %510 = vector.extract_strided_slice %368 {offsets = [32, 128], sizes = [8, 128], strides = [1, 1]} : vector<64x256xf32> to vector<8x128xf32>
    %511 = arith.addf %509, %510 : vector<8x128xf32>
    %512 = vector.extract_strided_slice %508 {offsets = [0, 0], sizes = [8, 96], strides = [1, 1]} : vector<8x128xf32> to vector<8x96xf32>
    %513 = arith.negf %512 : vector<8x96xf32>
    %514 = math.exp %513 : vector<8x96xf32>
    %cst_108 = arith.constant 1.000000e+00 : f32
    %515 = vector.broadcast %cst_108 : f32 to vector<8x96xf32>
    %516 = arith.addf %515, %514 : vector<8x96xf32>
    %517 = arith.divf %515, %516 : vector<8x96xf32>
    %518 = vector.extract_strided_slice %508 {offsets = [0, 96], sizes = [8, 32], strides = [1, 1]} : vector<8x128xf32> to vector<8x32xf32>
    %519 = math.tanh %518 : vector<8x32xf32>
    %520 = vector.extract_strided_slice %517 {offsets = [0, 0], sizes = [8, 32], strides = [1, 1]} : vector<8x96xf32> to vector<8x32xf32>
    %521 = arith.mulf %520, %481 : vector<8x32xf32>
    %522 = vector.extract_strided_slice %517 {offsets = [0, 32], sizes = [8, 32], strides = [1, 1]} : vector<8x96xf32> to vector<8x32xf32>
    %523 = arith.mulf %522, %519 : vector<8x32xf32>
    %524 = arith.addf %521, %523 : vector<8x32xf32>
    %525 = vector.extract_strided_slice %517 {offsets = [0, 64], sizes = [8, 32], strides = [1, 1]} : vector<8x96xf32> to vector<8x32xf32>
    %526 = math.tanh %524 : vector<8x32xf32>
    %527 = arith.mulf %525, %526 : vector<8x32xf32>
    %528 = vector.extract_strided_slice %511 {offsets = [0, 0], sizes = [8, 96], strides = [1, 1]} : vector<8x128xf32> to vector<8x96xf32>
    %529 = arith.negf %528 : vector<8x96xf32>
    %530 = math.exp %529 : vector<8x96xf32>
    %cst_109 = arith.constant 1.000000e+00 : f32
    %531 = vector.broadcast %cst_109 : f32 to vector<8x96xf32>
    %532 = arith.addf %531, %530 : vector<8x96xf32>
    %533 = arith.divf %531, %532 : vector<8x96xf32>
    %534 = vector.extract_strided_slice %511 {offsets = [0, 96], sizes = [8, 32], strides = [1, 1]} : vector<8x128xf32> to vector<8x32xf32>
    %535 = math.tanh %534 : vector<8x32xf32>
    %536 = vector.extract_strided_slice %533 {offsets = [0, 0], sizes = [8, 32], strides = [1, 1]} : vector<8x96xf32> to vector<8x32xf32>
    %537 = arith.mulf %536, %497 : vector<8x32xf32>
    %538 = vector.extract_strided_slice %533 {offsets = [0, 32], sizes = [8, 32], strides = [1, 1]} : vector<8x96xf32> to vector<8x32xf32>
    %539 = arith.mulf %538, %535 : vector<8x32xf32>
    %540 = arith.addf %537, %539 : vector<8x32xf32>
    %541 = vector.extract_strided_slice %533 {offsets = [0, 64], sizes = [8, 32], strides = [1, 1]} : vector<8x96xf32> to vector<8x32xf32>
    %542 = math.tanh %540 : vector<8x32xf32>
    %543 = arith.mulf %541, %542 : vector<8x32xf32>
    %c24_110 = arith.constant 24 : index
    %c0_111 = arith.constant 0 : index
    %544 = vector.load %arg21[%c24_110, %c0_111] : memref<64x64xf32, #tpu.memory_space<vmem>>, vector<8x32xf32>
    tpu.vector_store %arg21[%c24_110, %c0_111], %527 {strides = array<i32>} : memref<64x64xf32, #tpu.memory_space<vmem>>, vector<8x32xf32>,
    %c32_112 = arith.constant 32 : index
    %c32_113 = arith.constant 32 : index
    %545 = vector.load %arg21[%c32_112, %c32_113] : memref<64x64xf32, #tpu.memory_space<vmem>>, vector<8x32xf32>
    tpu.vector_store %arg21[%c32_112, %c32_113], %543 {strides = array<i32>} : memref<64x64xf32, #tpu.memory_space<vmem>>, vector<8x32xf32>,
    %546 = tpu.concatenate %527, %543 in 1 : vector<8x32xf32>, vector<8x32xf32> -> vector<8x64xf32>
    %547 = arith.truncf %546 : vector<8x64xf32> to vector<8x64xbf16>
    %cst_114 = arith.constant dense<0.000000e+00> : vector<8x256xf32>
    %548 = tpu.matmul %547, %369, %cst_114 {dimension_numbers = #tpu.dot_dimension_numbers<[1], [0], [0], [1], [0, 0, 1, 1], [], []>} : vector<8x64xbf16>, vector<64x256xbf16>, vector<8x256xf32> -> vector<8x256xf32>
    %549 = vector.extract_strided_slice %548 {offsets = [0, 0], sizes = [8, 128], strides = [1, 1]} : vector<8x256xf32> to vector<8x128xf32>
    %550 = vector.extract_strided_slice %368 {offsets = [32, 0], sizes = [8, 128], strides = [1, 1]} : vector<64x256xf32> to vector<8x128xf32>
    %551 = arith.addf %549, %550 : vector<8x128xf32>
    %552 = vector.extract_strided_slice %548 {offsets = [0, 128], sizes = [8, 128], strides = [1, 1]} : vector<8x256xf32> to vector<8x128xf32>
    %553 = vector.extract_strided_slice %368 {offsets = [24, 128], sizes = [8, 128], strides = [1, 1]} : vector<64x256xf32> to vector<8x128xf32>
    %554 = arith.addf %552, %553 : vector<8x128xf32>
    %555 = vector.extract_strided_slice %551 {offsets = [0, 0], sizes = [8, 96], strides = [1, 1]} : vector<8x128xf32> to vector<8x96xf32>
    %556 = arith.negf %555 : vector<8x96xf32>
    %557 = math.exp %556 : vector<8x96xf32>
    %cst_115 = arith.constant 1.000000e+00 : f32
    %558 = vector.broadcast %cst_115 : f32 to vector<8x96xf32>
    %559 = arith.addf %558, %557 : vector<8x96xf32>
    %560 = arith.divf %558, %559 : vector<8x96xf32>
    %561 = vector.extract_strided_slice %551 {offsets = [0, 96], sizes = [8, 32], strides = [1, 1]} : vector<8x128xf32> to vector<8x32xf32>
    %562 = math.tanh %561 : vector<8x32xf32>
    %563 = vector.extract_strided_slice %560 {offsets = [0, 0], sizes = [8, 32], strides = [1, 1]} : vector<8x96xf32> to vector<8x32xf32>
    %564 = arith.mulf %563, %524 : vector<8x32xf32>
    %565 = vector.extract_strided_slice %560 {offsets = [0, 32], sizes = [8, 32], strides = [1, 1]} : vector<8x96xf32> to vector<8x32xf32>
    %566 = arith.mulf %565, %562 : vector<8x32xf32>
    %567 = arith.addf %564, %566 : vector<8x32xf32>
    %568 = vector.extract_strided_slice %560 {offsets = [0, 64], sizes = [8, 32], strides = [1, 1]} : vector<8x96xf32> to vector<8x32xf32>
    %569 = math.tanh %567 : vector<8x32xf32>
    %570 = arith.mulf %568, %569 : vector<8x32xf32>
    %571 = vector.extract_strided_slice %554 {offsets = [0, 0], sizes = [8, 96], strides = [1, 1]} : vector<8x128xf32> to vector<8x96xf32>
    %572 = arith.negf %571 : vector<8x96xf32>
    %573 = math.exp %572 : vector<8x96xf32>
    %cst_116 = arith.constant 1.000000e+00 : f32
    %574 = vector.broadcast %cst_116 : f32 to vector<8x96xf32>
    %575 = arith.addf %574, %573 : vector<8x96xf32>
    %576 = arith.divf %574, %575 : vector<8x96xf32>
    %577 = vector.extract_strided_slice %554 {offsets = [0, 96], sizes = [8, 32], strides = [1, 1]} : vector<8x128xf32> to vector<8x32xf32>
    %578 = math.tanh %577 : vector<8x32xf32>
    %579 = vector.extract_strided_slice %576 {offsets = [0, 0], sizes = [8, 32], strides = [1, 1]} : vector<8x96xf32> to vector<8x32xf32>
    %580 = arith.mulf %579, %540 : vector<8x32xf32>
    %581 = vector.extract_strided_slice %576 {offsets = [0, 32], sizes = [8, 32], strides = [1, 1]} : vector<8x96xf32> to vector<8x32xf32>
    %582 = arith.mulf %581, %578 : vector<8x32xf32>
    %583 = arith.addf %580, %582 : vector<8x32xf32>
    %584 = vector.extract_strided_slice %576 {offsets = [0, 64], sizes = [8, 32], strides = [1, 1]} : vector<8x96xf32> to vector<8x32xf32>
    %585 = math.tanh %583 : vector<8x32xf32>
    %586 = arith.mulf %584, %585 : vector<8x32xf32>
    %c32_117 = arith.constant 32 : index
    %c0_118 = arith.constant 0 : index
    %587 = vector.load %arg21[%c32_117, %c0_118] : memref<64x64xf32, #tpu.memory_space<vmem>>, vector<8x32xf32>
    tpu.vector_store %arg21[%c32_117, %c0_118], %570 {strides = array<i32>} : memref<64x64xf32, #tpu.memory_space<vmem>>, vector<8x32xf32>,
    %c24_119 = arith.constant 24 : index
    %c32_120 = arith.constant 32 : index
    %588 = vector.load %arg21[%c24_119, %c32_120] : memref<64x64xf32, #tpu.memory_space<vmem>>, vector<8x32xf32>
    tpu.vector_store %arg21[%c24_119, %c32_120], %586 {strides = array<i32>} : memref<64x64xf32, #tpu.memory_space<vmem>>, vector<8x32xf32>,
    %589 = tpu.concatenate %570, %586 in 1 : vector<8x32xf32>, vector<8x32xf32> -> vector<8x64xf32>
    %590 = arith.truncf %589 : vector<8x64xf32> to vector<8x64xbf16>
    %cst_121 = arith.constant dense<0.000000e+00> : vector<8x256xf32>
    %591 = tpu.matmul %590, %369, %cst_121 {dimension_numbers = #tpu.dot_dimension_numbers<[1], [0], [0], [1], [0, 0, 1, 1], [], []>} : vector<8x64xbf16>, vector<64x256xbf16>, vector<8x256xf32> -> vector<8x256xf32>
    %592 = vector.extract_strided_slice %591 {offsets = [0, 0], sizes = [8, 128], strides = [1, 1]} : vector<8x256xf32> to vector<8x128xf32>
    %593 = vector.extract_strided_slice %368 {offsets = [40, 0], sizes = [8, 128], strides = [1, 1]} : vector<64x256xf32> to vector<8x128xf32>
    %594 = arith.addf %592, %593 : vector<8x128xf32>
    %595 = vector.extract_strided_slice %591 {offsets = [0, 128], sizes = [8, 128], strides = [1, 1]} : vector<8x256xf32> to vector<8x128xf32>
    %596 = vector.extract_strided_slice %368 {offsets = [16, 128], sizes = [8, 128], strides = [1, 1]} : vector<64x256xf32> to vector<8x128xf32>
    %597 = arith.addf %595, %596 : vector<8x128xf32>
    %598 = vector.extract_strided_slice %594 {offsets = [0, 0], sizes = [8, 96], strides = [1, 1]} : vector<8x128xf32> to vector<8x96xf32>
    %599 = arith.negf %598 : vector<8x96xf32>
    %600 = math.exp %599 : vector<8x96xf32>
    %cst_122 = arith.constant 1.000000e+00 : f32
    %601 = vector.broadcast %cst_122 : f32 to vector<8x96xf32>
    %602 = arith.addf %601, %600 : vector<8x96xf32>
    %603 = arith.divf %601, %602 : vector<8x96xf32>
    %604 = vector.extract_strided_slice %594 {offsets = [0, 96], sizes = [8, 32], strides = [1, 1]} : vector<8x128xf32> to vector<8x32xf32>
    %605 = math.tanh %604 : vector<8x32xf32>
    %606 = vector.extract_strided_slice %603 {offsets = [0, 0], sizes = [8, 32], strides = [1, 1]} : vector<8x96xf32> to vector<8x32xf32>
    %607 = arith.mulf %606, %567 : vector<8x32xf32>
    %608 = vector.extract_strided_slice %603 {offsets = [0, 32], sizes = [8, 32], strides = [1, 1]} : vector<8x96xf32> to vector<8x32xf32>
    %609 = arith.mulf %608, %605 : vector<8x32xf32>
    %610 = arith.addf %607, %609 : vector<8x32xf32>
    %611 = vector.extract_strided_slice %603 {offsets = [0, 64], sizes = [8, 32], strides = [1, 1]} : vector<8x96xf32> to vector<8x32xf32>
    %612 = math.tanh %610 : vector<8x32xf32>
    %613 = arith.mulf %611, %612 : vector<8x32xf32>
    %614 = vector.extract_strided_slice %597 {offsets = [0, 0], sizes = [8, 96], strides = [1, 1]} : vector<8x128xf32> to vector<8x96xf32>
    %615 = arith.negf %614 : vector<8x96xf32>
    %616 = math.exp %615 : vector<8x96xf32>
    %cst_123 = arith.constant 1.000000e+00 : f32
    %617 = vector.broadcast %cst_123 : f32 to vector<8x96xf32>
    %618 = arith.addf %617, %616 : vector<8x96xf32>
    %619 = arith.divf %617, %618 : vector<8x96xf32>
    %620 = vector.extract_strided_slice %597 {offsets = [0, 96], sizes = [8, 32], strides = [1, 1]} : vector<8x128xf32> to vector<8x32xf32>
    %621 = math.tanh %620 : vector<8x32xf32>
    %622 = vector.extract_strided_slice %619 {offsets = [0, 0], sizes = [8, 32], strides = [1, 1]} : vector<8x96xf32> to vector<8x32xf32>
    %623 = arith.mulf %622, %583 : vector<8x32xf32>
    %624 = vector.extract_strided_slice %619 {offsets = [0, 32], sizes = [8, 32], strides = [1, 1]} : vector<8x96xf32> to vector<8x32xf32>
    %625 = arith.mulf %624, %621 : vector<8x32xf32>
    %626 = arith.addf %623, %625 : vector<8x32xf32>
    %627 = vector.extract_strided_slice %619 {offsets = [0, 64], sizes = [8, 32], strides = [1, 1]} : vector<8x96xf32> to vector<8x32xf32>
    %628 = math.tanh %626 : vector<8x32xf32>
    %629 = arith.mulf %627, %628 : vector<8x32xf32>
    %c40_124 = arith.constant 40 : index
    %c0_125 = arith.constant 0 : index
    %630 = vector.load %arg21[%c40_124, %c0_125] : memref<64x64xf32, #tpu.memory_space<vmem>>, vector<8x32xf32>
    tpu.vector_store %arg21[%c40_124, %c0_125], %613 {strides = array<i32>} : memref<64x64xf32, #tpu.memory_space<vmem>>, vector<8x32xf32>,
    %c16_126 = arith.constant 16 : index
    %c32_127 = arith.constant 32 : index
    %631 = vector.load %arg21[%c16_126, %c32_127] : memref<64x64xf32, #tpu.memory_space<vmem>>, vector<8x32xf32>
    tpu.vector_store %arg21[%c16_126, %c32_127], %629 {strides = array<i32>} : memref<64x64xf32, #tpu.memory_space<vmem>>, vector<8x32xf32>,
    %632 = tpu.concatenate %613, %629 in 1 : vector<8x32xf32>, vector<8x32xf32> -> vector<8x64xf32>
    %633 = arith.truncf %632 : vector<8x64xf32> to vector<8x64xbf16>
    %cst_128 = arith.constant dense<0.000000e+00> : vector<8x256xf32>
    %634 = tpu.matmul %633, %369, %cst_128 {dimension_numbers = #tpu.dot_dimension_numbers<[1], [0], [0], [1], [0, 0, 1, 1], [], []>} : vector<8x64xbf16>, vector<64x256xbf16>, vector<8x256xf32> -> vector<8x256xf32>
    %635 = vector.extract_strided_slice %634 {offsets = [0, 0], sizes = [8, 128], strides = [1, 1]} : vector<8x256xf32> to vector<8x128xf32>
    %636 = vector.extract_strided_slice %368 {offsets = [48, 0], sizes = [8, 128], strides = [1, 1]} : vector<64x256xf32> to vector<8x128xf32>
    %637 = arith.addf %635, %636 : vector<8x128xf32>
    %638 = vector.extract_strided_slice %634 {offsets = [0, 128], sizes = [8, 128], strides = [1, 1]} : vector<8x256xf32> to vector<8x128xf32>
    %639 = vector.extract_strided_slice %368 {offsets = [8, 128], sizes = [8, 128], strides = [1, 1]} : vector<64x256xf32> to vector<8x128xf32>
    %640 = arith.addf %638, %639 : vector<8x128xf32>
    %641 = vector.extract_strided_slice %637 {offsets = [0, 0], sizes = [8, 96], strides = [1, 1]} : vector<8x128xf32> to vector<8x96xf32>
    %642 = arith.negf %641 : vector<8x96xf32>
    %643 = math.exp %642 : vector<8x96xf32>
    %cst_129 = arith.constant 1.000000e+00 : f32
    %644 = vector.broadcast %cst_129 : f32 to vector<8x96xf32>
    %645 = arith.addf %644, %643 : vector<8x96xf32>
    %646 = arith.divf %644, %645 : vector<8x96xf32>
    %647 = vector.extract_strided_slice %637 {offsets = [0, 96], sizes = [8, 32], strides = [1, 1]} : vector<8x128xf32> to vector<8x32xf32>
    %648 = math.tanh %647 : vector<8x32xf32>
    %649 = vector.extract_strided_slice %646 {offsets = [0, 0], sizes = [8, 32], strides = [1, 1]} : vector<8x96xf32> to vector<8x32xf32>
    %650 = arith.mulf %649, %610 : vector<8x32xf32>
    %651 = vector.extract_strided_slice %646 {offsets = [0, 32], sizes = [8, 32], strides = [1, 1]} : vector<8x96xf32> to vector<8x32xf32>
    %652 = arith.mulf %651, %648 : vector<8x32xf32>
    %653 = arith.addf %650, %652 : vector<8x32xf32>
    %654 = vector.extract_strided_slice %646 {offsets = [0, 64], sizes = [8, 32], strides = [1, 1]} : vector<8x96xf32> to vector<8x32xf32>
    %655 = math.tanh %653 : vector<8x32xf32>
    %656 = arith.mulf %654, %655 : vector<8x32xf32>
    %657 = vector.extract_strided_slice %640 {offsets = [0, 0], sizes = [8, 96], strides = [1, 1]} : vector<8x128xf32> to vector<8x96xf32>
    %658 = arith.negf %657 : vector<8x96xf32>
    %659 = math.exp %658 : vector<8x96xf32>
    %cst_130 = arith.constant 1.000000e+00 : f32
    %660 = vector.broadcast %cst_130 : f32 to vector<8x96xf32>
    %661 = arith.addf %660, %659 : vector<8x96xf32>
    %662 = arith.divf %660, %661 : vector<8x96xf32>
    %663 = vector.extract_strided_slice %640 {offsets = [0, 96], sizes = [8, 32], strides = [1, 1]} : vector<8x128xf32> to vector<8x32xf32>
    %664 = math.tanh %663 : vector<8x32xf32>
    %665 = vector.extract_strided_slice %662 {offsets = [0, 0], sizes = [8, 32], strides = [1, 1]} : vector<8x96xf32> to vector<8x32xf32>
    %666 = arith.mulf %665, %626 : vector<8x32xf32>
    %667 = vector.extract_strided_slice %662 {offsets = [0, 32], sizes = [8, 32], strides = [1, 1]} : vector<8x96xf32> to vector<8x32xf32>
    %668 = arith.mulf %667, %664 : vector<8x32xf32>
    %669 = arith.addf %666, %668 : vector<8x32xf32>
    %670 = vector.extract_strided_slice %662 {offsets = [0, 64], sizes = [8, 32], strides = [1, 1]} : vector<8x96xf32> to vector<8x32xf32>
    %671 = math.tanh %669 : vector<8x32xf32>
    %672 = arith.mulf %670, %671 : vector<8x32xf32>
    %c48_131 = arith.constant 48 : index
    %c0_132 = arith.constant 0 : index
    %673 = vector.load %arg21[%c48_131, %c0_132] : memref<64x64xf32, #tpu.memory_space<vmem>>, vector<8x32xf32>
    tpu.vector_store %arg21[%c48_131, %c0_132], %656 {strides = array<i32>} : memref<64x64xf32, #tpu.memory_space<vmem>>, vector<8x32xf32>,
    %c8_133 = arith.constant 8 : index
    %c32_134 = arith.constant 32 : index
    %674 = vector.load %arg21[%c8_133, %c32_134] : memref<64x64xf32, #tpu.memory_space<vmem>>, vector<8x32xf32>
    tpu.vector_store %arg21[%c8_133, %c32_134], %672 {strides = array<i32>} : memref<64x64xf32, #tpu.memory_space<vmem>>, vector<8x32xf32>,
    %675 = tpu.concatenate %656, %672 in 1 : vector<8x32xf32>, vector<8x32xf32> -> vector<8x64xf32>
    %676 = arith.truncf %675 : vector<8x64xf32> to vector<8x64xbf16>
    %cst_135 = arith.constant dense<0.000000e+00> : vector<8x256xf32>
    %677 = tpu.matmul %676, %369, %cst_135 {dimension_numbers = #tpu.dot_dimension_numbers<[1], [0], [0], [1], [0, 0, 1, 1], [], []>} : vector<8x64xbf16>, vector<64x256xbf16>, vector<8x256xf32> -> vector<8x256xf32>
    %678 = vector.extract_strided_slice %677 {offsets = [0, 0], sizes = [8, 128], strides = [1, 1]} : vector<8x256xf32> to vector<8x128xf32>
    %679 = vector.extract_strided_slice %368 {offsets = [56, 0], sizes = [8, 128], strides = [1, 1]} : vector<64x256xf32> to vector<8x128xf32>
    %680 = arith.addf %678, %679 : vector<8x128xf32>
    %681 = vector.extract_strided_slice %677 {offsets = [0, 128], sizes = [8, 128], strides = [1, 1]} : vector<8x256xf32> to vector<8x128xf32>
    %682 = vector.extract_strided_slice %368 {offsets = [0, 128], sizes = [8, 128], strides = [1, 1]} : vector<64x256xf32> to vector<8x128xf32>
    %683 = arith.addf %681, %682 : vector<8x128xf32>
    %684 = vector.extract_strided_slice %680 {offsets = [0, 0], sizes = [8, 96], strides = [1, 1]} : vector<8x128xf32> to vector<8x96xf32>
    %685 = arith.negf %684 : vector<8x96xf32>
    %686 = math.exp %685 : vector<8x96xf32>
    %cst_136 = arith.constant 1.000000e+00 : f32
    %687 = vector.broadcast %cst_136 : f32 to vector<8x96xf32>
    %688 = arith.addf %687, %686 : vector<8x96xf32>
    %689 = arith.divf %687, %688 : vector<8x96xf32>
    %690 = vector.extract_strided_slice %680 {offsets = [0, 96], sizes = [8, 32], strides = [1, 1]} : vector<8x128xf32> to vector<8x32xf32>
    %691 = math.tanh %690 : vector<8x32xf32>
    %692 = vector.extract_strided_slice %689 {offsets = [0, 0], sizes = [8, 32], strides = [1, 1]} : vector<8x96xf32> to vector<8x32xf32>
    %693 = arith.mulf %692, %653 : vector<8x32xf32>
    %694 = vector.extract_strided_slice %689 {offsets = [0, 32], sizes = [8, 32], strides = [1, 1]} : vector<8x96xf32> to vector<8x32xf32>
    %695 = arith.mulf %694, %691 : vector<8x32xf32>
    %696 = arith.addf %693, %695 : vector<8x32xf32>
    %697 = vector.extract_strided_slice %689 {offsets = [0, 64], sizes = [8, 32], strides = [1, 1]} : vector<8x96xf32> to vector<8x32xf32>
    %698 = math.tanh %696 : vector<8x32xf32>
    %699 = arith.mulf %697, %698 : vector<8x32xf32>
    %700 = vector.extract_strided_slice %683 {offsets = [0, 0], sizes = [8, 96], strides = [1, 1]} : vector<8x128xf32> to vector<8x96xf32>
    %701 = arith.negf %700 : vector<8x96xf32>
    %702 = math.exp %701 : vector<8x96xf32>
    %cst_137 = arith.constant 1.000000e+00 : f32
    %703 = vector.broadcast %cst_137 : f32 to vector<8x96xf32>
    %704 = arith.addf %703, %702 : vector<8x96xf32>
    %705 = arith.divf %703, %704 : vector<8x96xf32>
    %706 = vector.extract_strided_slice %683 {offsets = [0, 96], sizes = [8, 32], strides = [1, 1]} : vector<8x128xf32> to vector<8x32xf32>
    %707 = math.tanh %706 : vector<8x32xf32>
    %708 = vector.extract_strided_slice %705 {offsets = [0, 0], sizes = [8, 32], strides = [1, 1]} : vector<8x96xf32> to vector<8x32xf32>
    %709 = arith.mulf %708, %669 : vector<8x32xf32>
    %710 = vector.extract_strided_slice %705 {offsets = [0, 32], sizes = [8, 32], strides = [1, 1]} : vector<8x96xf32> to vector<8x32xf32>
    %711 = arith.mulf %710, %707 : vector<8x32xf32>
    %712 = arith.addf %709, %711 : vector<8x32xf32>
    %713 = vector.extract_strided_slice %705 {offsets = [0, 64], sizes = [8, 32], strides = [1, 1]} : vector<8x96xf32> to vector<8x32xf32>
    %714 = math.tanh %712 : vector<8x32xf32>
    %715 = arith.mulf %713, %714 : vector<8x32xf32>
    %c56_138 = arith.constant 56 : index
    %c0_139 = arith.constant 0 : index
    %716 = vector.load %arg21[%c56_138, %c0_139] : memref<64x64xf32, #tpu.memory_space<vmem>>, vector<8x32xf32>
    tpu.vector_store %arg21[%c56_138, %c0_139], %699 {strides = array<i32>} : memref<64x64xf32, #tpu.memory_space<vmem>>, vector<8x32xf32>,
    %c0_140 = arith.constant 0 : index
    %c32_141 = arith.constant 32 : index
    %717 = vector.load %arg21[%c0_140, %c32_141] : memref<64x64xf32, #tpu.memory_space<vmem>>, vector<8x32xf32>
    tpu.vector_store %arg21[%c0_140, %c32_141], %715 {strides = array<i32>} : memref<64x64xf32, #tpu.memory_space<vmem>>, vector<8x32xf32>,
    %c0_142 = arith.constant 0 : index
    %c0_143 = arith.constant 0 : index
    %718 = vector.load %arg21[%c0_142, %c0_143] : memref<64x64xf32, #tpu.memory_space<vmem>>, vector<64x64xf32>
    %719 = arith.truncf %718 : vector<64x64xf32> to vector<64x64xbf16>
    %c0_144 = arith.constant 0 : index
    %c0_145 = arith.constant 0 : index
    %720 = vector.load %arg17[%c0_144, %c0_145] : memref<64x128xbf16, #tpu.memory_space<vmem>>, vector<64x128xbf16>
    %cst_146 = arith.constant dense<0.000000e+00> : vector<64x128xf32>
    %721 = tpu.matmul %719, %720, %cst_146 {dimension_numbers = #tpu.dot_dimension_numbers<[1], [0], [0], [1], [0, 0, 1, 1], [], []>} : vector<64x64xbf16>, vector<64x128xbf16>, vector<64x128xf32> -> vector<64x128xf32>
    %c0_147 = arith.constant 0 : index
    %c0_148 = arith.constant 0 : index
    %722 = vector.load %arg18[%c0_147, %c0_148] : memref<1x128xf32, #tpu.memory_space<vmem>>, vector<1x128xf32>
    %723 = vector.broadcast %722 : vector<1x128xf32> to vector<64x128xf32>
    %724 = arith.addf %721, %723 : vector<64x128xf32>
    %c56_149 = arith.constant 56 : index
    %c0_150 = arith.constant 0 : index
    %725 = vector.load %arg21[%c56_149, %c0_150] : memref<64x64xf32, #tpu.memory_space<vmem>>, vector<8x64xf32>
    %c0_151 = arith.constant 0 : index
    %c0_152 = arith.constant 0 : index
    %726 = vector.load %arg20[%c0_151, %c0_152] : memref<8x64xf32, #tpu.memory_space<vmem>>, vector<8x64xf32>
    tpu.vector_store %arg20[%c0_151, %c0_152], %725 {strides = array<i32>} : memref<8x64xf32, #tpu.memory_space<vmem>>, vector<8x64xf32>,
    %c0_153 = arith.constant 0 : index
    %c0_154 = arith.constant 0 : index
    %727 = vector.load %arg19[%c0_153, %c0_154] : memref<64x128xf32, #tpu.memory_space<vmem>>, vector<64x128xf32>
    tpu.vector_store %arg19[%c0_153, %c0_154], %724 {strides = array<i32>} : memref<64x128xf32, #tpu.memory_space<vmem>>, vector<64x128xf32>,
    return
  }
}

</mosaic_0001>

<bundles_post_ra>
// kernel: tpu_custom_call.1
= control target key start
LH: loop header
LB: loop body
LE: loop exit
PB: predicated region body
PF: predicated region fallthrough
CT: control target
= control target key end

     0   :  { %s4364_s0 = inlined_call_operand.vmem [shape: f32[64,16], index: 0, kind: input, shape index: {}]   ;;  %s4365_s1 = inlined_call_operand.hbm [shape: f32[8,32], index: 1, kind: input, shape index: {}]   ;;  %s4366_s2 = inlined_call_operand.hbm [shape: f32[8,32], index: 2, kind: input, shape index: {}]   ;;  %s4367_s3 = inlined_call_operand.hbm [shape: f32[8,32], index: 3, kind: input, shape index: {}]   ;;  %s4368_s4 = inlined_call_operand.hbm [shape: f32[8,32], index: 4, kind: input, shape index: {}]   ;;  %s4369_s5 = inlined_call_operand.vmem [shape: bf16[16,256], index: 5, kind: input, shape index: {}]   ;;  %s4370_s6 = inlined_call_operand.hbm [shape: f32[1,256], index: 6, kind: input, shape index: {}]   ;;  %s4371_s7 = inlined_call_operand.vmem [shape: bf16[64,256], index: 7, kind: input, shape index: {}]   ;;  %s4372_s8 = inlined_call_operand.vmem [shape: bf16[64,32], index: 8, kind: input, shape index: {}]   ;;  %s4373_s9 = inlined_call_operand.vmem [shape: f32[1,32], index: 9, kind: input, shape index: {}]   ;;  %s4374_s10 = inlined_call_operand.vmem [shape: f32[8,32], index: 10, kind: input, shape index: {}]   ;;  %s4375_s11 = inlined_call_operand.hbm [shape: f32[8,32], index: 11, kind: input, shape index: {}]   ;;  %s4376_s12 = inlined_call_operand.hbm [shape: f32[8,32], index: 12, kind: input, shape index: {}]   ;;  %s4377_s13 = inlined_call_operand.hbm [shape: f32[8,32], index: 13, kind: input, shape index: {}]   ;;  %s4378_s14 = inlined_call_operand.vmem [shape: bf16[32,256], index: 14, kind: input, shape index: {}]   ;;  %s4379_s15 = inlined_call_operand.vmem [shape: f32[1,256], index: 15, kind: input, shape index: {}]   ;;  %s4380_s16 = inlined_call_operand.hbm [shape: bf16[64,256], index: 16, kind: input, shape index: {}]   ;;  %s4381_s17 = inlined_call_operand.hbm [shape: bf16[64,128], index: 17, kind: input, shape index: {}]   ;;  %s4382_s18 = inlined_call_operand.vmem [shape: f32[1,128], index: 18, kind: input, shape index: {}]   ;;  %s4383_s19 = inlined_call_operand.hbm [shape: f32[64,128], index: 19, kind: output, shape index: {0}]   ;;  %s4384_s20 = inlined_call_operand.hbm [shape: f32[8,64], index: 20, kind: output, shape index: {1}]  }
   0x1   :  { %4386 = sst [smem:[#allocation31_spill]] %s4364_s0 }
   0x2   :  { %4387 = sst [smem:[#allocation32_spill]] %s4365_s1 }
   0x3   :  { %4388 = sst [smem:[#allocation33_spill]] %s4366_s2 }
   0x4   :  { %4389 = sst [smem:[#allocation34_spill]] %s4367_s3 }
   0x5   :  { %4390 = sst [smem:[#allocation35_spill]] %s4368_s4 }
   0x6   :  { %4391 = sst [smem:[#allocation36_spill]] %s4383_s19 }
   0x7   :  { %26 = vsyncpa [#allocation4], 0 }
   0x8   :  { %27 = vsyncpa [#allocation7], 0 }
   0x9   :  { %28 = vsyncpa [#allocation10], 0 }
   0xa   :  { %29 = vsyncpa [#allocation13], 0 }
   0xb   :  { %30 = vsyncpa [#allocation16], 0 }
   0xc   :  { %31 = vsyncpa [#allocation19], 0 }
   0xd   :  { %32 = vsyncpa [#allocation5], 0  ;;  %s4392_s23 = sld [smem:[#allocation33_spill]] }
  0x13   :  { %s52_s24 = sshll.u32 %s4392_s23, 4  ;;  %s53_s24 = int_to_ptr.hbm [resolvable:$true] %s52_s24 }
  0x14   :  { %33 = vsyncpa [#allocation22], 0  ;;  %s3447_s2 = smov [#allocation6]   ;;  %s4393_s27 = sld [smem:[#allocation35_spill]] }
  0x15   :  { %s54_s25 = sshll.u32 %s3447_s2, 4  ;;  %s3448_s4 = smov [#allocation9]   ;;  %s55_s25 = int_to_ptr.vmem [resolvable:$true] %s54_s25 }
  0x16   :  { %57 = dma.hbm_to_vmem [thread:$0]  %s53_s24, 128, %s55_s25, [#allocation7]  }
  0x17   :  { %s76_s29 = sshll.u32 %s3448_s4, 4  ;;  %s106_s21 = sshll.u32 %s4375_s11, 4  ;;  %s77_s29 = int_to_ptr.vmem [resolvable:$true] %s76_s29  ;;  %s107_s21 = int_to_ptr.hbm [resolvable:$true] %s106_s21 }
  0x18   :  { %s128_s23 = sshll.u32 %s4377_s13, 4  ;;  %s3449_s2 = smov [#allocation12]   ;;  %s129_s23 = int_to_ptr.hbm [resolvable:$true] %s128_s23 }
  0x19   :  { %s108_s19 = sshll.u32 %s3449_s2, 4  ;;  %s3450_s24 = smov [#allocation15]   ;;  %s109_s19 = int_to_ptr.vmem [resolvable:$true] %s108_s19 }
  0x1a   :  { %s74_s28 = sshll.u32 %s4393_s27, 4  ;;  %s130_s25 = sshll.u32 %s3450_s24, 4  ;;  %s75_s28 = int_to_ptr.hbm [resolvable:$true] %s74_s28  ;;  %s131_s25 = int_to_ptr.vmem [resolvable:$true] %s130_s25 }
  0x1b   :  { %79 = dma.hbm_to_vmem [thread:$0]  %s75_s28, 128, %s77_s29, [#allocation10]  }
  0x1c   :  { %111 = dma.hbm_to_vmem [thread:$0]  %s107_s21, 128, %s109_s19, [#allocation13]  }
  0x1d   :  { %s4394_s27 = sld [smem:[#allocation32_spill]]  ;;  %s3451_s0 = smov [#allocation3]  }
  0x1e   :  { %133 = dma.hbm_to_vmem [thread:$0]  %s129_s23, 128, %s131_s25, [#allocation16]  }
  0x1f   :  { %s4395_s29 = sld [smem:[#allocation34_spill]]  ;;  %s43_s13 = sshll.u32 %s3451_s0, 4  ;;  %s44_s13 = int_to_ptr.vmem [resolvable:$true] %s43_s13 }
  0x20   :  { %s3452_s1 = smov [#allocation8]   ;;  %s87_s2 = sshll.u32 %s4370_s6, 4  ;;  %s88_s2 = int_to_ptr.hbm [resolvable:$true] %s87_s2 }
  0x21   :  { %s65_s19 = sshll.u32 %s3452_s1, 4  ;;  %s117_s25 = sshll.u32 %s4376_s12, 4  ;;  %s66_s19 = int_to_ptr.vmem [resolvable:$true] %s65_s19  ;;  %s118_s25 = int_to_ptr.hbm [resolvable:$true] %s117_s25 }
  0x22   :  { %s3453_s3 = smov [#allocation11]   ;;  %s3455_s6 = smov [#allocation17]  }
  0x23   :  { %s41_s4 = sshll.u32 %s4394_s27, 4  ;;  %s89_s26 = sshll.u32 %s3453_s3, 4  ;;  %s42_s4 = int_to_ptr.hbm [resolvable:$true] %s41_s4  ;;  %s90_s26 = int_to_ptr.vmem [resolvable:$true] %s89_s26 }
  0x24   :  { %46 = dma.hbm_to_vmem [thread:$0]  %s42_s4, 128, %s44_s13, [#allocation4]  }
  0x25   :  { %s63_s30 = sshll.u32 %s4395_s29, 4  ;;  %s3454_s27 = smov [#allocation14]   ;;  %s64_s30 = int_to_ptr.hbm [resolvable:$true] %s63_s30 }
  0x26   :  { %68 = dma.hbm_to_vmem [thread:$0]  %s64_s30, 128, %s66_s19, [#allocation7]  }
  0x27   :  { %92 = dma.hbm_to_vmem [thread:$0]  %s88_s2, 32, %s90_s26, [#allocation10]  }
  0x28   :  { %s119_s4 = sshll.u32 %s3454_s27, 4  ;;  %s142_s29 = sshll.u32 %s4380_s16, 4  ;;  %s120_s4 = int_to_ptr.vmem [resolvable:$true] %s119_s4  ;;  %s143_s29 = int_to_ptr.hbm [resolvable:$true] %s142_s29 }
  0x29   :  { %122 = dma.hbm_to_vmem [thread:$0]  %s118_s25, 128, %s120_s4, [#allocation13]  }
  0x2a   :  { %s144_s30 = sshll.u32 %s3455_s6, 4  ;;  %s155_s12 = sshll.u32 %s4381_s17, 4  ;;  %s145_s30 = int_to_ptr.vmem [resolvable:$true] %s144_s30  ;;  %s156_s12 = int_to_ptr.hbm [resolvable:$true] %s155_s12 }
  0x2b   :  { %s3456_s1 = smov 128   ;;  %s3457_s19 = smov 8  }
  0x2c   :  { %150 = dma.hbm_to_vmem [thread:$0]  %s143_s29, 1024, %s145_s30, [#allocation16], %s3456_s1, %s3456_s1, %s3457_s19  }
  0x2d   :  { %s3458_s21 = smov [#allocation18]   ;;  %s3459_s16 = smov 64  }
  0x2e   :  { %s157_s22 = sshll.u32 %s3458_s21, 4  ;;  %s3460_s2 = smov 4   ;;  %s158_s22 = int_to_ptr.vmem [resolvable:$true] %s157_s22 }
  0x2f   :  { %163 = dma.hbm_to_vmem [thread:$0]  %s156_s12, 512, %s158_s22, [#allocation19], %s3459_s16, %s3459_s16, %s3460_s2  }
  0x30   :  { %3431 = dma.done.wait [#allocation4], 128  }
  0x31   :  { %3432 = vsyncadd [#allocation4], 4294967168 }
  0x32   :  { %3433 = dma.done.wait [#allocation7], 256  }
  0x33   :  { %3434 = vsyncadd [#allocation7], 4294967040 }
  0x34   :  { %3435 = dma.done.wait [#allocation10], 160  }
  0x35   :  { %3436 = vsyncadd [#allocation10], 4294967136 }
  0x36   :  { %3437 = dma.done.wait [#allocation13], 256  }
  0x37   :  { %3438 = vsyncadd [#allocation13], 4294967040 }
  0x38   :  { %3439 = dma.done.wait [#allocation16], 1152  }
  0x39   :  { %3440 = vsyncadd [#allocation16], 4294966144 }
  0x3a   :  { %3441 = dma.done.wait [#allocation19], 512  }
  0x3b   :  { %3442 = vsyncadd [#allocation19], 4294966784  ;;  %v318_v0 = vld [vmem:[#allocation8] sm:$0xff]  ;;  %v2628_v1 = vld [vmem:[%s4369_s5] sm:$0xf]  ;;  %s3461_s3 = smov 32  }
  0x3c   :  { %v2835_v2 = vld [vmem:[%s4369_s5 + $0x4] sm:$0xf0]  ;;  %321 = vrot.lane.b32.xlu0 %v318_v0, %s3461_s3  ;;  %s4396_s4 = sld [smem:[#allocation31_spill]]  ;;  %v2834_v6 = vld [vmem:[%s4369_s5 + $0x4] sm:$0xf]  ;;  %vm237_vm0 = vcmask 130048  }
  0x3d   :  { %v2629_v3 = vor.u32 %v2835_v2, %v2628_v1  ;;  %v2630_v8 = vld [vmem:[%s4369_s5 + $0x8] sm:$0xf0]  ;;  %v2668_v18 = vld [vmem:[%s4371_s7 + $0x30] sm:$0xf]  ;;  %v2843_v20 = vld [vmem:[%s4371_s7 + $0x34] sm:$0xf0] }
  0x3e   :  { %v2633_v11 = vor.u32 %v2834_v6, %v2630_v8  ;;  %v2842_v21 = vld [vmem:[%s4371_s7 + $0x34] sm:$0xf]  ;;  %v2670_v22 = vld [vmem:[%s4371_s7 + $0x38] sm:$0xf0]  ;;  %v3658_v23 = vor.u32 %v2843_v20, %v2668_v18  ;;  %v2660_v25 = vld [vmem:[%s4371_s7 + $0x20] sm:$0xf] }
  0x3f   :  { %2864 = vmatpush.bf16.msra.mxu1 %v2629_v3  ;;  %2865 = vmatpush.bf16.msra.mxu2 %v2629_v3  ;;  %v3660_v24 = vor.u32 %v2842_v21, %v2670_v22  ;;  %v2841_v26 = vld [vmem:[%s4371_s7 + $0x24] sm:$0xf0]  ;;  %v2840_v27 = vld [vmem:[%s4371_s7 + $0x24] sm:$0xf]  ;;  %v2662_v28 = vld [vmem:[%s4371_s7 + $0x28] sm:$0xf0] }
  0x40   :  { %2866 = vmatpush.bf16.msra.mxu3 %v2629_v3  ;;  %257 = vmatpush.bf16.msra.mxu0 %v2629_v3  ;;  %v3677_v29 = vor.u32 %v2841_v26, %v2660_v25  ;;  %v3679_v30 = vor.u32 %v2840_v27, %v2662_v28  ;;  %v2652_v31 = vld [vmem:[%s4371_s7 + $0x10] sm:$0xf]  ;;  %v2839_v32 = vld [vmem:[%s4371_s7 + $0x14] sm:$0xf0]  ;;  %v2838_v33 = vld [vmem:[%s4371_s7 + $0x14] sm:$0xf] }
  0x41   :  { %v2654_v34 = vld [vmem:[%s4371_s7 + $0x18] sm:$0xf0]  ;;  %v3697_v35 = vor.u32 %v2839_v32, %v2652_v31  ;;  %v2644_v37 = vld [vmem:[%s4371_s7] sm:$0xf]  ;;  %v2837_v38 = vld [vmem:[%s4371_s7 + $0x4] sm:$0xf0] }
  0x42   :  { %v209_v4 = vld [vmem:[%s4396_s4 + $0x10] sm:$0xff]  ;;  %v210_v5 = vld [vmem:[%s4396_s4 + $0x18] sm:$0xff]  ;;  %v207_v9 = vld [vmem:[%s4396_s4] sm:$0xff]  ;;  %v3699_v36 = vor.u32 %v2838_v33, %v2654_v34  ;;  %v3719_v40 = vor.u32 %v2837_v38, %v2644_v37  ;;  %vm324_vm1 = vcmask 261120   ;;  %vm367_vm2 = vcmask 523264   ;;  %s2606_s28 = sshll.u32 %s4384_s20, 4  ;;  %s2607_s28 = int_to_ptr.hbm [resolvable:$true] %s2606_s28 }
  0x43   :  { %v216_v7 = vpack.c.bf16 %v210_v5, %v209_v4  ;;  %v208_v10 = vld [vmem:[%s4396_s4 + $0x8] sm:$0xff]  ;;  %286 = vmatpush.bf16.msrb.mxu1 %v2633_v11  ;;  %v211_v13 = vld [vmem:[%s4396_s4 + $0x20] sm:$0xff]  ;;  %v213_v16 = vld [vmem:[%s4396_s4 + $0x30] sm:$0xff]  ;;  %375 = vmatpush.bf16.msrb.mxu2 %v3658_v23  ;;  %vm482_vm11 = vcmask 523520  }
  0x44   :  { %v215_v12 = vpack.c.bf16 %v208_v10, %v207_v9  ;;  %v212_v14 = vld [vmem:[%s4396_s4 + $0x28] sm:$0xff]  ;;  %v214_v17 = vld [vmem:[%s4396_s4 + $0x38] sm:$0xff]  ;;  %388 = vmatpush.bf16.msrb.mxu3 %v3660_v24  ;;  %844 = vmatpush.bf16.msrb.mxu0 %v3658_v23  ;;  %v2836_v39 = vld [vmem:[%s4371_s7 + $0x4] sm:$0xf] }
  0x45   :  { %2635 = vmatmul.msk.bf16.vlgmr.msra.gmra.mxu1 %vm237_vm0, %v216_v7  ;;  %v217_v15 = vpack.c.bf16 %v212_v14, %v211_v13  ;;  %v218_v19 = vpack.c.bf16 %v214_v17, %v213_v16  ;;  %v2646_v41 = vld [vmem:[%s4371_s7 + $0x8] sm:$0xf0]  ;;  %v316_v43 = vld [vmem:[#allocation3] sm:$0xff]  ;;  %s3462_s7 = smov 96  }
  0x46   :  { %2634 = vmatmul.msk.bf16.vlgmr.msra.gmra.mxu0 %vm237_vm0, %v215_v12  ;;  %v3724_v42 = vor.u32 %v2836_v39, %v2646_v41  ;;  %v221_v47 = vld [vmem:[#allocation11] sm:$0x3] }
  0x47   :  { %2636 = vmatmul.msk.bf16.vlgmr.msra.gmra.mxu2 %vm237_vm0, %v217_v15  ;;  %2637 = vmatmul.msk.bf16.vlgmr.msra.gmra.mxu3 %vm237_vm0, %v218_v19  ;;  %v3753_v48 = vperm.slane %v221_v47, 0  ;;  %v3764_v52 = vperm.slane %v221_v47, 1 }
  0x48   :  { %857 = vmatpush.bf16.msra.mxu1 %v3660_v24  ;;  %376 = vmatpush.bf16.msrb.mxu2 %v3677_v29 }
  0x49   :  { %389 = vmatpush.bf16.msrb.mxu3 %v3679_v30  ;;  %845 = vmatpush.bf16.msrb.mxu0 %v3677_v29 }
  0x4c   :  { %858 = vmatpush.bf16.msra.mxu1 %v3679_v30  ;;  %377 = vmatpush.bf16.msrb.mxu2 %v3697_v35 }
  0x4d   :  { %390 = vmatpush.bf16.msrb.mxu3 %v3699_v36  ;;  %846 = vmatpush.bf16.msrb.mxu0 %v3697_v35 }
  0x50   :  { %859 = vmatpush.bf16.msra.mxu1 %v3699_v36  ;;  %378 = vmatpush.bf16.msrb.mxu2 %v3719_v40 }
  0x51   :  { %847 = vmatpush.bf16.msrb.mxu0 %v3719_v40  ;;  %391 = vmatpush.bf16.msrb.mxu3 %v3724_v42 }
  0x54   :  { %493 = vmatpush.bf16.msra.mxu2 %v3658_v23  ;;  %860 = vmatpush.bf16.msra.mxu1 %v3724_v42 }
  0x55   :  { %2638 = vmatmul.msk.bf16.vlgmr.msrb.gmra.mxu1 %vm237_vm0, %v215_v12  ;;  %506 = vmatpush.bf16.msra.mxu3 %v3660_v24 }
  0x56   :  { %1078 = vmatpush.bf16.msra.mxu0 %v3658_v23 }
  0x58   :  { %1091 = vmatpush.bf16.msrb.mxu1 %v3660_v24  ;;  %494 = vmatpush.bf16.msra.mxu2 %v3677_v29 }
  0x59   :  { %507 = vmatpush.bf16.msra.mxu3 %v3679_v30 }
  0x5a   :  { %1079 = vmatpush.bf16.msra.mxu0 %v3677_v29 }
  0x5c   :  { %1092 = vmatpush.bf16.msrb.mxu1 %v3679_v30  ;;  %495 = vmatpush.bf16.msra.mxu2 %v3697_v35 }
  0x5d   :  { %508 = vmatpush.bf16.msra.mxu3 %v3699_v36 }
  0x5e   :  { %1080 = vmatpush.bf16.msra.mxu0 %v3697_v35 }
  0x60   :  { %1093 = vmatpush.bf16.msrb.mxu1 %v3699_v36  ;;  %496 = vmatpush.bf16.msra.mxu2 %v3719_v40 }
  0x61   :  { %509 = vmatpush.bf16.msra.mxu3 %v3724_v42 }
  0x62   :  { %1081 = vmatpush.bf16.msra.mxu0 %v3719_v40 }
  0x64   :  { %1094 = vmatpush.bf16.msrb.mxu1 %v3724_v42 }
  0x65   :  { %2639 = vmatmul.msk.bf16.gmra.mxu1 %vm237_vm0, %v216_v7 }
  0x75   :  { %2640 = vmatmul.msk.bf16.gmra.mxu1 %vm237_vm0, %v217_v15 }
  0x85   :  { %2641 = vmatmul.msk.bf16.gmra.mxu1 %vm237_vm0, %v218_v19 }
  0xae   :  { %v322_v44 = vpop.permute.xlu0 %321 }
  0xaf   :  { %v325_v45 = vsel %vm324_vm1, %v316_v43, %v322_v44 }
  0xb0   :  { %v326_v46 = vpack.c.bf16 %v325_v45, %v325_v45 }
  0xb2   :  { %2674 = vmatmul.msk.bf16.vlgmr.msrb.gmra.mxu2 %vm367_vm2, %v326_v46  ;;  %2675 = vmatmul.msk.bf16.vlgmr.msrb.gmra.mxu3 %vm367_vm2, %v326_v46 }
  0xb3   :  { %623 = vmatpush.bf16.msrb.mxu3 %v3660_v24  ;;  %610 = vmatpush.bf16.msrb.mxu2 %v3658_v23 }
  0xb7   :  { %624 = vmatpush.bf16.msrb.mxu3 %v3679_v30  ;;  %611 = vmatpush.bf16.msrb.mxu2 %v3677_v29 }
  0xbb   :  { %625 = vmatpush.bf16.msrb.mxu3 %v3699_v36  ;;  %612 = vmatpush.bf16.msrb.mxu2 %v3697_v35 }
  0xbf   :  { %626 = vmatpush.bf16.msrb.mxu3 %v3724_v42  ;;  %613 = vmatpush.bf16.msrb.mxu2 %v3719_v40 }
  0xc2   :  { %v264_v49 = vpop.f32.mrf.mxu1 }
  0xc3   :  { %v3758_v50 = vadd.f32 %v264_v49, %v3753_v48  ;;  %v259_v9 = vpop.f32.mrf.mxu0 }
  0xc4   :  { %v260_v10 = vadd.f32 %v259_v9, %v3753_v48  ;;  %v319_v9 = vld [vmem:[#allocation9] sm:$0xff] }
  0xca   :  { %v3762_v51 = vpop.f32.mrf.mxu1  ;;  %v269_v55 = vpop.f32.mrf.mxu2 }
  0xcb   :  { %v3770_v56 = vadd.f32 %v269_v55, %v3753_v48  ;;  %v274_v58 = vpop.f32.mrf.mxu3 }
  0xcc   :  { %v3775_v59 = vadd.f32 %v274_v58, %v3753_v48 }
  0xd2   :  { %v288_v53 = vpop.f32.mrf.mxu1  ;;  %v3794_v7 = vpop.f32.mrf.mxu2 }
  0xd3   :  { %v3767_v54 = vadd.f32 %v288_v53, %v3764_v52  ;;  %v3792_v6 = vpop.f32.mrf.mxu3 }
  0xda   :  { %v3772_v57 = vpop.f32.mrf.mxu1 }
  0xe2   :  { %v293_v60 = vpop.f32.mrf.mxu1 }
  0xe3   :  { %v3778_v61 = vadd.f32 %v293_v60, %v3764_v52 }
  0xea   :  { %v295_v62 = vpop.f32.mrf.mxu1 }
  0xeb   :  { %v3781_v63 = vadd.f32 %v295_v62, %v3764_v52 }
  0xf2   :  { %v298_v0 = vpop.f32.mrf.mxu1 }
  0xf3   :  { %v3784_v1 = vadd.f32 %v298_v0, %v3764_v52 }
  0xfa   :  { %v300_v2 = vpop.f32.mrf.mxu1 }
  0xfb   :  { %v3787_v3 = vadd.f32 %v300_v2, %v3764_v52 }
 0x102   :  { %v303_v4 = vpop.f32.mrf.mxu1 }
 0x103   :  { %v3790_v5 = vadd.f32 %v303_v4, %v3764_v52 }
 0x10a   :  { %v305_v8 = vpop.f32.mrf.mxu1 }
 0x10b   :  { %v306_v11 = vadd.f32 %v305_v8, %v3764_v52 }
 0x135   :  { %v380_v12 = vpop.f32.mrf.mxu2  ;;  %v393_v13 = vpop.f32.mrf.mxu3 }
 0x136   :  { %v397_v14 = vadd.f32 %v380_v12, %v260_v10  ;;  %v398_v15 = vadd.f32 %v393_v13, %v306_v11 }
 0x138   :  { %2887 = vtanh.f32 %v397_v14  ;;  %v2676_v20 = vmul.f32 -1.442695, %v397_v14  ;;  %v2677_v21 = vmul.f32 -1.442695, %v398_v15  ;;  %v317_v14 = vld [vmem:[#allocation6] sm:$0xff] }
 0x139   :  { %2889 = vtanh.f32 %v398_v15 }
 0x13a   :  { %2891 = vpow2.f32 %v2676_v20 }
 0x13b   :  { %2893 = vpow2.f32 %v2677_v21 }
 0x13d   :  { %v382_v16 = vpop.f32.mrf.mxu2  ;;  %v395_v17 = vpop.f32.mrf.mxu3 }
 0x13e   :  { %v2888_v18 = vpop.eup %2887 }
 0x13f   :  { %v2890_v19 = vpop.eup %2889  ;;  %421 = vrot.lane.b32.xlu0 %v2888_v18, %s3459_s16 }
 0x140   :  { %458 = vrot.lane.b32.xlu1 %v2890_v19, %s3459_s16  ;;  %v2892_v22 = vpop.eup %2891 }
 0x141   :  { %v2894_v25 = vpop.eup %2893  ;;  %v402_v26 = vadd.f32 1.0, %v2892_v22 }
 0x142   :  { %v439_v27 = vadd.f32 1.0, %v2894_v25 }
 0x143   :  { %2895 = vrcp.f32 %v402_v26  ;;  %v414_v44 = vand.u32 2147483648, %v402_v26  ;;  %vm408_vm5 = vweird.f32 %v402_v26  ;;  %v412_v46 = vand.u32 2147483647, %v402_v26 }
 0x144   :  { %2897 = vrcp.f32 %v439_v27  ;;  %v451_v45 = vand.u32 2147483648, %v439_v27  ;;  %vm445_vm6 = vweird.f32 %v439_v27  ;;  %v449_v47 = vand.u32 2147483647, %v439_v27 }
 0x145   :  { %v415_v55 = vor.u32 1.1754944e-38, %v414_v44  ;;  %vm413_vm9 = vcmp.eq.f32.partialorder %v412_v46, 8.507059e+37 }
 0x146   :  { %v452_v58 = vor.u32 1.1754944e-38, %v451_v45  ;;  %vm450_vm10 = vcmp.eq.f32.partialorder %v449_v47, 8.507059e+37 }
 0x149   :  { %v2896_v28 = vpop.eup %2895 }
 0x14a   :  { %v2898_v31 = vpop.eup %2897  ;;  %v404_v32 = vmul.f32 %v2896_v28, %v402_v26  ;;  %vm409_vm3 = vweird.f32 %v2896_v28 }
 0x14b   :  { %v441_v33 = vmul.f32 %v2898_v31, %v439_v27  ;;  %vm446_vm4 = vweird.f32 %v2898_v31  ;;  %vm410_vm7 = vmor %vm408_vm5, %vm409_vm3 }
 0x14c   :  { %v405_v34 = vsub.f32 1.0, %v404_v32  ;;  %vm447_vm8 = vmor %vm445_vm6, %vm446_vm4 }
 0x14d   :  { %v442_v37 = vsub.f32 1.0, %v441_v33 }
 0x14e   :  { %v406_v38 = vmul.f32 %v2896_v28, %v405_v34 }
 0x14f   :  { %v443_v39 = vmul.f32 %v2898_v31, %v442_v37 }
 0x150   :  { %v407_v41 = vadd.f32 %v2896_v28, %v406_v38 }
 0x151   :  { %v444_v43 = vadd.f32 %v2898_v31, %v443_v39 }
 0x152   :  { %v411_v49 = vsel %vm410_vm7, %v2896_v28, %v407_v41 }
 0x153   :  { %v448_v53 = vsel %vm447_vm8, %v2898_v31, %v444_v43  ;;  %v416_v62 = vsel %vm413_vm9, %v415_v55, %v411_v49  ;;  %v261_v31 = vpop.f32.mrf.mxu0 }
 0x154   :  { %v453_v2 = vsel %vm450_vm10, %v452_v58, %v448_v53  ;;  %v419_v15 = vmul.f32 %v416_v62, %v317_v14  ;;  %v262_v32 = vadd.f32 %v261_v31, %v3753_v48 }
 0x155   :  { %v456_v10 = vmul.f32 %v453_v2, %v319_v9 }
 0x1b1   :  { %v422_v60 = vpop.permute.xlu0 %421 }
 0x1b2   :  { %v459_v0 = vpop.permute.xlu1 %458  ;;  %v424_v4 = vmul.f32 %v422_v60, %v416_v62 }
 0x1b3   :  { %v461_v8 = vmul.f32 %v459_v0, %v453_v2 }
 0x1b4   :  { %426 = vrot.lane.b32.xlu1 %v424_v4, %s3462_s7 }
 0x1b5   :  { %463 = vrot.lane.b32.xlu2 %v461_v8, %s3462_s7 }
 0x20f   :  { %v464_v11 = vpop.permute.xlu2 %463 }
 0x210   :  { %v3802_v12 = vadd.f32 %v464_v11, %v456_v10 }
 0x212   :  { %2899 = vtanh.f32 %v3802_v12 }
 0x218   :  { %v2900_v13 = vpop.eup %2899 }
 0x219   :  { %469 = vrot.lane.b32.xlu0 %v2900_v13, %s3459_s16 }
 0x226   :  { %v427_v16 = vpop.permute.xlu1 %426 }
 0x227   :  { %v3806_v17 = vadd.f32 %v427_v16, %v419_v15 }
 0x229   :  { %2901 = vtanh.f32 %v3806_v17 }
 0x22f   :  { %v2902_v18 = vpop.eup %2901 }
 0x230   :  { %432 = vrot.lane.b32.xlu2 %v2902_v18, %s3459_s16 }
 0x28a   :  { %v433_v19 = vpop.permute.xlu2 %432 }
 0x28b   :  { %v470_v20 = vpop.permute.xlu0 %469  ;;  %v435_v21 = vmul.f32 %v433_v19, %v416_v62 }
 0x28c   :  { %v472_v22 = vmul.f32 %v470_v20, %v453_v2 }
 0x28d   :  { %474 = vrot.lane.b32.xlu1 %v435_v21, %s3459_s16 }
 0x28e   :  { %479 = vrot.lane.b32.xlu2 %v472_v22, %s3462_s7 }
 0x2e8   :  { %v480_v25 = vpop.permute.xlu2 %479 }
 0x2e9   :  { %483 = vst.msk [vmem:[#allocation2 + $0x38] sm:$0xff] %vm482_vm11, %v480_v25 }
 0x2ff   :  { %v475_v26 = vpop.permute.xlu1 %474 }
 0x300   :  { %477 = vst.msk [vmem:[#allocation2] sm:$0xff] %vm324_vm1, %v475_v26  ;;  %v484_v27 = vsel %vm324_vm1, %v475_v26, %v480_v25 }
 0x301   :  { %v485_v28 = vpack.c.bf16 %v484_v27, %v484_v27 }
 0x303   :  { %2678 = vmatmul.msk.bf16.vlgmr.msra.gmra.mxu2 %vm367_vm2, %v485_v28  ;;  %2679 = vmatmul.msk.bf16.vlgmr.msra.gmra.mxu3 %vm367_vm2, %v485_v28 }
 0x304   :  { %727 = vmatpush.bf16.msra.mxu2 %v3658_v23  ;;  %740 = vmatpush.bf16.msra.mxu3 %v3660_v24 }
 0x308   :  { %728 = vmatpush.bf16.msra.mxu2 %v3677_v29  ;;  %741 = vmatpush.bf16.msra.mxu3 %v3679_v30 }
 0x30c   :  { %729 = vmatpush.bf16.msra.mxu2 %v3697_v35  ;;  %742 = vmatpush.bf16.msra.mxu3 %v3699_v36 }
 0x310   :  { %730 = vmatpush.bf16.msra.mxu2 %v3719_v40  ;;  %743 = vmatpush.bf16.msra.mxu3 %v3724_v42 }
 0x386   :  { %v498_v33 = vpop.f32.mrf.mxu2  ;;  %v511_v34 = vpop.f32.mrf.mxu3 }
 0x387   :  { %v515_v37 = vadd.f32 %v498_v33, %v262_v32  ;;  %v516_v38 = vadd.f32 %v511_v34, %v3790_v5 }
 0x389   :  { %2903 = vtanh.f32 %v515_v37  ;;  %v2680_v45 = vmul.f32 -1.442695, %v515_v37  ;;  %v2681_v46 = vmul.f32 -1.442695, %v516_v38 }
 0x38a   :  { %2905 = vtanh.f32 %v516_v38 }
 0x38b   :  { %2907 = vpow2.f32 %v2680_v45 }
 0x38c   :  { %2909 = vpow2.f32 %v2681_v46 }
 0x38e   :  { %v500_v39 = vpop.f32.mrf.mxu2  ;;  %v513_v41 = vpop.f32.mrf.mxu3 }
 0x38f   :  { %v2904_v43 = vpop.eup %2903 }
 0x390   :  { %v2906_v44 = vpop.eup %2905  ;;  %539 = vrot.lane.b32.xlu0 %v2904_v43, %s3459_s16 }
 0x391   :  { %576 = vrot.lane.b32.xlu1 %v2906_v44, %s3459_s16  ;;  %v2908_v47 = vpop.eup %2907 }
 0x392   :  { %v2910_v49 = vpop.eup %2909  ;;  %v520_v53 = vadd.f32 1.0, %v2908_v47 }
 0x393   :  { %v557_v55 = vadd.f32 1.0, %v2910_v49 }
 0x394   :  { %2911 = vrcp.f32 %v520_v53  ;;  %v532_v11 = vand.u32 2147483648, %v520_v53  ;;  %vm526_vm14 = vweird.f32 %v520_v53  ;;  %v530_v14 = vand.u32 2147483647, %v520_v53 }
 0x395   :  { %2913 = vrcp.f32 %v557_v55  ;;  %v569_v13 = vand.u32 2147483648, %v557_v55  ;;  %vm563_vm15 = vweird.f32 %v557_v55  ;;  %v567_v15 = vand.u32 2147483647, %v557_v55 }
 0x396   :  { %v533_v19 = vor.u32 1.1754944e-38, %v532_v11  ;;  %vm531_vm4 = vcmp.eq.f32.partialorder %v530_v14, 8.507059e+37 }
 0x397   :  { %v570_v20 = vor.u32 1.1754944e-38, %v569_v13  ;;  %vm568_vm5 = vcmp.eq.f32.partialorder %v567_v15, 8.507059e+37 }
 0x39a   :  { %v2912_v5 = vpop.eup %2911 }
 0x39b   :  { %v2914_v58 = vpop.eup %2913  ;;  %v522_v60 = vmul.f32 %v2912_v5, %v520_v53  ;;  %vm527_vm12 = vweird.f32 %v2912_v5 }
 0x39c   :  { %v559_v62 = vmul.f32 %v2914_v58, %v557_v55  ;;  %vm564_vm13 = vweird.f32 %v2914_v58  ;;  %vm528_vm0 = vmor %vm526_vm14, %vm527_vm12 }
 0x39d   :  { %v523_v0 = vsub.f32 1.0, %v522_v60  ;;  %vm565_vm3 = vmor %vm563_vm15, %vm564_vm13 }
 0x39e   :  { %v560_v2 = vsub.f32 1.0, %v559_v62 }
 0x39f   :  { %v524_v4 = vmul.f32 %v2912_v5, %v523_v0 }
 0x3a0   :  { %v561_v8 = vmul.f32 %v2914_v58, %v560_v2 }
 0x3a1   :  { %v525_v9 = vadd.f32 %v2912_v5, %v524_v4 }
 0x3a2   :  { %v562_v10 = vadd.f32 %v2914_v58, %v561_v8 }
 0x3a3   :  { %v529_v16 = vsel %vm528_vm0, %v2912_v5, %v525_v9 }
 0x3a4   :  { %v566_v18 = vsel %vm565_vm3, %v2914_v58, %v562_v10  ;;  %v534_v22 = vsel %vm531_vm4, %v533_v19, %v529_v16 }
 0x3a5   :  { %v571_v26 = vsel %vm568_vm5, %v570_v20, %v566_v18  ;;  %v537_v31 = vmul.f32 %v534_v22, %v3806_v17 }
 0x3a6   :  { %v574_v37 = vmul.f32 %v571_v26, %v3802_v12 }
 0x402   :  { %v540_v21 = vpop.permute.xlu0 %539 }
 0x403   :  { %v577_v25 = vpop.permute.xlu1 %576  ;;  %v542_v27 = vmul.f32 %v540_v21, %v534_v22 }
 0x404   :  { %v579_v28 = vmul.f32 %v577_v25, %v571_v26 }
 0x405   :  { %544 = vrot.lane.b32.xlu2 %v542_v27, %s3462_s7 }
 0x406   :  { %581 = vrot.lane.b32.xlu0 %v579_v28, %s3462_s7 }
 0x45f   :  { %v545_v32 = vpop.permute.xlu2 %544 }
 0x460   :  { %v3832_v33 = vadd.f32 %v545_v32, %v537_v31 }
 0x462   :  { %2915 = vtanh.f32 %v3832_v33 }
 0x468   :  { %v2916_v34 = vpop.eup %2915 }
 0x469   :  { %550 = vrot.lane.b32.xlu1 %v2916_v34, %s3459_s16 }
 0x478   :  { %v582_v38 = vpop.permute.xlu0 %581 }
 0x479   :  { %v3837_v39 = vadd.f32 %v582_v38, %v574_v37 }
 0x47b   :  { %2917 = vtanh.f32 %v3837_v39 }
 0x481   :  { %v2918_v41 = vpop.eup %2917 }
 0x482   :  { %587 = vrot.lane.b32.xlu2 %v2918_v41, %s3459_s16 }
 0x4db   :  { %v551_v43 = vpop.permute.xlu1 %550 }
 0x4dc   :  { %v588_v17 = vpop.permute.xlu2 %587  ;;  %v553_v44 = vmul.f32 %v551_v43, %v534_v22 }
 0x4dd   :  { %v590_v45 = vmul.f32 %v588_v17, %v571_v26 }
 0x4de   :  { %592 = vrot.lane.b32.xlu0 %v553_v44, %s3459_s16 }
 0x4df   :  { %597 = vrot.lane.b32.xlu1 %v590_v45, %s3462_s7 }
 0x550   :  { %v593_v46 = vpop.permute.xlu0 %592 }
 0x551   :  { %595 = vst.msk [vmem:[#allocation2 + $0x8] sm:$0xff] %vm324_vm1, %v593_v46  ;;  %v598_v12 = vpop.permute.xlu1 %597 }
 0x552   :  { %600 = vst.msk [vmem:[#allocation2 + $0x30] sm:$0xff] %vm482_vm11, %v598_v12  ;;  %v601_v47 = vsel %vm324_vm1, %v593_v46, %v598_v12 }
 0x553   :  { %v602_v49 = vpack.c.bf16 %v601_v47, %v601_v47 }
 0x555   :  { %2682 = vmatmul.msk.bf16.vlgmr.msrb.gmra.mxu2 %vm367_vm2, %v602_v49  ;;  %2683 = vmatmul.msk.bf16.vlgmr.msrb.gmra.mxu3 %vm367_vm2, %v602_v49 }
 0x556   :  { %974 = vmatpush.bf16.msrb.mxu3 %v3660_v24  ;;  %961 = vmatpush.bf16.msrb.mxu2 %v3658_v23 }
 0x55a   :  { %975 = vmatpush.bf16.msrb.mxu3 %v3679_v30  ;;  %962 = vmatpush.bf16.msrb.mxu2 %v3677_v29 }
 0x55e   :  { %976 = vmatpush.bf16.msrb.mxu3 %v3699_v36  ;;  %963 = vmatpush.bf16.msrb.mxu2 %v3697_v35 }
 0x562   :  { %977 = vmatpush.bf16.msrb.mxu3 %v3724_v42  ;;  %964 = vmatpush.bf16.msrb.mxu2 %v3719_v40 }
 0x5d8   :  { %v615_v53 = vpop.f32.mrf.mxu2  ;;  %v628_v55 = vpop.f32.mrf.mxu3 }
 0x5d9   :  { %v632_v5 = vadd.f32 %v615_v53, %v3758_v50  ;;  %v633_v58 = vadd.f32 %v628_v55, %v3787_v3 }
 0x5db   :  { %2919 = vtanh.f32 %v632_v5  ;;  %v2684_v4 = vmul.f32 -1.442695, %v632_v5  ;;  %v2685_v11 = vmul.f32 -1.442695, %v633_v58 }
 0x5dc   :  { %2921 = vtanh.f32 %v633_v58 }
 0x5dd   :  { %2923 = vpow2.f32 %v2684_v4 }
 0x5e0   :  { %v617_v60 = vpop.f32.mrf.mxu2  ;;  %v630_v62 = vpop.f32.mrf.mxu3 }
 0x5e1   :  { %v2920_v0 = vpop.eup %2919 }
 0x5e2   :  { %v2922_v2 = vpop.eup %2921  ;;  %656 = vrot.lane.b32.xlu2 %v2920_v0, %s3459_s16 }
 0x5e3   :  { %693 = vrot.lane.b32.xlu0 %v2922_v2, %s3459_s16  ;;  %v2924_v8 = vpop.eup %2923 }
 0x5e4   :  { %v637_v9 = vadd.f32 1.0, %v2924_v8 }
 0x5e6   :  { %2925 = vrcp.f32 %v637_v9  ;;  %v649_v18 = vand.u32 2147483648, %v637_v9  ;;  %vm643_vm7 = vweird.f32 %v637_v9  ;;  %v647_v19 = vand.u32 2147483647, %v637_v9 }
 0x5e7   :  { %2927 = vpow2.f32 %v2685_v11 }
 0x5e8   :  { %v650_v21 = vor.u32 1.1754944e-38, %v649_v18  ;;  %vm648_vm9 = vcmp.eq.f32.partialorder %v647_v19, 8.507059e+37 }
 0x5ec   :  { %v2926_v10 = vpop.eup %2925 }
 0x5ed   :  { %v639_v50 = vmul.f32 %v2926_v10, %v637_v9  ;;  %v2928_v14 = vpop.eup %2927  ;;  %vm644_vm6 = vweird.f32 %v2926_v10  ;;  %v267_v9 = vadd.f32 %v3762_v51, %v3753_v48 }
 0x5ee   :  { %v674_v15 = vadd.f32 1.0, %v2928_v14  ;;  %vm645_vm8 = vmor %vm643_vm7, %vm644_vm6 }
 0x5ef   :  { %v640_v3 = vsub.f32 1.0, %v639_v50 }
 0x5f0   :  { %2929 = vrcp.f32 %v674_v15  ;;  %v686_v37 = vand.u32 2147483648, %v674_v15  ;;  %vm680_vm12 = vweird.f32 %v674_v15  ;;  %v684_v38 = vand.u32 2147483647, %v674_v15 }
 0x5f1   :  { %v641_v13 = vmul.f32 %v2926_v10, %v640_v3 }
 0x5f2   :  { %v687_v43 = vor.u32 1.1754944e-38, %v686_v37  ;;  %vm685_vm14 = vcmp.eq.f32.partialorder %v684_v38, 8.507059e+37 }
 0x5f3   :  { %v642_v16 = vadd.f32 %v2926_v10, %v641_v13 }
 0x5f5   :  { %v646_v20 = vsel %vm645_vm8, %v2926_v10, %v642_v16 }
 0x5f6   :  { %v651_v25 = vsel %vm648_vm9, %v650_v21, %v646_v20  ;;  %v2930_v27 = vpop.eup %2929 }
 0x5f7   :  { %v676_v28 = vmul.f32 %v2930_v27, %v674_v15  ;;  %vm681_vm10 = vweird.f32 %v2930_v27  ;;  %v654_v46 = vmul.f32 %v651_v25, %v3832_v33 }
 0x5f8   :  { %vm682_vm13 = vmor %vm680_vm12, %vm681_vm10 }
 0x5f9   :  { %v677_v31 = vsub.f32 1.0, %v676_v28 }
 0x5fb   :  { %v678_v32 = vmul.f32 %v2930_v27, %v677_v31 }
 0x5fd   :  { %v679_v34 = vadd.f32 %v2930_v27, %v678_v32 }
 0x5ff   :  { %v683_v41 = vsel %vm682_vm13, %v2930_v27, %v679_v34 }
 0x600   :  { %v688_v44 = vsel %vm685_vm14, %v687_v43, %v683_v41 }
 0x601   :  { %v691_v12 = vmul.f32 %v688_v44, %v3837_v39 }
 0x63c   :  { %v657_v22 = vpop.permute.xlu2 %656 }
 0x63d   :  { %v659_v26 = vmul.f32 %v657_v22, %v651_v25 }
 0x63f   :  { %661 = vrot.lane.b32.xlu1 %v659_v26, %s3462_s7 }
 0x655   :  { %v694_v17 = vpop.permute.xlu0 %693 }
 0x656   :  { %v696_v45 = vmul.f32 %v694_v17, %v688_v44 }
 0x658   :  { %698 = vrot.lane.b32.xlu2 %v696_v45, %s3462_s7 }
 0x6b1   :  { %v662_v47 = vpop.permute.xlu1 %661 }
 0x6b2   :  { %v699_v49 = vpop.permute.xlu2 %698  ;;  %v3864_v53 = vadd.f32 %v662_v47, %v654_v46 }
 0x6b3   :  { %v3866_v55 = vadd.f32 %v699_v49, %v691_v12 }
 0x6b4   :  { %2931 = vtanh.f32 %v3864_v53 }
 0x6b5   :  { %2933 = vtanh.f32 %v3866_v55 }
 0x6ba   :  { %v2932_v5 = vpop.eup %2931 }
 0x6bb   :  { %v2934_v58 = vpop.eup %2933  ;;  %667 = vrot.lane.b32.xlu0 %v2932_v5, %s3459_s16 }
 0x6bc   :  { %704 = vrot.lane.b32.xlu1 %v2934_v58, %s3459_s16 }
 0x72d   :  { %v668_v60 = vpop.permute.xlu0 %667 }
 0x72e   :  { %v705_v33 = vpop.permute.xlu1 %704  ;;  %v670_v62 = vmul.f32 %v668_v60, %v651_v25 }
 0x72f   :  { %v707_v39 = vmul.f32 %v705_v33, %v688_v44 }
 0x730   :  { %709 = vrot.lane.b32.xlu2 %v670_v62, %s3459_s16 }
 0x731   :  { %714 = vrot.lane.b32.xlu0 %v707_v39, %s3462_s7 }
 0x78a   :  { %v710_v0 = vpop.permute.xlu2 %709 }
 0x78b   :  { %712 = vst.msk [vmem:[#allocation2 + $0x10] sm:$0xff] %vm324_vm1, %v710_v0 }
 0x7a3   :  { %v715_v2 = vpop.permute.xlu0 %714 }
 0x7a4   :  { %717 = vst.msk [vmem:[#allocation2 + $0x28] sm:$0xff] %vm482_vm11, %v715_v2  ;;  %v718_v4 = vsel %vm324_vm1, %v710_v0, %v715_v2 }
 0x7a5   :  { %v719_v8 = vpack.c.bf16 %v718_v4, %v718_v4 }
 0x7a7   :  { %2686 = vmatmul.msk.bf16.vlgmr.msra.gmra.mxu2 %vm367_vm2, %v719_v8  ;;  %2687 = vmatmul.msk.bf16.vlgmr.msra.gmra.mxu3 %vm367_vm2, %v719_v8 }
 0x7a8   :  { %1208 = vmatpush.bf16.msra.mxu3 %v3660_v24  ;;  %1195 = vmatpush.bf16.msra.mxu2 %v3658_v23 }
 0x7ac   :  { %1209 = vmatpush.bf16.msra.mxu3 %v3679_v30  ;;  %1196 = vmatpush.bf16.msra.mxu2 %v3677_v29 }
 0x7b0   :  { %1210 = vmatpush.bf16.msra.mxu3 %v3699_v36  ;;  %1197 = vmatpush.bf16.msra.mxu2 %v3697_v35 }
 0x7b4   :  { %1211 = vmatpush.bf16.msra.mxu3 %v3724_v42  ;;  %1198 = vmatpush.bf16.msra.mxu2 %v3719_v40 }
 0x82a   :  { %v732_v10 = vpop.f32.mrf.mxu2  ;;  %v745_v11 = vpop.f32.mrf.mxu3 }
 0x82b   :  { %v749_v24 = vadd.f32 %v732_v10, %v267_v9  ;;  %v750_v23 = vadd.f32 %v745_v11, %v3784_v1 }
 0x82d   :  { %2935 = vtanh.f32 %v749_v24  ;;  %v2689_v35 = vmul.f32 -1.442695, %v750_v23  ;;  %v2688_v3 = vmul.f32 -1.442695, %v749_v24 }
 0x82e   :  { %2937 = vtanh.f32 %v750_v23 }
 0x82f   :  { %2939 = vpow2.f32 %v2689_v35 }
 0x832   :  { %v734_v30 = vpop.f32.mrf.mxu2  ;;  %v747_v29 = vpop.f32.mrf.mxu3 }
 0x833   :  { %v2936_v50 = vpop.eup %2935 }
 0x834   :  { %v2938_v36 = vpop.eup %2937  ;;  %773 = vrot.lane.b32.xlu1 %v2936_v50, %s3459_s16 }
 0x835   :  { %810 = vrot.lane.b32.xlu2 %v2938_v36, %s3459_s16  ;;  %v2940_v40 = vpop.eup %2939 }
 0x836   :  { %v791_v42 = vadd.f32 1.0, %v2940_v40 }
 0x838   :  { %2941 = vrcp.f32 %v791_v42  ;;  %v803_v19 = vand.u32 2147483648, %v791_v42  ;;  %vm797_vm0 = vweird.f32 %v791_v42  ;;  %v801_v20 = vand.u32 2147483647, %v791_v42 }
 0x839   :  { %2943 = vpow2.f32 %v2688_v3 }
 0x83a   :  { %v804_v22 = vor.u32 1.1754944e-38, %v803_v19  ;;  %vm802_vm4 = vcmp.eq.f32.partialorder %v801_v20, 8.507059e+37 }
 0x83e   :  { %v2942_v51 = vpop.eup %2941 }
 0x83f   :  { %v793_v13 = vmul.f32 %v2942_v51, %v791_v42  ;;  %v2944_v14 = vpop.eup %2943  ;;  %vm798_vm15 = vweird.f32 %v2942_v51 }
 0x840   :  { %v754_v16 = vadd.f32 1.0, %v2944_v14  ;;  %vm799_vm3 = vmor %vm797_vm0, %vm798_vm15 }
 0x841   :  { %v794_v1 = vsub.f32 1.0, %v793_v13 }
 0x842   :  { %2945 = vrcp.f32 %v754_v16  ;;  %v766_v38 = vand.u32 2147483648, %v754_v16  ;;  %vm760_vm6 = vweird.f32 %v754_v16  ;;  %v764_v41 = vand.u32 2147483647, %v754_v16 }
 0x843   :  { %v795_v15 = vmul.f32 %v2942_v51, %v794_v1 }
 0x844   :  { %v767_v17 = vor.u32 1.1754944e-38, %v766_v38  ;;  %vm765_vm8 = vcmp.eq.f32.partialorder %v764_v41, 8.507059e+37 }
 0x845   :  { %v796_v18 = vadd.f32 %v2942_v51, %v795_v15 }
 0x847   :  { %v800_v21 = vsel %vm799_vm3, %v2942_v51, %v796_v18 }
 0x848   :  { %v805_v26 = vsel %vm802_vm4, %v804_v22, %v800_v21  ;;  %v2946_v27 = vpop.eup %2945 }
 0x849   :  { %v756_v31 = vmul.f32 %v2946_v27, %v754_v16  ;;  %vm761_vm5 = vweird.f32 %v2946_v27  ;;  %v808_v12 = vmul.f32 %v805_v26, %v3866_v55 }
 0x84a   :  { %vm762_vm7 = vmor %vm760_vm6, %vm761_vm5 }
 0x84b   :  { %v757_v32 = vsub.f32 1.0, %v756_v31 }
 0x84d   :  { %v758_v34 = vmul.f32 %v2946_v27, %v757_v32 }
 0x84f   :  { %v759_v37 = vadd.f32 %v2946_v27, %v758_v34 }
 0x851   :  { %v763_v43 = vsel %vm762_vm7, %v2946_v27, %v759_v37 }
 0x852   :  { %v768_v45 = vsel %vm765_vm8, %v767_v17, %v763_v43 }
 0x853   :  { %v771_v58 = vmul.f32 %v768_v45, %v3864_v53 }
 0x88f   :  { %v811_v25 = vpop.permute.xlu2 %810 }
 0x890   :  { %v813_v28 = vmul.f32 %v811_v25, %v805_v26 }
 0x892   :  { %815 = vrot.lane.b32.xlu1 %v813_v28, %s3462_s7 }
 0x8a6   :  { %v774_v44 = vpop.permute.xlu1 %773 }
 0x8a7   :  { %v776_v46 = vmul.f32 %v774_v44, %v768_v45 }
 0x8a9   :  { %778 = vrot.lane.b32.xlu0 %v776_v46, %s3462_s7 }
 0x904   :  { %v816_v47 = vpop.permute.xlu1 %815 }
 0x905   :  { %v3895_v49 = vadd.f32 %v816_v47, %v808_v12 }
 0x907   :  { %2947 = vtanh.f32 %v3895_v49 }
 0x90d   :  { %v2948_v5 = vpop.eup %2947 }
 0x90e   :  { %821 = vrot.lane.b32.xlu0 %v2948_v5, %s3459_s16 }
 0x91b   :  { %v779_v60 = vpop.permute.xlu0 %778 }
 0x91c   :  { %v3900_v33 = vadd.f32 %v779_v60, %v771_v58 }
 0x91e   :  { %2949 = vtanh.f32 %v3900_v33 }
 0x924   :  { %v2950_v62 = vpop.eup %2949 }
 0x925   :  { %784 = vrot.lane.b32.xlu2 %v2950_v62, %s3459_s16 }
 0x97f   :  { %v785_v39 = vpop.permute.xlu2 %784 }
 0x980   :  { %v822_v55 = vpop.permute.xlu0 %821  ;;  %v787_v0 = vmul.f32 %v785_v39, %v768_v45 }
 0x981   :  { %v824_v2 = vmul.f32 %v822_v55, %v805_v26 }
 0x982   :  { %826 = vrot.lane.b32.xlu1 %v787_v0, %s3459_s16 }
 0x983   :  { %831 = vrot.lane.b32.xlu2 %v824_v2, %s3462_s7 }
 0x9dd   :  { %v832_v4 = vpop.permute.xlu2 %831 }
 0x9de   :  { %834 = vst.msk [vmem:[#allocation2 + $0x20] sm:$0xff] %vm482_vm11, %v832_v4 }
 0x9f4   :  { %v827_v53 = vpop.permute.xlu1 %826 }
 0x9f5   :  { %829 = vst.msk [vmem:[#allocation2 + $0x18] sm:$0xff] %vm324_vm1, %v827_v53  ;;  %v835_v8 = vsel %vm324_vm1, %v827_v53, %v832_v4 }
 0x9f6   :  { %v836_v9 = vpack.c.bf16 %v835_v8, %v835_v8  ;;  %v272_v8 = vadd.f32 %v3794_v7, %v3753_v48 }
 0x9f8   :  { %2690 = vmatmul.msk.bf16.vlgmr.msrb.gmra.mxu0 %vm367_vm2, %v836_v9  ;;  %2691 = vmatmul.msk.bf16.vlgmr.msra.gmra.mxu1 %vm367_vm2, %v836_v9 }
 0xa75   :  { %v849_v10 = vpop.f32.mrf.mxu0  ;;  %v862_v11 = vpop.f32.mrf.mxu1 }
 0xa76   :  { %v866_v24 = vadd.f32 %v849_v10, %v3770_v56  ;;  %v867_v23 = vadd.f32 %v862_v11, %v3781_v63 }
 0xa78   :  { %2951 = vtanh.f32 %v866_v24  ;;  %v2692_v35 = vmul.f32 -1.442695, %v866_v24  ;;  %v2693_v40 = vmul.f32 -1.442695, %v867_v23 }
 0xa79   :  { %2953 = vtanh.f32 %v867_v23 }
 0xa7a   :  { %2955 = vpow2.f32 %v2692_v35 }
 0xa7b   :  { %2957 = vpow2.f32 %v2693_v40 }
 0xa7d   :  { %v851_v30 = vpop.f32.mrf.mxu0  ;;  %v864_v29 = vpop.f32.mrf.mxu1 }
 0xa7e   :  { %v2952_v50 = vpop.eup %2951 }
 0xa7f   :  { %v2954_v36 = vpop.eup %2953  ;;  %890 = vrot.lane.b32.xlu0 %v2952_v50, %s3459_s16 }
 0xa80   :  { %927 = vrot.lane.b32.xlu1 %v2954_v36, %s3459_s16  ;;  %v2956_v42 = vpop.eup %2955 }
 0xa81   :  { %v2958_v51 = vpop.eup %2957  ;;  %v871_v3 = vadd.f32 1.0, %v2956_v42 }
 0xa82   :  { %v908_v56 = vadd.f32 1.0, %v2958_v51 }
 0xa83   :  { %2959 = vrcp.f32 %v871_v3  ;;  %v883_v22 = vand.u32 2147483648, %v871_v3  ;;  %vm877_vm12 = vweird.f32 %v871_v3  ;;  %v881_v26 = vand.u32 2147483647, %v871_v3 }
 0xa84   :  { %2961 = vrcp.f32 %v908_v56  ;;  %v920_v25 = vand.u32 2147483648, %v908_v56  ;;  %vm914_vm13 = vweird.f32 %v908_v56  ;;  %v918_v27 = vand.u32 2147483647, %v908_v56 }
 0xa85   :  { %v884_v32 = vor.u32 1.1754944e-38, %v883_v22  ;;  %vm882_vm0 = vcmp.eq.f32.partialorder %v881_v26, 8.507059e+37 }
 0xa86   :  { %v921_v34 = vor.u32 1.1754944e-38, %v920_v25  ;;  %vm919_vm3 = vcmp.eq.f32.partialorder %v918_v27, 8.507059e+37 }
 0xa89   :  { %v2960_v63 = vpop.eup %2959 }
 0xa8a   :  { %v2962_v13 = vpop.eup %2961  ;;  %v873_v1 = vmul.f32 %v2960_v63, %v871_v3  ;;  %vm878_vm9 = vweird.f32 %v2960_v63 }
 0xa8b   :  { %v910_v14 = vmul.f32 %v2962_v13, %v908_v56  ;;  %vm915_vm10 = vweird.f32 %v2962_v13  ;;  %vm879_vm14 = vmor %vm877_vm12, %vm878_vm9 }
 0xa8c   :  { %v874_v15 = vsub.f32 1.0, %v873_v1  ;;  %vm916_vm15 = vmor %vm914_vm13, %vm915_vm10 }
 0xa8d   :  { %v911_v16 = vsub.f32 1.0, %v910_v14 }
 0xa8e   :  { %v875_v18 = vmul.f32 %v2960_v63, %v874_v15 }
 0xa8f   :  { %v912_v19 = vmul.f32 %v2962_v13, %v911_v16 }
 0xa90   :  { %v876_v20 = vadd.f32 %v2960_v63, %v875_v18 }
 0xa91   :  { %v913_v21 = vadd.f32 %v2962_v13, %v912_v19 }
 0xa92   :  { %v880_v28 = vsel %vm879_vm14, %v2960_v63, %v876_v20 }
 0xa93   :  { %v917_v31 = vsel %vm916_vm15, %v2962_v13, %v913_v21  ;;  %v885_v38 = vsel %vm882_vm0, %v884_v32, %v880_v28 }
 0xa94   :  { %v922_v43 = vsel %vm919_vm3, %v921_v34, %v917_v31  ;;  %v888_v45 = vmul.f32 %v885_v38, %v3900_v33 }
 0xa95   :  { %v925_v5 = vmul.f32 %v922_v43, %v3895_v49 }
 0xaf1   :  { %v891_v37 = vpop.permute.xlu0 %890 }
 0xaf2   :  { %v928_v41 = vpop.permute.xlu1 %927  ;;  %v893_v17 = vmul.f32 %v891_v37, %v885_v38 }
 0xaf3   :  { %v930_v44 = vmul.f32 %v928_v41, %v922_v43 }
 0xaf4   :  { %895 = vrot.lane.b32.xlu2 %v893_v17, %s3462_s7 }
 0xaf5   :  { %932 = vrot.lane.b32.xlu0 %v930_v44, %s3462_s7 }
 0xb4e   :  { %v896_v46 = vpop.permute.xlu2 %895 }
 0xb4f   :  { %v3918_v12 = vadd.f32 %v896_v46, %v888_v45 }
 0xb51   :  { %2963 = vtanh.f32 %v3918_v12 }
 0xb57   :  { %v2964_v47 = vpop.eup %2963 }
 0xb58   :  { %901 = vrot.lane.b32.xlu1 %v2964_v47, %s3459_s16 }
 0xb67   :  { %v933_v58 = vpop.permute.xlu0 %932 }
 0xb68   :  { %v3923_v60 = vadd.f32 %v933_v58, %v925_v5 }
 0xb6a   :  { %2965 = vtanh.f32 %v3923_v60 }
 0xb70   :  { %v2966_v62 = vpop.eup %2965 }
 0xb71   :  { %938 = vrot.lane.b32.xlu2 %v2966_v62, %s3459_s16 }
 0xbca   :  { %v902_v39 = vpop.permute.xlu1 %901 }
 0xbcb   :  { %v939_v33 = vpop.permute.xlu2 %938  ;;  %v904_v55 = vmul.f32 %v902_v39, %v885_v38 }
 0xbcc   :  { %v941_v0 = vmul.f32 %v939_v33, %v922_v43 }
 0xbcd   :  { %943 = vrot.lane.b32.xlu0 %v904_v55, %s3459_s16 }
 0xbce   :  { %948 = vrot.lane.b32.xlu1 %v941_v0, %s3462_s7 }
 0xc3f   :  { %v944_v2 = vpop.permute.xlu0 %943 }
 0xc40   :  { %946 = vst.msk [vmem:[#allocation2 + $0x20] sm:$0xff] %vm324_vm1, %v944_v2  ;;  %v949_v49 = vpop.permute.xlu1 %948 }
 0xc41   :  { %951 = vst.msk [vmem:[#allocation2 + $0x18] sm:$0xff] %vm482_vm11, %v949_v49  ;;  %v952_v4 = vsel %vm324_vm1, %v944_v2, %v949_v49  ;;  %v291_v49 = vadd.f32 %v3772_v57, %v3764_v52 }
 0xc42   :  { %v953_v53 = vpack.c.bf16 %v952_v4, %v952_v4 }
 0xc44   :  { %2694 = vmatmul.msk.bf16.vlgmr.msrb.gmra.mxu2 %vm367_vm2, %v953_v53  ;;  %2695 = vmatmul.msk.bf16.vlgmr.msrb.gmra.mxu3 %vm367_vm2, %v953_v53 }
 0xcc7   :  { %v966_v9 = vpop.f32.mrf.mxu2  ;;  %v979_v10 = vpop.f32.mrf.mxu3 }
 0xcc8   :  { %v983_v11 = vadd.f32 %v966_v9, %v272_v8  ;;  %v984_v24 = vadd.f32 %v979_v10, %v3778_v61 }
 0xcca   :  { %2967 = vtanh.f32 %v983_v11  ;;  %v2696_v36 = vmul.f32 -1.442695, %v983_v11  ;;  %v2697_v42 = vmul.f32 -1.442695, %v984_v24 }
 0xccb   :  { %2969 = vtanh.f32 %v984_v24 }
 0xccc   :  { %2971 = vpow2.f32 %v2696_v36 }
 0xccf   :  { %v968_v23 = vpop.f32.mrf.mxu2  ;;  %v981_v30 = vpop.f32.mrf.mxu3 }
 0xcd0   :  { %v2968_v29 = vpop.eup %2967 }
 0xcd1   :  { %v2970_v50 = vpop.eup %2969  ;;  %1007 = vrot.lane.b32.xlu2 %v2968_v29, %s3459_s16 }
 0xcd2   :  { %1044 = vrot.lane.b32.xlu0 %v2970_v50, %s3459_s16  ;;  %v2972_v35 = vpop.eup %2971 }
 0xcd3   :  { %v988_v40 = vadd.f32 1.0, %v2972_v35 }
 0xcd5   :  { %2973 = vrcp.f32 %v988_v40  ;;  %v1000_v1 = vand.u32 2147483648, %v988_v40  ;;  %vm994_vm5 = vweird.f32 %v988_v40  ;;  %v998_v14 = vand.u32 2147483647, %v988_v40 }
 0xcd6   :  { %2975 = vpow2.f32 %v2697_v42 }
 0xcd7   :  { %v1001_v16 = vor.u32 1.1754944e-38, %v1000_v1  ;;  %vm999_vm7 = vcmp.eq.f32.partialorder %v998_v14, 8.507059e+37 }
 0xcdb   :  { %v2974_v7 = vpop.eup %2973 }
 0xcdc   :  { %v990_v51 = vmul.f32 %v2974_v7, %v988_v40  ;;  %v2976_v56 = vpop.eup %2975  ;;  %vm995_vm4 = vweird.f32 %v2974_v7 }
 0xcdd   :  { %v1025_v63 = vadd.f32 1.0, %v2976_v56  ;;  %vm996_vm6 = vmor %vm994_vm5, %vm995_vm4 }
 0xcde   :  { %v991_v61 = vsub.f32 1.0, %v990_v51 }
 0xcdf   :  { %2977 = vrcp.f32 %v1025_v63  ;;  %v1037_v28 = vand.u32 2147483648, %v1025_v63  ;;  %vm1031_vm9 = vweird.f32 %v1025_v63  ;;  %v1035_v31 = vand.u32 2147483647, %v1025_v63 }
 0xce0   :  { %v992_v3 = vmul.f32 %v2974_v7, %v991_v61 }
 0xce1   :  { %v1038_v34 = vor.u32 1.1754944e-38, %v1037_v28  ;;  %vm1036_vm12 = vcmp.eq.f32.partialorder %v1035_v31, 8.507059e+37 }
 0xce2   :  { %v993_v13 = vadd.f32 %v2974_v7, %v992_v3 }
 0xce4   :  { %v997_v15 = vsel %vm996_vm6, %v2974_v7, %v993_v13 }
 0xce5   :  { %v1002_v19 = vsel %vm999_vm7, %v1001_v16, %v997_v15  ;;  %v2978_v21 = vpop.eup %2977 }
 0xce6   :  { %v1027_v22 = vmul.f32 %v2978_v21, %v1025_v63  ;;  %vm1032_vm8 = vweird.f32 %v2978_v21  ;;  %v1005_v43 = vmul.f32 %v1002_v19, %v3918_v12 }
 0xce7   :  { %vm1033_vm10 = vmor %vm1031_vm9, %vm1032_vm8 }
 0xce8   :  { %v1028_v25 = vsub.f32 1.0, %v1027_v22 }
 0xcea   :  { %v1029_v26 = vmul.f32 %v2978_v21, %v1028_v25 }
 0xcec   :  { %v1030_v27 = vadd.f32 %v2978_v21, %v1029_v26 }
 0xcee   :  { %v1034_v32 = vsel %vm1033_vm10, %v2978_v21, %v1030_v27 }
 0xcef   :  { %v1039_v38 = vsel %vm1036_vm12, %v1038_v34, %v1034_v32 }
 0xcf0   :  { %v1042_v17 = vmul.f32 %v1039_v38, %v3923_v60 }
 0xd2b   :  { %v1008_v18 = vpop.permute.xlu2 %1007 }
 0xd2c   :  { %v1010_v20 = vmul.f32 %v1008_v18, %v1002_v19 }
 0xd2e   :  { %1012 = vrot.lane.b32.xlu1 %v1010_v20, %s3462_s7 }
 0xd44   :  { %v1045_v37 = vpop.permute.xlu0 %1044 }
 0xd45   :  { %v1047_v41 = vmul.f32 %v1045_v37, %v1039_v38 }
 0xd47   :  { %1049 = vrot.lane.b32.xlu2 %v1047_v41, %s3462_s7 }
 0xda0   :  { %v1013_v44 = vpop.permute.xlu1 %1012 }
 0xda1   :  { %v1050_v45 = vpop.permute.xlu2 %1049  ;;  %v3943_v46 = vadd.f32 %v1013_v44, %v1005_v43 }
 0xda2   :  { %v3945_v47 = vadd.f32 %v1050_v45, %v1042_v17 }
 0xda3   :  { %2979 = vtanh.f32 %v3943_v46 }
 0xda4   :  { %2981 = vtanh.f32 %v3945_v47 }
 0xda9   :  { %v2980_v5 = vpop.eup %2979 }
 0xdaa   :  { %v2982_v58 = vpop.eup %2981  ;;  %1018 = vrot.lane.b32.xlu0 %v2980_v5, %s3459_s16 }
 0xdab   :  { %1055 = vrot.lane.b32.xlu1 %v2982_v58, %s3459_s16 }
 0xe1c   :  { %v1019_v62 = vpop.permute.xlu0 %1018 }
 0xe1d   :  { %v1056_v12 = vpop.permute.xlu1 %1055  ;;  %v1021_v39 = vmul.f32 %v1019_v62, %v1002_v19 }
 0xe1e   :  { %v1058_v60 = vmul.f32 %v1056_v12, %v1039_v38 }
 0xe1f   :  { %1060 = vrot.lane.b32.xlu2 %v1021_v39, %s3459_s16  ;;  %v277_v39 = vadd.f32 %v3792_v6, %v3753_v48 }
 0xe20   :  { %1065 = vrot.lane.b32.xlu0 %v1058_v60, %s3462_s7 }
 0xe79   :  { %v1061_v33 = vpop.permute.xlu2 %1060 }
 0xe7a   :  { %1063 = vst.msk [vmem:[#allocation2 + $0x28] sm:$0xff] %vm324_vm1, %v1061_v33 }
 0xe92   :  { %v1066_v55 = vpop.permute.xlu0 %1065 }
 0xe93   :  { %1068 = vst.msk [vmem:[#allocation2 + $0x10] sm:$0xff] %vm482_vm11, %v1066_v55  ;;  %v1069_v0 = vsel %vm324_vm1, %v1061_v33, %v1066_v55 }
 0xe94   :  { %v1070_v2 = vpack.c.bf16 %v1069_v0, %v1069_v0 }
 0xe96   :  { %2698 = vmatmul.msk.bf16.vlgmr.msra.gmra.mxu0 %vm367_vm2, %v1070_v2  ;;  %2699 = vmatmul.msk.bf16.vlgmr.msrb.gmra.mxu1 %vm367_vm2, %v1070_v2 }
 0xf13   :  { %v1083_v4 = vpop.f32.mrf.mxu0  ;;  %v1096_v53 = vpop.f32.mrf.mxu1 }
 0xf14   :  { %v1100_v8 = vadd.f32 %v1083_v4, %v3775_v59  ;;  %v1101_v9 = vadd.f32 %v1096_v53, %v291_v49 }
 0xf16   :  { %2983 = vtanh.f32 %v1100_v8  ;;  %v2701_v30 = vmul.f32 -1.442695, %v1101_v9  ;;  %v2700_v57 = vmul.f32 -1.442695, %v1100_v8 }
 0xf17   :  { %2985 = vtanh.f32 %v1101_v9 }
 0xf18   :  { %2987 = vpow2.f32 %v2701_v30 }
 0xf1b   :  { %v1085_v10 = vpop.f32.mrf.mxu0  ;;  %v1098_v11 = vpop.f32.mrf.mxu1 }
 0xf1c   :  { %v2984_v24 = vpop.eup %2983 }
 0xf1d   :  { %v2986_v23 = vpop.eup %2985  ;;  %1124 = vrot.lane.b32.xlu1 %v2984_v24, %s3459_s16 }
 0xf1e   :  { %1161 = vrot.lane.b32.xlu2 %v2986_v23, %s3459_s16  ;;  %v2988_v29 = vpop.eup %2987 }
 0xf1f   :  { %v1142_v50 = vadd.f32 1.0, %v2988_v29 }
 0xf21   :  { %2989 = vrcp.f32 %v1142_v50  ;;  %v1154_v51 = vand.u32 2147483648, %v1142_v50  ;;  %vm1148_vm14 = vweird.f32 %v1142_v50  ;;  %v1152_v61 = vand.u32 2147483647, %v1142_v50 }
 0xf22   :  { %2991 = vpow2.f32 %v2700_v57 }
 0xf23   :  { %v1155_v56 = vor.u32 1.1754944e-38, %v1154_v51  ;;  %vm1153_vm0 = vcmp.eq.f32.partialorder %v1152_v61, 8.507059e+37 }
 0xf27   :  { %v2990_v52 = vpop.eup %2989 }
 0xf28   :  { %v1144_v36 = vmul.f32 %v2990_v52, %v1142_v50  ;;  %v2992_v35 = vpop.eup %2991  ;;  %vm1149_vm13 = vweird.f32 %v2990_v52 }
 0xf29   :  { %v1105_v7 = vadd.f32 1.0, %v2992_v35  ;;  %vm1150_vm15 = vmor %vm1148_vm14, %vm1149_vm13 }
 0xf2a   :  { %v1145_v59 = vsub.f32 1.0, %v1144_v36 }
 0xf2b   :  { %2993 = vrcp.f32 %v1105_v7  ;;  %v1117_v20 = vand.u32 2147483648, %v1105_v7  ;;  %vm1111_vm4 = vweird.f32 %v1105_v7  ;;  %v1115_v21 = vand.u32 2147483647, %v1105_v7 }
 0xf2c   :  { %v1146_v40 = vmul.f32 %v2990_v52, %v1145_v59 }
 0xf2d   :  { %v1118_v25 = vor.u32 1.1754944e-38, %v1117_v20  ;;  %vm1116_vm6 = vcmp.eq.f32.partialorder %v1115_v21, 8.507059e+37 }
 0xf2e   :  { %v1147_v42 = vadd.f32 %v2990_v52, %v1146_v40 }
 0xf30   :  { %v1151_v3 = vsel %vm1150_vm15, %v2990_v52, %v1147_v42 }
 0xf31   :  { %v1156_v13 = vsel %vm1153_vm0, %v1155_v56, %v1151_v3  ;;  %v2994_v1 = vpop.eup %2993 }
 0xf32   :  { %v1107_v15 = vmul.f32 %v2994_v1, %v1105_v7  ;;  %vm1112_vm3 = vweird.f32 %v2994_v1  ;;  %v1159_v31 = vmul.f32 %v1156_v13, %v3945_v47 }
 0xf33   :  { %vm1113_vm5 = vmor %vm1111_vm4, %vm1112_vm3 }
 0xf34   :  { %v1108_v16 = vsub.f32 1.0, %v1107_v15 }
 0xf36   :  { %v1109_v18 = vmul.f32 %v2994_v1, %v1108_v16 }
 0xf38   :  { %v1110_v19 = vadd.f32 %v2994_v1, %v1109_v18 }
 0xf3a   :  { %v1114_v22 = vsel %vm1113_vm5, %v2994_v1, %v1110_v19 }
 0xf3b   :  { %v1119_v27 = vsel %vm1116_vm6, %v1118_v25, %v1114_v22 }
 0xf3c   :  { %v1122_v38 = vmul.f32 %v1119_v27, %v3943_v46 }
 0xf78   :  { %v1162_v63 = vpop.permute.xlu2 %1161 }
 0xf79   :  { %v1164_v14 = vmul.f32 %v1162_v63, %v1156_v13 }
 0xf7b   :  { %1166 = vrot.lane.b32.xlu1 %v1164_v14, %s3462_s7 }
 0xf8f   :  { %v1125_v26 = vpop.permute.xlu1 %1124 }
 0xf90   :  { %v1127_v28 = vmul.f32 %v1125_v26, %v1119_v27 }
 0xf92   :  { %1129 = vrot.lane.b32.xlu0 %v1127_v28, %s3462_s7  ;;  %v2847_v28 = vld [vmem:[%s4372_s8 + $0x18] sm:$0xff] }
 0xf93   :  { %1367 = vmatpush.bf16.msrb.mxu0 %v2847_v28 }
 0xfed   :  { %v1167_v32 = vpop.permute.xlu1 %1166 }
 0xfee   :  { %v3966_v34 = vadd.f32 %v1167_v32, %v1159_v31  ;;  %v2846_v31 = vld [vmem:[%s4372_s8 + $0x10] sm:$0xff] }
 0xfef   :  { %1368 = vmatpush.bf16.msrb.mxu0 %v2846_v31  ;;  %v2852_v31 = vld [vmem:[#allocation17 + $0x4] sm:$0xf] }
 0xff0   :  { %2995 = vtanh.f32 %v3966_v34 }
 0xff6   :  { %v2996_v37 = vpop.eup %2995 }
 0xff7   :  { %1172 = vrot.lane.b32.xlu0 %v2996_v37, %s3459_s16 }
0x1004   :  { %v1130_v41 = vpop.permute.xlu0 %1129 }
0x1005   :  { %v3971_v43 = vadd.f32 %v1130_v41, %v1122_v38  ;;  %v2845_v41 = vld [vmem:[%s4372_s8 + $0x8] sm:$0xff] }
0x1006   :  { %1369 = vmatpush.bf16.msrb.mxu0 %v2845_v41 }
0x1007   :  { %2997 = vtanh.f32 %v3971_v43 }
0x100d   :  { %v2998_v17 = vpop.eup %2997 }
0x100e   :  { %1135 = vrot.lane.b32.xlu2 %v2998_v17, %s3459_s16 }
0x1068   :  { %v1136_v44 = vpop.permute.xlu2 %1135 }
0x1069   :  { %v1173_v45 = vpop.permute.xlu0 %1172  ;;  %v1138_v47 = vmul.f32 %v1136_v44, %v1119_v27 }
0x106a   :  { %v1175_v5 = vmul.f32 %v1173_v45, %v1156_v13 }
0x106b   :  { %1177 = vrot.lane.b32.xlu1 %v1138_v47, %s3459_s16 }
0x106c   :  { %1182 = vrot.lane.b32.xlu2 %v1175_v5, %s3462_s7 }
0x10c6   :  { %v1183_v58 = vpop.permute.xlu2 %1182 }
0x10c7   :  { %1185 = vst.msk [vmem:[#allocation2 + $0x8] sm:$0xff] %vm482_vm11, %v1183_v58 }
0x10ce   :  { %v1304_v47 = vld [vmem:[#allocation2 + $0x8] sm:$0xff] }
0x10dd   :  { %v1178_v46 = vpop.permute.xlu1 %1177 }
0x10de   :  { %1180 = vst.msk [vmem:[#allocation2 + $0x30] sm:$0xff] %vm324_vm1, %v1178_v46  ;;  %v1186_v62 = vsel %vm324_vm1, %v1178_v46, %v1183_v58  ;;  %v1506_v58 = vld [vmem:[#allocation14] sm:$0xff] }
0x10df   :  { %v1187_v12 = vpack.c.bf16 %v1186_v62, %v1186_v62  ;;  %v1305_v46 = vld [vmem:[#allocation2 + $0x10] sm:$0xff]  ;;  %v1306_v62 = vld [vmem:[#allocation2 + $0x18] sm:$0xff] }
0x10e1   :  { %2702 = vmatmul.msk.bf16.vlgmr.msra.gmra.mxu2 %vm367_vm2, %v1187_v12  ;;  %2703 = vmatmul.msk.bf16.vlgmr.msra.gmra.mxu3 %vm367_vm2, %v1187_v12  ;;  %v1312_v12 = vpack.c.bf16 %v1306_v62, %v1305_v46 }
0x1164   :  { %v1200_v60 = vpop.f32.mrf.mxu2  ;;  %v1213_v33 = vpop.f32.mrf.mxu3 }
0x1165   :  { %v1217_v55 = vadd.f32 %v1200_v60, %v277_v39  ;;  %v1218_v0 = vadd.f32 %v1213_v33, %v3767_v54  ;;  %v2776_v39 = vld [vmem:[#allocation17 + $0x30] sm:$0xf]  ;;  %v2859_v60 = vld [vmem:[#allocation17 + $0x34] sm:$0xf0] }
0x1166   :  { %v2850_v33 = vld [vmem:[%s4378_s14 + $0x14] sm:$0xf] }
0x1167   :  { %2999 = vtanh.f32 %v1217_v55  ;;  %v2704_v8 = vmul.f32 -1.442695, %v1217_v55  ;;  %v2705_v6 = vmul.f32 -1.442695, %v1218_v0  ;;  %v4015_v55 = vor.u32 %v2859_v60, %v2776_v39 }
0x1168   :  { %3001 = vtanh.f32 %v1218_v0  ;;  %v2738_v0 = vld [vmem:[%s4378_s14 + $0x18] sm:$0xf0] }
0x1169   :  { %3003 = vpow2.f32 %v2704_v8  ;;  %1561 = vmatpush.bf16.msrb.mxu3 %v4015_v55  ;;  %v1308_v8 = vld [vmem:[#allocation2 + $0x28] sm:$0xff] }
0x116c   :  { %v1202_v2 = vpop.f32.mrf.mxu2  ;;  %v1215_v49 = vpop.f32.mrf.mxu3 }
0x116d   :  { %v3000_v4 = vpop.eup %2999  ;;  %v2768_v2 = vld [vmem:[#allocation17 + $0x20] sm:$0xf]  ;;  %v2857_v49 = vld [vmem:[#allocation17 + $0x24] sm:$0xf0] }
0x116e   :  { %v3002_v53 = vpop.eup %3001  ;;  %1241 = vrot.lane.b32.xlu2 %v3000_v4, %s3459_s16  ;;  %v2741_v4 = vor.u32 %v2850_v33, %v2738_v0 }
0x116f   :  { %1278 = vrot.lane.b32.xlu0 %v3002_v53, %s3459_s16  ;;  %v3004_v9 = vpop.eup %3003  ;;  %v4021_v53 = vor.u32 %v2857_v49, %v2768_v2  ;;  %v1400_v49 = vld [vmem:[%s4379_s15] sm:$0x3]  ;;  %s3463_s15 = smov [#allocation21]  }
0x1170   :  { %v1222_v10 = vadd.f32 1.0, %v3004_v9  ;;  %1473 = vmatpush.bf16.msrb.mxu2 %v2741_v4  ;;  %v1307_v9 = vld [vmem:[#allocation2 + $0x20] sm:$0xff]  ;;  %v4114_v4 = vperm.slane %v1400_v49, 0 }
0x1171   :  { %1562 = vmatpush.bf16.msrb.mxu3 %v4021_v53 }
0x1172   :  { %3005 = vrcp.f32 %v1222_v10  ;;  %v1234_v50 = vand.u32 2147483648, %v1222_v10  ;;  %vm1228_vm8 = vweird.f32 %v1222_v10  ;;  %v1232_v52 = vand.u32 2147483647, %v1222_v10 }
0x1173   :  { %3007 = vpow2.f32 %v2705_v6  ;;  %v1309_v6 = vld [vmem:[#allocation2 + $0x30] sm:$0xff] }
0x1174   :  { %v1235_v36 = vor.u32 1.1754944e-38, %v1234_v50  ;;  %vm1233_vm10 = vcmp.eq.f32.partialorder %v1232_v52, 8.507059e+37  ;;  %v1504_v50 = vld [vmem:[%s4374_s10] sm:$0xff] }
0x1178   :  { %v3006_v48 = vpop.eup %3005 }
0x1179   :  { %v1224_v11 = vmul.f32 %v3006_v48, %v1222_v10  ;;  %v3008_v23 = vpop.eup %3007  ;;  %vm1229_vm7 = vweird.f32 %v3006_v48  ;;  %v1313_v10 = vpack.c.bf16 %v1308_v8, %v1307_v9 }
0x117a   :  { %v1259_v30 = vadd.f32 1.0, %v3008_v23  ;;  %vm1230_vm9 = vmor %vm1228_vm8, %vm1229_vm7 }
0x117b   :  { %v1225_v54 = vsub.f32 1.0, %v1224_v11 }
0x117c   :  { %3009 = vrcp.f32 %v1259_v30  ;;  %v1271_v56 = vand.u32 2147483648, %v1259_v30  ;;  %vm1265_vm13 = vweird.f32 %v1259_v30  ;;  %v1269_v63 = vand.u32 2147483647, %v1259_v30 }
0x117d   :  { %v1226_v24 = vmul.f32 %v3006_v48, %v1225_v54  ;;  %v2760_v54 = vld [vmem:[#allocation17 + $0x10] sm:$0xf] }
0x117e   :  { %v1272_v1 = vor.u32 1.1754944e-38, %v1271_v56  ;;  %vm1270_vm15 = vcmp.eq.f32.partialorder %v1269_v63, 8.507059e+37  ;;  %v2849_v56 = vld [vmem:[%s4378_s14 + $0x4] sm:$0xf0] }
0x117f   :  { %v1227_v29 = vadd.f32 %v3006_v48, %v1226_v24  ;;  %v2855_v24 = vld [vmem:[#allocation17 + $0x14] sm:$0xf0] }
0x1180   :  { %v4028_v23 = vor.u32 %v2855_v24, %v2760_v54 }
0x1181   :  { %v1231_v57 = vsel %vm1230_vm9, %v3006_v48, %v1227_v29  ;;  %v2730_v29 = vld [vmem:[%s4378_s14 + $0x8] sm:$0xf0] }
0x1182   :  { %v1236_v35 = vsel %vm1233_vm10, %v1235_v36, %v1231_v57  ;;  %v3010_v7 = vpop.eup %3009  ;;  %1563 = vmatpush.bf16.msrb.mxu3 %v4028_v23 }
0x1183   :  { %v1261_v42 = vmul.f32 %v3010_v7, %v1259_v30  ;;  %vm1266_vm12 = vweird.f32 %v3010_v7  ;;  %v1239_v18 = vmul.f32 %v1236_v35, %v3971_v43  ;;  %v2844_v43 = vld [vmem:[%s4372_s8] sm:$0xff] }
0x1184   :  { %vm1267_vm14 = vmor %vm1265_vm13, %vm1266_vm12  ;;  %1370 = vmatpush.bf16.msrb.mxu0 %v2844_v43  ;;  %v2848_v30 = vld [vmem:[%s4378_s14 + $0x4] sm:$0xf] }
0x1185   :  { %v1262_v51 = vsub.f32 1.0, %v1261_v42  ;;  %v2733_v57 = vor.u32 %v2848_v30, %v2730_v29  ;;  %v2853_v42 = vld [vmem:[#allocation17 + $0x4] sm:$0xf0] }
0x1187   :  { %v1263_v61 = vmul.f32 %v3010_v7, %v1262_v51  ;;  %1474 = vmatpush.bf16.msrb.mxu2 %v2733_v57 }
0x1188   :  { %1795 = vmatpush.bf16.msra.mxu0 %v4015_v55 }
0x1189   :  { %v1264_v3 = vadd.f32 %v3010_v7, %v1263_v61 }
0x118b   :  { %v1268_v13 = vsel %vm1267_vm14, %v3010_v7, %v1264_v3  ;;  %1912 = vmatpush.bf16.msra.mxu2 %v4015_v55  ;;  %v2728_v3 = vld [vmem:[%s4378_s14] sm:$0xf] }
0x118c   :  { %v1273_v15 = vsel %vm1270_vm15, %v1272_v1, %v1268_v13  ;;  %1796 = vmatpush.bf16.msra.mxu0 %v4021_v53  ;;  %v2729_v63 = vor.u32 %v2849_v56, %v2728_v3  ;;  %v2858_v13 = vld [vmem:[#allocation17 + $0x34] sm:$0xf]  ;;  %v2778_v1 = vld [vmem:[#allocation17 + $0x38] sm:$0xf0] }
0x118d   :  { %v1276_v22 = vmul.f32 %v1273_v15, %v3966_v34 }
0x118f   :  { %1913 = vmatpush.bf16.msra.mxu2 %v4021_v53 }
0x1190   :  { %1797 = vmatpush.bf16.msra.mxu0 %v4028_v23 }
0x1193   :  { %1914 = vmatpush.bf16.msra.mxu2 %v4028_v23 }
0x11c8   :  { %v1242_v59 = vpop.permute.xlu2 %1241 }
0x11c9   :  { %v1244_v40 = vmul.f32 %v1242_v59, %v1236_v35  ;;  %v2736_v59 = vld [vmem:[%s4378_s14 + $0x10] sm:$0xf] }
0x11cb   :  { %1246 = vrot.lane.b32.xlu0 %v1244_v40, %s3462_s7  ;;  %v2752_v40 = vld [vmem:[#allocation17] sm:$0xf] }
0x11cc   :  { %v4048_v51 = vor.u32 %v2853_v42, %v2752_v40 }
0x11ce   :  { %1564 = vmatpush.bf16.msrb.mxu3 %v4048_v51  ;;  %1798 = vmatpush.bf16.msra.mxu0 %v4048_v51 }
0x11cf   :  { %1915 = vmatpush.bf16.msra.mxu2 %v4048_v51 }
0x11e1   :  { %v1279_v14 = vpop.permute.xlu0 %1278 }
0x11e2   :  { %v1281_v16 = vmul.f32 %v1279_v14, %v1273_v15  ;;  %v4067_v14 = vor.u32 %v2858_v13, %v2778_v1 }
0x11e4   :  { %1283 = vrot.lane.b32.xlu1 %v1281_v16, %s3462_s7  ;;  %1574 = vmatpush.bf16.msra.mxu3 %v4067_v14  ;;  %v2856_v16 = vld [vmem:[#allocation17 + $0x24] sm:$0xf] }
0x123d   :  { %v1247_v19 = vpop.permute.xlu0 %1246 }
0x123e   :  { %v1249_v20 = vadd.f32 %v1247_v19, %v1239_v18  ;;  %v2770_v18 = vld [vmem:[#allocation17 + $0x28] sm:$0xf0] }
0x123f   :  { %v4071_v19 = vor.u32 %v2856_v16, %v2770_v18 }
0x1240   :  { %3011 = vtanh.f32 %v1249_v20  ;;  %v2885_v20 = vld [vmem:[%s4373_s9] ss:$0 sm:$0xff] }
0x1241   :  { %1575 = vmatpush.bf16.msra.mxu3 %v4071_v19 }
0x1246   :  { %v3012_v21 = vpop.eup %3011 }
0x1247   :  { %1252 = vrot.lane.b32.xlu0 %v3012_v21, %s3459_s16  ;;  %v2854_v21 = vld [vmem:[#allocation17 + $0x14] sm:$0xf] }
0x1256   :  { %v1284_v25 = vpop.permute.xlu1 %1283 }
0x1257   :  { %v1286_v26 = vadd.f32 %v1284_v25, %v1276_v22  ;;  %v2762_v22 = vld [vmem:[#allocation17 + $0x18] sm:$0xf0] }
0x1258   :  { %v4078_v25 = vor.u32 %v2854_v21, %v2762_v22 }
0x1259   :  { %3013 = vtanh.f32 %v1286_v26 }
0x125a   :  { %1576 = vmatpush.bf16.msra.mxu3 %v4078_v25 }
0x125f   :  { %v3014_v27 = vpop.eup %3013 }
0x1260   :  { %1289 = vrot.lane.b32.xlu1 %v3014_v27, %s3459_s16 }
0x12b9   :  { %v1253_v32 = vpop.permute.xlu0 %1252 }
0x12ba   :  { %v1255_v37 = vmul.f32 %v1253_v32, %v1236_v35  ;;  %v2851_v35 = vld [vmem:[%s4378_s14 + $0x14] sm:$0xf0]  ;;  %v2754_v32 = vld [vmem:[#allocation17 + $0x8] sm:$0xf0] }
0x12bb   :  { %v2737_v7 = vor.u32 %v2851_v35, %v2736_v59 }
0x12bc   :  { %1294 = vrot.lane.b32.xlu1 %v1255_v37, %s3459_s16  ;;  %v4082_v37 = vor.u32 %v2852_v31, %v2754_v32 }
0x12bd   :  { %1444 = vmatpush.bf16.msra.mxu1 %v2737_v7 }
0x12be   :  { %1577 = vmatpush.bf16.msra.mxu3 %v4082_v37 }
0x12c1   :  { %1445 = vmatpush.bf16.msra.mxu1 %v2729_v63 }
0x12c5   :  { %1808 = vmatpush.bf16.msrb.mxu1 %v4067_v14 }
0x12c9   :  { %1809 = vmatpush.bf16.msrb.mxu1 %v4071_v19 }
0x12cd   :  { %1810 = vmatpush.bf16.msrb.mxu1 %v4078_v25 }
0x12d1   :  { %1811 = vmatpush.bf16.msrb.mxu1 %v4082_v37 }
0x12d2   :  { %v1290_v34 = vpop.permute.xlu1 %1289 }
0x12d3   :  { %v1292_v38 = vmul.f32 %v1290_v34, %v1273_v15 }
0x12d5   :  { %1299 = vrot.lane.b32.xlu2 %v1292_v38, %s3462_s7 }
0x12dd   :  { %1509 = vrot.lane.b32.xlu2 %v1506_v58, %s3461_s3  ;;  %s4397_s3 = sld [smem:[#allocation36_spill]] }
0x12e3   :  { %s2592_s0 = sshll.u32 %s4397_s3, 4  ;;  %s2593_s0 = int_to_ptr.hbm [resolvable:$true] %s2592_s0 }
0x132e   :  { %v1295_v17 = vpop.permute.xlu1 %1294 }
0x132f   :  { %v1300_v44 = vpop.permute.xlu2 %1299  ;;  %1297 = vst.msk [vmem:[#allocation2 + $0x38] sm:$0xff] %vm324_vm1, %v1295_v17 }
0x1330   :  { %1302 = vst.msk [vmem:[#allocation2] sm:$0xff] %vm482_vm11, %v1300_v44 }
0x1336   :  { %v1310_v48 = vld [vmem:[#allocation2 + $0x38] sm:$0xff] }
0x1337   :  { %v1303_v45 = vld [vmem:[#allocation2] sm:$0xff]  ;;  %v1314_v11 = vpack.c.bf16 %v1310_v48, %v1309_v6  ;;  %v1510_v52 = vpop.permute.xlu2 %1509  ;;  %v1403_v48 = vperm.slane %v1400_v49, 1 }
0x1338   :  { %v1311_v5 = vpack.c.bf16 %v1304_v47, %v1303_v45  ;;  %v1512_v36 = vsel %vm324_vm1, %v1504_v50, %v1510_v52 }
0x1339   :  { %v1513_v61 = vpack.c.bf16 %v1512_v36, %v1512_v36 }
0x133a   :  { %2722 = vmatmul.msk.bf16.vlgmr.msrb.gmra.mxu0 %vm367_vm2, %v1311_v5 }
0x133b   :  { %2029 = vmatpush.bf16.msrb.mxu0 %v4015_v55  ;;  %2782 = vmatmul.msk.bf16.vlgmr.msrb.gmra.mxu3 %vm367_vm2, %v1513_v61 }
0x133c   :  { %1678 = vmatpush.bf16.msrb.mxu3 %v4015_v55 }
0x133f   :  { %2030 = vmatpush.bf16.msrb.mxu0 %v4021_v53 }
0x1340   :  { %1679 = vmatpush.bf16.msrb.mxu3 %v4021_v53 }
0x1343   :  { %2031 = vmatpush.bf16.msrb.mxu0 %v4028_v23 }
0x1344   :  { %1680 = vmatpush.bf16.msrb.mxu3 %v4028_v23 }
0x1347   :  { %2032 = vmatpush.bf16.msrb.mxu0 %v4048_v51 }
0x1348   :  { %1681 = vmatpush.bf16.msrb.mxu3 %v4048_v51 }
0x134a   :  { %2723 = vmatmul.msk.bf16.gmra.mxu0 %vm367_vm2, %v1312_v12 }
0x134b   :  { %2783 = vmatmul.msk.bf16.vlgmr.msra.gmra.mxu3 %vm367_vm2, %v1513_v61 }
0x134c   :  { %1691 = vmatpush.bf16.msra.mxu3 %v4067_v14 }
0x1350   :  { %1692 = vmatpush.bf16.msra.mxu3 %v4071_v19 }
0x1354   :  { %1693 = vmatpush.bf16.msra.mxu3 %v4078_v25 }
0x1358   :  { %1694 = vmatpush.bf16.msra.mxu3 %v4082_v37 }
0x135a   :  { %2724 = vmatmul.msk.bf16.gmra.mxu0 %vm367_vm2, %v1313_v10 }
0x136a   :  { %2725 = vmatmul.msk.bf16.gmra.mxu0 %vm367_vm2, %v1314_v11 }
0x13b7   :  { %v1372_v15 = vpop.f32.mrf.mxu0 }
0x13b8   :  { %v1373_v27 = vadd.f32 %v2885_v20, %v1372_v15 }
0x13be   :  { %v1566_v0 = vpop.f32.mrf.mxu3 }
0x13bf   :  { %v1374_v26 = vpop.f32.mrf.mxu0 }
0x13c0   :  { %v1375_v28 = vadd.f32 %v2885_v20, %v1374_v26 }
0x13c2   :  { %v1392_v34 = vpack.c.bf16 %v1375_v28, %v1373_v27 }
0x13c4   :  { %2742 = vmatmul.msk.bf16.vlgmr.msra.gmra.mxu1 %vm324_vm1, %v1392_v34  ;;  %2746 = vmatmul.msk.bf16.vlgmr.msrb.gmra.mxu2 %vm324_vm1, %v1392_v34 }
0x13c5   :  { %2042 = vmatpush.bf16.msra.mxu1 %v4067_v14  ;;  %2146 = vmatpush.bf16.msrb.mxu2 %v4015_v55 }
0x13c6   :  { %v1568_v2 = vpop.f32.mrf.mxu3 }
0x13c7   :  { %v1377_v38 = vpop.f32.mrf.mxu0 }
0x13c8   :  { %v1378_v43 = vadd.f32 %v2885_v20, %v1377_v38 }
0x13c9   :  { %2043 = vmatpush.bf16.msra.mxu1 %v4071_v19  ;;  %2147 = vmatpush.bf16.msrb.mxu2 %v4021_v53 }
0x13cd   :  { %2044 = vmatpush.bf16.msra.mxu1 %v4078_v25  ;;  %2148 = vmatpush.bf16.msrb.mxu2 %v4028_v23 }
0x13ce   :  { %v1579_v24 = vpop.f32.mrf.mxu3 }
0x13cf   :  { %v1379_v41 = vpop.f32.mrf.mxu0 }
0x13d0   :  { %v1380_v17 = vadd.f32 %v2885_v20, %v1379_v41 }
0x13d1   :  { %2045 = vmatpush.bf16.msra.mxu1 %v4082_v37  ;;  %2149 = vmatpush.bf16.msrb.mxu2 %v4048_v51 }
0x13d2   :  { %v1393_v44 = vpack.c.bf16 %v1380_v17, %v1378_v43 }
0x13d4   :  { %2743 = vmatmul.msk.bf16.gmra.mxu1 %vm324_vm1, %v1393_v44  ;;  %2747 = vmatmul.msk.bf16.gmra.mxu2 %vm324_vm1, %v1393_v44 }
0x13d6   :  { %v1581_v57 = vpop.f32.mrf.mxu3 }
0x13d7   :  { %v1382_v45 = vpop.f32.mrf.mxu0 }
0x13d8   :  { %v1383_v5 = vadd.f32 %v2885_v20, %v1382_v45 }
0x13df   :  { %v1384_v47 = vpop.f32.mrf.mxu0 }
0x13e0   :  { %v1385_v58 = vadd.f32 %v2885_v20, %v1384_v47 }
0x13e2   :  { %v1394_v46 = vpack.c.bf16 %v1385_v58, %v1383_v5 }
0x13e4   :  { %2744 = vmatmul.msk.bf16.gmra.mxu1 %vm324_vm1, %v1394_v46  ;;  %2748 = vmatmul.msk.bf16.gmra.mxu2 %vm324_vm1, %v1394_v46 }
0x13e7   :  { %v1387_v62 = vpop.f32.mrf.mxu0 }
0x13e8   :  { %v1388_v39 = vadd.f32 %v2885_v20, %v1387_v62 }
0x13ef   :  { %v1389_v12 = vpop.f32.mrf.mxu0 }
0x13f0   :  { %v1390_v60 = vadd.f32 %v2885_v20, %v1389_v12 }
0x13f2   :  { %v1395_v33 = vpack.c.bf16 %v1390_v60, %v1388_v39 }
0x13f4   :  { %2745 = vmatmul.msk.bf16.gmra.mxu1 %vm324_vm1, %v1395_v33  ;;  %2749 = vmatmul.msk.bf16.gmra.mxu2 %vm324_vm1, %v1395_v33 }
0x1441   :  { %v1447_v8 = vpop.f32.mrf.mxu1 }
0x1442   :  { %v1448_v9 = vadd.f32 %v1447_v8, %v4114_v4 }
0x1444   :  { %v1583_v10 = vadd.f32 %v1566_v0, %v1448_v9 }
0x1446   :  { %3015 = vtanh.f32 %v1583_v10  ;;  %v2784_v32 = vmul.f32 -1.442695, %v1583_v10 }
0x1447   :  { %v1476_v6 = vpop.f32.mrf.mxu2 }
0x1448   :  { %v4117_v11 = vadd.f32 %v1476_v6, %v1403_v48 }
0x1449   :  { %v4119_v54 = vpop.f32.mrf.mxu1 }
0x144c   :  { %v3016_v30 = vpop.eup %3015 }
0x144d   :  { %1607 = vrot.lane.b32.xlu0 %v3016_v30, %s3459_s16 }
0x144f   :  { %v1478_v29 = vpop.f32.mrf.mxu2 }
0x1450   :  { %v4122_v50 = vadd.f32 %v1478_v29, %v1403_v48 }
0x1451   :  { %v4124_v52 = vpop.f32.mrf.mxu1 }
0x1457   :  { %v1481_v36 = vpop.f32.mrf.mxu2 }
0x1458   :  { %v4126_v59 = vadd.f32 %v1481_v36, %v1403_v48 }
0x1459   :  { %v1454_v35 = vpop.f32.mrf.mxu1 }
0x145a   :  { %v4129_v40 = vadd.f32 %v1454_v35, %v4114_v4  ;;  %v1505_v35 = vld [vmem:[#allocation12] sm:$0xff] }
0x145f   :  { %v1483_v7 = vpop.f32.mrf.mxu2 }
0x1460   :  { %v4131_v42 = vadd.f32 %v1483_v7, %v1403_v48 }
0x1461   :  { %v1457_v61 = vpop.f32.mrf.mxu1 }
0x1462   :  { %v4134_v3 = vadd.f32 %v1457_v61, %v4114_v4 }
0x1467   :  { %v1486_v56 = vpop.f32.mrf.mxu2 }
0x1468   :  { %v4136_v63 = vadd.f32 %v1486_v56, %v1403_v48 }
0x1469   :  { %v1459_v13 = vpop.f32.mrf.mxu1 }
0x146a   :  { %v4139_v1 = vadd.f32 %v1459_v13, %v4114_v4 }
0x146f   :  { %v1488_v15 = vpop.f32.mrf.mxu2 }
0x1470   :  { %v4141_v16 = vadd.f32 %v1488_v15, %v1403_v48  ;;  %v1507_v15 = vld [vmem:[#allocation15] sm:$0xff] }
0x1471   :  { %v1462_v18 = vpop.f32.mrf.mxu1 }
0x1472   :  { %v4144_v20 = vadd.f32 %v1462_v18, %v4114_v4 }
0x1477   :  { %v1491_v21 = vpop.f32.mrf.mxu2 }
0x1478   :  { %v4146_v22 = vadd.f32 %v1491_v21, %v1403_v48 }
0x147f   :  { %v1493_v26 = vpop.f32.mrf.mxu2 }
0x1480   :  { %v1494_v27 = vadd.f32 %v1493_v26, %v1403_v48 }
0x1482   :  { %v1584_v28 = vadd.f32 %v1579_v24, %v1494_v27 }
0x1484   :  { %3017 = vtanh.f32 %v1584_v28  ;;  %v2785_v60 = vmul.f32 -1.442695, %v1584_v28 }
0x1485   :  { %3019 = vpow2.f32 %v2784_v32 }
0x148a   :  { %v3018_v31 = vpop.eup %3017 }
0x148b   :  { %1644 = vrot.lane.b32.xlu1 %v3018_v31, %s3459_s16  ;;  %v3020_v34 = vpop.eup %3019 }
0x148c   :  { %v1588_v38 = vadd.f32 1.0, %v3020_v34 }
0x148e   :  { %3021 = vrcp.f32 %v1588_v38  ;;  %v1600_v47 = vand.u32 2147483648, %v1588_v38  ;;  %vm1594_vm3 = vweird.f32 %v1588_v38  ;;  %v1598_v5 = vand.u32 2147483647, %v1588_v38 }
0x148f   :  { %3023 = vpow2.f32 %v2785_v60 }
0x1490   :  { %v1601_v46 = vor.u32 1.1754944e-38, %v1600_v47  ;;  %vm1599_vm5 = vcmp.eq.f32.partialorder %v1598_v5, 8.507059e+37 }
0x1494   :  { %v3022_v41 = vpop.eup %3021 }
0x1495   :  { %v1590_v43 = vmul.f32 %v3022_v41, %v1588_v38  ;;  %vm1595_vm0 = vweird.f32 %v3022_v41  ;;  %v3024_v33 = vpop.eup %3023 }
0x1496   :  { %vm1596_vm4 = vmor %vm1594_vm3, %vm1595_vm0  ;;  %v1625_v0 = vadd.f32 1.0, %v3024_v33 }
0x1497   :  { %v1591_v17 = vsub.f32 1.0, %v1590_v43 }
0x1498   :  { %3025 = vrcp.f32 %v1625_v0  ;;  %v1637_v48 = vand.u32 2147483648, %v1625_v0  ;;  %vm1631_vm7 = vweird.f32 %v1625_v0  ;;  %v1635_v6 = vand.u32 2147483647, %v1625_v0 }
0x1499   :  { %v1592_v44 = vmul.f32 %v3022_v41, %v1591_v17 }
0x149a   :  { %v1638_v30 = vor.u32 1.1754944e-38, %v1637_v48  ;;  %vm1636_vm9 = vcmp.eq.f32.partialorder %v1635_v6, 8.507059e+37 }
0x149b   :  { %v1593_v45 = vadd.f32 %v3022_v41, %v1592_v44  ;;  %v1450_v44 = vadd.f32 %v4119_v54, %v4114_v4 }
0x149d   :  { %v1597_v58 = vsel %vm1596_vm4, %v3022_v41, %v1593_v45 }
0x149e   :  { %v1602_v62 = vsel %vm1599_vm5, %v1601_v46, %v1597_v58  ;;  %v3026_v2 = vpop.eup %3025 }
0x149f   :  { %v1627_v49 = vmul.f32 %v3026_v2, %v1625_v0  ;;  %vm1632_vm6 = vweird.f32 %v3026_v2  ;;  %v1605_v7 = vmul.f32 %v1602_v62, %v1505_v35 }
0x14a0   :  { %vm1633_vm8 = vmor %vm1631_vm7, %vm1632_vm6 }
0x14a1   :  { %v1628_v8 = vsub.f32 1.0, %v1627_v49 }
0x14a3   :  { %v1629_v9 = vmul.f32 %v3026_v2, %v1628_v8 }
0x14a5   :  { %v1630_v10 = vadd.f32 %v3026_v2, %v1629_v9 }
0x14a7   :  { %v1634_v24 = vsel %vm1633_vm8, %v3026_v2, %v1630_v10 }
0x14a8   :  { %v1639_v57 = vsel %vm1636_vm9, %v1638_v30, %v1634_v24 }
0x14a9   :  { %v1642_v18 = vmul.f32 %v1639_v57, %v1507_v15 }
0x14bf   :  { %v1608_v12 = vpop.permute.xlu0 %1607 }
0x14c0   :  { %v1610_v39 = vmul.f32 %v1608_v12, %v1602_v62 }
0x14c2   :  { %1612 = vrot.lane.b32.xlu2 %v1610_v39, %s3462_s7 }
0x14fd   :  { %v1645_v29 = vpop.permute.xlu1 %1644 }
0x14fe   :  { %v1647_v36 = vmul.f32 %v1645_v29, %v1639_v57 }
0x1500   :  { %1649 = vrot.lane.b32.xlu0 %v1647_v36, %s3462_s7 }
0x151c   :  { %v1613_v61 = vpop.permute.xlu2 %1612 }
0x151d   :  { %v4151_v56 = vadd.f32 %v1613_v61, %v1605_v7 }
0x151f   :  { %3027 = vtanh.f32 %v4151_v56 }
0x1525   :  { %v3028_v13 = vpop.eup %3027 }
0x1526   :  { %1618 = vrot.lane.b32.xlu1 %v3028_v13, %s3459_s16 }
0x1572   :  { %v1650_v21 = vpop.permute.xlu0 %1649 }
0x1573   :  { %v4155_v26 = vadd.f32 %v1650_v21, %v1642_v18 }
0x1575   :  { %3029 = vtanh.f32 %v4155_v26 }
0x157b   :  { %v3030_v27 = vpop.eup %3029 }
0x157c   :  { %1655 = vrot.lane.b32.xlu2 %v3030_v27, %s3459_s16 }
0x1598   :  { %v1619_v28 = vpop.permute.xlu1 %1618 }
0x1599   :  { %v1621_v31 = vmul.f32 %v1619_v28, %v1602_v62 }
0x159b   :  { %1660 = vrot.lane.b32.xlu0 %v1621_v31, %s3459_s16 }
0x15d6   :  { %v1656_v32 = vpop.permute.xlu2 %1655 }
0x15d7   :  { %v1658_v34 = vmul.f32 %v1656_v32, %v1639_v57 }
0x15d9   :  { %1665 = vrot.lane.b32.xlu1 %v1658_v34, %s3462_s7 }
0x160d   :  { %v1661_v38 = vpop.permute.xlu0 %1660 }
0x160e   :  { %1663 = vst.msk [vmem:[#allocation2] sm:$0xff] %vm324_vm1, %v1661_v38 }
0x164b   :  { %v1666_v41 = vpop.permute.xlu1 %1665 }
0x164c   :  { %1668 = vst.msk [vmem:[#allocation2 + $0x38] sm:$0xff] %vm482_vm11, %v1666_v41  ;;  %v1669_v43 = vsel %vm324_vm1, %v1661_v38, %v1666_v41 }
0x164d   :  { %v1670_v17 = vpack.c.bf16 %v1669_v43, %v1669_v43 }
0x164f   :  { %2786 = vmatmul.msk.bf16.vlgmr.msrb.gmra.mxu3 %vm367_vm2, %v1670_v17 }
0x1650   :  { %1925 = vmatpush.bf16.msrb.mxu3 %v4067_v14 }
0x1654   :  { %1926 = vmatpush.bf16.msrb.mxu3 %v4071_v19 }
0x1658   :  { %1927 = vmatpush.bf16.msrb.mxu3 %v4078_v25 }
0x165c   :  { %1928 = vmatpush.bf16.msrb.mxu3 %v4082_v37 }
0x165f   :  { %2787 = vmatmul.msk.bf16.vlgmr.msra.gmra.mxu3 %vm367_vm2, %v1670_v17 }
0x1660   :  { %2159 = vmatpush.bf16.msra.mxu3 %v4067_v14 }
0x1664   :  { %2160 = vmatpush.bf16.msra.mxu3 %v4071_v19 }
0x1668   :  { %2161 = vmatpush.bf16.msra.mxu3 %v4078_v25 }
0x166c   :  { %2162 = vmatpush.bf16.msra.mxu3 %v4082_v37 }
0x16d2   :  { %v1683_v45 = vpop.f32.mrf.mxu3 }
0x16d3   :  { %v1700_v47 = vadd.f32 %v1683_v45, %v1450_v44 }
0x16d5   :  { %3031 = vtanh.f32 %v1700_v47  ;;  %v2788_v60 = vmul.f32 -1.442695, %v1700_v47 }
0x16da   :  { %v1685_v5 = vpop.f32.mrf.mxu3 }
0x16db   :  { %v3032_v58 = vpop.eup %3031 }
0x16dc   :  { %1724 = vrot.lane.b32.xlu2 %v3032_v58, %s3459_s16 }
0x16e2   :  { %v1696_v46 = vpop.f32.mrf.mxu3 }
0x16e3   :  { %v1701_v62 = vadd.f32 %v1696_v46, %v4146_v22 }
0x16e5   :  { %3033 = vtanh.f32 %v1701_v62  ;;  %v2789_v48 = vmul.f32 -1.442695, %v1701_v62 }
0x16e6   :  { %3035 = vpow2.f32 %v2788_v60 }
0x16ea   :  { %v1698_v12 = vpop.f32.mrf.mxu3 }
0x16eb   :  { %v3034_v39 = vpop.eup %3033 }
0x16ec   :  { %1761 = vrot.lane.b32.xlu0 %v3034_v39, %s3459_s16  ;;  %v3036_v33 = vpop.eup %3035 }
0x16ed   :  { %v1705_v0 = vadd.f32 1.0, %v3036_v33 }
0x16ef   :  { %3037 = vrcp.f32 %v1705_v0  ;;  %v1717_v10 = vand.u32 2147483648, %v1705_v0  ;;  %vm1711_vm12 = vweird.f32 %v1705_v0  ;;  %v1715_v22 = vand.u32 2147483647, %v1705_v0 }
0x16f0   :  { %3039 = vpow2.f32 %v2789_v48 }
0x16f1   :  { %v1718_v24 = vor.u32 1.1754944e-38, %v1717_v10  ;;  %vm1716_vm14 = vcmp.eq.f32.partialorder %v1715_v22, 8.507059e+37 }
0x16f5   :  { %v3038_v54 = vpop.eup %3037 }
0x16f6   :  { %v1707_v2 = vmul.f32 %v3038_v54, %v1705_v0  ;;  %vm1712_vm10 = vweird.f32 %v3038_v54  ;;  %v3040_v36 = vpop.eup %3039  ;;  %v4206_v0 = vpop.f32.mrf.mxu1 }
0x16f7   :  { %vm1713_vm13 = vmor %vm1711_vm12, %vm1712_vm10  ;;  %v1742_v35 = vadd.f32 1.0, %v3040_v36 }
0x16f8   :  { %v1708_v49 = vsub.f32 1.0, %v1707_v2 }
0x16f9   :  { %3041 = vrcp.f32 %v1742_v35  ;;  %v1754_v21 = vand.u32 2147483648, %v1742_v35  ;;  %vm1748_vm0 = vweird.f32 %v1742_v35  ;;  %v1752_v27 = vand.u32 2147483647, %v1742_v35 }
0x16fa   :  { %v1709_v8 = vmul.f32 %v3038_v54, %v1708_v49 }
0x16fb   :  { %v1755_v31 = vor.u32 1.1754944e-38, %v1754_v21  ;;  %vm1753_vm4 = vcmp.eq.f32.partialorder %v1752_v27, 8.507059e+37 }
0x16fc   :  { %v1710_v9 = vadd.f32 %v3038_v54, %v1709_v8 }
0x16fe   :  { %v1714_v6 = vsel %vm1713_vm13, %v3038_v54, %v1710_v9  ;;  %v1453_v54 = vadd.f32 %v4124_v52, %v4114_v4 }
0x16ff   :  { %v1719_v29 = vsel %vm1716_vm14, %v1718_v24, %v1714_v6  ;;  %v3042_v7 = vpop.eup %3041 }
0x1700   :  { %v1744_v61 = vmul.f32 %v3042_v7, %v1742_v35  ;;  %vm1749_vm15 = vweird.f32 %v3042_v7  ;;  %v1722_v41 = vmul.f32 %v1719_v29, %v4151_v56 }
0x1701   :  { %vm1750_vm3 = vmor %vm1748_vm0, %vm1749_vm15 }
0x1702   :  { %v1745_v13 = vsub.f32 1.0, %v1744_v61 }
0x1704   :  { %v1746_v15 = vmul.f32 %v3042_v7, %v1745_v13 }
0x1706   :  { %v1747_v18 = vadd.f32 %v3042_v7, %v1746_v15 }
0x1708   :  { %v1751_v28 = vsel %vm1750_vm3, %v3042_v7, %v1747_v18 }
0x1709   :  { %v1756_v34 = vsel %vm1753_vm4, %v1755_v31, %v1751_v28 }
0x170a   :  { %v1759_v45 = vmul.f32 %v1756_v34, %v4155_v26 }
0x1736   :  { %v1725_v30 = vpop.permute.xlu2 %1724 }
0x1737   :  { %v1727_v57 = vmul.f32 %v1725_v30, %v1719_v29 }
0x1739   :  { %1729 = vrot.lane.b32.xlu1 %v1727_v57, %s3462_s7 }
0x175e   :  { %v1762_v32 = vpop.permute.xlu0 %1761 }
0x175f   :  { %v1764_v38 = vmul.f32 %v1762_v32, %v1756_v34 }
0x1761   :  { %1766 = vrot.lane.b32.xlu2 %v1764_v38, %s3462_s7 }
0x17ab   :  { %v1730_v43 = vpop.permute.xlu1 %1729 }
0x17ac   :  { %v4182_v17 = vadd.f32 %v1730_v43, %v1722_v41 }
0x17ae   :  { %3043 = vtanh.f32 %v4182_v17 }
0x17b4   :  { %v3044_v44 = vpop.eup %3043 }
0x17b5   :  { %1735 = vrot.lane.b32.xlu0 %v3044_v44, %s3459_s16 }
0x17bb   :  { %v1767_v47 = vpop.permute.xlu2 %1766 }
0x17bc   :  { %v4187_v5 = vadd.f32 %v1767_v47, %v1759_v45 }
0x17be   :  { %3045 = vtanh.f32 %v4187_v5 }
0x17c4   :  { %v3046_v58 = vpop.eup %3045 }
0x17c5   :  { %1772 = vrot.lane.b32.xlu1 %v3046_v58, %s3459_s16 }
0x1827   :  { %v1736_v46 = vpop.permute.xlu0 %1735 }
0x1828   :  { %v1738_v56 = vmul.f32 %v1736_v46, %v1719_v29 }
0x182a   :  { %1777 = vrot.lane.b32.xlu2 %v1738_v56, %s3459_s16 }
0x1837   :  { %v1773_v62 = vpop.permute.xlu1 %1772 }
0x1838   :  { %v1775_v12 = vmul.f32 %v1773_v62, %v1756_v34 }
0x183a   :  { %1782 = vrot.lane.b32.xlu0 %v1775_v12, %s3462_s7 }
0x1884   :  { %v1778_v39 = vpop.permute.xlu2 %1777 }
0x1885   :  { %1780 = vst.msk [vmem:[#allocation2 + $0x8] sm:$0xff] %vm324_vm1, %v1778_v39 }
0x18ac   :  { %v1783_v26 = vpop.permute.xlu0 %1782 }
0x18ad   :  { %1785 = vst.msk [vmem:[#allocation2 + $0x30] sm:$0xff] %vm482_vm11, %v1783_v26  ;;  %v1786_v60 = vsel %vm324_vm1, %v1778_v39, %v1783_v26 }
0x18ae   :  { %v1787_v33 = vpack.c.bf16 %v1786_v60, %v1786_v60 }
0x18b0   :  { %2790 = vmatmul.msk.bf16.vlgmr.msra.gmra.mxu0 %vm367_vm2, %v1787_v33  ;;  %2791 = vmatmul.msk.bf16.vlgmr.msrb.gmra.mxu1 %vm367_vm2, %v1787_v33 }
0x18b1   :  { %2263 = vmatpush.bf16.msra.mxu0 %v4015_v55  ;;  %2276 = vmatpush.bf16.msrb.mxu1 %v4067_v14 }
0x18b5   :  { %2264 = vmatpush.bf16.msra.mxu0 %v4021_v53  ;;  %2277 = vmatpush.bf16.msrb.mxu1 %v4071_v19 }
0x18b9   :  { %2265 = vmatpush.bf16.msra.mxu0 %v4028_v23  ;;  %2278 = vmatpush.bf16.msrb.mxu1 %v4078_v25 }
0x18bd   :  { %2266 = vmatpush.bf16.msra.mxu0 %v4048_v51  ;;  %2279 = vmatpush.bf16.msrb.mxu1 %v4082_v37 }
0x192d   :  { %v1800_v2 = vpop.f32.mrf.mxu0  ;;  %v1813_v49 = vpop.f32.mrf.mxu1 }
0x192e   :  { %v1817_v8 = vadd.f32 %v1800_v2, %v1453_v54  ;;  %v1818_v9 = vadd.f32 %v1813_v49, %v4141_v16 }
0x1930   :  { %3047 = vtanh.f32 %v1817_v8  ;;  %v2793_v24 = vmul.f32 -1.442695, %v1818_v9  ;;  %v2792_v57 = vmul.f32 -1.442695, %v1817_v8 }
0x1931   :  { %3049 = vtanh.f32 %v1818_v9 }
0x1932   :  { %3051 = vpow2.f32 %v2793_v24 }
0x1935   :  { %v1802_v10 = vpop.f32.mrf.mxu0  ;;  %v1815_v48 = vpop.f32.mrf.mxu1 }
0x1936   :  { %v3048_v22 = vpop.eup %3047 }
0x1937   :  { %v3050_v6 = vpop.eup %3049  ;;  %1841 = vrot.lane.b32.xlu1 %v3048_v22, %s3459_s16 }
0x1938   :  { %1878 = vrot.lane.b32.xlu2 %v3050_v6, %s3459_s16  ;;  %v3052_v30 = vpop.eup %3051 }
0x1939   :  { %v1859_v29 = vadd.f32 1.0, %v3052_v30 }
0x193b   :  { %3053 = vrcp.f32 %v1859_v29  ;;  %v1871_v15 = vand.u32 2147483648, %v1859_v29  ;;  %vm1865_vm6 = vweird.f32 %v1859_v29  ;;  %v1869_v18 = vand.u32 2147483647, %v1859_v29 }
0x193c   :  { %3055 = vpow2.f32 %v2792_v57 }
0x193d   :  { %v1872_v27 = vor.u32 1.1754944e-38, %v1871_v15  ;;  %vm1870_vm8 = vcmp.eq.f32.partialorder %v1869_v18, 8.507059e+37 }
0x1941   :  { %v3054_v52 = vpop.eup %3053 }
0x1942   :  { %v1861_v36 = vmul.f32 %v3054_v52, %v1859_v29  ;;  %v3056_v35 = vpop.eup %3055  ;;  %vm1866_vm5 = vweird.f32 %v3054_v52 }
0x1943   :  { %v1822_v61 = vadd.f32 1.0, %v3056_v35  ;;  %vm1867_vm7 = vmor %vm1865_vm6, %vm1866_vm5 }
0x1944   :  { %v1862_v16 = vsub.f32 1.0, %v1861_v36 }
0x1945   :  { %3057 = vrcp.f32 %v1822_v61  ;;  %v1834_v45 = vand.u32 2147483648, %v1822_v61  ;;  %vm1828_vm10 = vweird.f32 %v1822_v61  ;;  %v1832_v47 = vand.u32 2147483647, %v1822_v61 }
0x1946   :  { %v1863_v7 = vmul.f32 %v3054_v52, %v1862_v16 }
0x1947   :  { %v1835_v46 = vor.u32 1.1754944e-38, %v1834_v45  ;;  %vm1833_vm13 = vcmp.eq.f32.partialorder %v1832_v47, 8.507059e+37 }
0x1948   :  { %v1864_v13 = vadd.f32 %v3054_v52, %v1863_v7 }
0x194a   :  { %v1868_v21 = vsel %vm1867_vm7, %v3054_v52, %v1864_v13 }
0x194b   :  { %v1873_v31 = vsel %vm1870_vm8, %v1872_v27, %v1868_v21  ;;  %v3058_v32 = vpop.eup %3057 }
0x194c   :  { %v1824_v38 = vmul.f32 %v3058_v32, %v1822_v61  ;;  %vm1829_vm9 = vweird.f32 %v3058_v32  ;;  %v1876_v39 = vmul.f32 %v1873_v31, %v4187_v5 }
0x194d   :  { %vm1830_vm12 = vmor %vm1828_vm10, %vm1829_vm9 }
0x194e   :  { %v1825_v41 = vsub.f32 1.0, %v1824_v38 }
0x1950   :  { %v1826_v43 = vmul.f32 %v3058_v32, %v1825_v41 }
0x1952   :  { %v1827_v44 = vadd.f32 %v3058_v32, %v1826_v43 }
0x1954   :  { %v1831_v58 = vsel %vm1830_vm12, %v3058_v32, %v1827_v44 }
0x1955   :  { %v1836_v62 = vsel %vm1833_vm13, %v1835_v46, %v1831_v58 }
0x1956   :  { %v1839_v54 = vmul.f32 %v1836_v62, %v4182_v17 }
0x1992   :  { %v1879_v28 = vpop.permute.xlu2 %1878 }
0x1993   :  { %v1881_v34 = vmul.f32 %v1879_v28, %v1873_v31 }
0x1995   :  { %1883 = vrot.lane.b32.xlu1 %v1881_v34, %s3462_s7 }
0x19a9   :  { %v1842_v56 = vpop.permute.xlu1 %1841 }
0x19aa   :  { %v1844_v12 = vmul.f32 %v1842_v56, %v1836_v62 }
0x19ac   :  { %1846 = vrot.lane.b32.xlu0 %v1844_v12, %s3462_s7 }
0x1a07   :  { %v1884_v26 = vpop.permute.xlu1 %1883 }
0x1a08   :  { %v4216_v60 = vadd.f32 %v1884_v26, %v1876_v39 }
0x1a0a   :  { %3059 = vtanh.f32 %v4216_v60 }
0x1a10   :  { %v3060_v33 = vpop.eup %3059 }
0x1a11   :  { %1889 = vrot.lane.b32.xlu0 %v3060_v33, %s3459_s16 }
0x1a1e   :  { %v1847_v2 = vpop.permute.xlu0 %1846 }
0x1a1f   :  { %v4221_v49 = vadd.f32 %v1847_v2, %v1839_v54 }
0x1a21   :  { %3061 = vtanh.f32 %v4221_v49 }
0x1a27   :  { %v3062_v8 = vpop.eup %3061 }
0x1a28   :  { %1852 = vrot.lane.b32.xlu2 %v3062_v8, %s3459_s16 }
0x1a82   :  { %v1853_v9 = vpop.permute.xlu2 %1852 }
0x1a83   :  { %v1855_v5 = vmul.f32 %v1853_v9, %v1836_v62  ;;  %v1890_v10 = vpop.permute.xlu0 %1889 }
0x1a84   :  { %v1892_v48 = vmul.f32 %v1890_v10, %v1873_v31 }
0x1a85   :  { %1894 = vrot.lane.b32.xlu1 %v1855_v5, %s3459_s16 }
0x1a86   :  { %1899 = vrot.lane.b32.xlu2 %v1892_v48, %s3462_s7 }
0x1ae0   :  { %v1900_v22 = vpop.permute.xlu2 %1899 }
0x1ae1   :  { %1902 = vst.msk [vmem:[#allocation2 + $0x28] sm:$0xff] %vm482_vm11, %v1900_v22 }
0x1af7   :  { %v1895_v17 = vpop.permute.xlu1 %1894 }
0x1af8   :  { %1897 = vst.msk [vmem:[#allocation2 + $0x10] sm:$0xff] %vm324_vm1, %v1895_v17  ;;  %v1903_v6 = vsel %vm324_vm1, %v1895_v17, %v1900_v22 }
0x1af9   :  { %v1904_v24 = vpack.c.bf16 %v1903_v6, %v1903_v6 }
0x1afb   :  { %2794 = vmatmul.msk.bf16.vlgmr.msra.gmra.mxu2 %vm367_vm2, %v1904_v24  ;;  %2795 = vmatmul.msk.bf16.vlgmr.msrb.gmra.mxu3 %vm367_vm2, %v1904_v24 }
0x1afc   :  { %2393 = vmatpush.bf16.msrb.mxu3 %v4067_v14  ;;  %2380 = vmatpush.bf16.msra.mxu2 %v4015_v55 }
0x1b00   :  { %2394 = vmatpush.bf16.msrb.mxu3 %v4071_v19  ;;  %2381 = vmatpush.bf16.msra.mxu2 %v4021_v53 }
0x1b04   :  { %2395 = vmatpush.bf16.msrb.mxu3 %v4078_v25  ;;  %2382 = vmatpush.bf16.msra.mxu2 %v4028_v23 }
0x1b08   :  { %2396 = vmatpush.bf16.msrb.mxu3 %v4082_v37  ;;  %2383 = vmatpush.bf16.msra.mxu2 %v4048_v51 }
0x1b7e   :  { %v1917_v30 = vpop.f32.mrf.mxu2  ;;  %v1930_v29 = vpop.f32.mrf.mxu3 }
0x1b7f   :  { %v1934_v52 = vadd.f32 %v1917_v30, %v4129_v40  ;;  %v1935_v14 = vadd.f32 %v1930_v29, %v4136_v63 }
0x1b81   :  { %3063 = vtanh.f32 %v1934_v52  ;;  %v2796_v23 = vmul.f32 -1.442695, %v1934_v52  ;;  %v2797_v25 = vmul.f32 -1.442695, %v1935_v14 }
0x1b82   :  { %3065 = vtanh.f32 %v1935_v14 }
0x1b83   :  { %3067 = vpow2.f32 %v2796_v23 }
0x1b84   :  { %3069 = vpow2.f32 %v2797_v25 }
0x1b86   :  { %v1919_v55 = vpop.f32.mrf.mxu2  ;;  %v1932_v19 = vpop.f32.mrf.mxu3 }
0x1b87   :  { %v3064_v57 = vpop.eup %3063 }
0x1b88   :  { %v3066_v53 = vpop.eup %3065  ;;  %1958 = vrot.lane.b32.xlu0 %v3064_v57, %s3459_s16 }
0x1b89   :  { %1995 = vrot.lane.b32.xlu1 %v3066_v53, %s3459_s16  ;;  %v3068_v51 = vpop.eup %3067 }
0x1b8a   :  { %v3070_v37 = vpop.eup %3069  ;;  %v1939_v36 = vadd.f32 1.0, %v3068_v51 }
0x1b8b   :  { %v1976_v40 = vadd.f32 1.0, %v3070_v37 }
0x1b8c   :  { %3071 = vrcp.f32 %v1939_v36  ;;  %v1951_v28 = vand.u32 2147483648, %v1939_v36  ;;  %vm1945_vm0 = vweird.f32 %v1939_v36  ;;  %v1949_v32 = vand.u32 2147483647, %v1939_v36 }
0x1b8d   :  { %3073 = vrcp.f32 %v1976_v40  ;;  %v1988_v31 = vand.u32 2147483648, %v1976_v40  ;;  %vm1982_vm3 = vweird.f32 %v1976_v40  ;;  %v1986_v34 = vand.u32 2147483647, %v1976_v40 }
0x1b8e   :  { %v1952_v43 = vor.u32 1.1754944e-38, %v1951_v28  ;;  %vm1950_vm6 = vcmp.eq.f32.partialorder %v1949_v32, 8.507059e+37 }
0x1b8f   :  { %v1989_v44 = vor.u32 1.1754944e-38, %v1988_v31  ;;  %vm1987_vm7 = vcmp.eq.f32.partialorder %v1986_v34, 8.507059e+37 }
0x1b92   :  { %v3072_v63 = vpop.eup %3071 }
0x1b93   :  { %v3074_v16 = vpop.eup %3073  ;;  %v1941_v35 = vmul.f32 %v3072_v63, %v1939_v36  ;;  %vm1946_vm14 = vweird.f32 %v3072_v63 }
0x1b94   :  { %v1978_v7 = vmul.f32 %v3074_v16, %v1976_v40  ;;  %vm1983_vm15 = vweird.f32 %v3074_v16  ;;  %vm1947_vm4 = vmor %vm1945_vm0, %vm1946_vm14 }
0x1b95   :  { %v1942_v61 = vsub.f32 1.0, %v1941_v35  ;;  %vm1984_vm5 = vmor %vm1982_vm3, %vm1983_vm15 }
0x1b96   :  { %v1979_v13 = vsub.f32 1.0, %v1978_v7 }
0x1b97   :  { %v1943_v15 = vmul.f32 %v3072_v63, %v1942_v61 }
0x1b98   :  { %v1980_v18 = vmul.f32 %v3074_v16, %v1979_v13 }
0x1b99   :  { %v1944_v21 = vadd.f32 %v3072_v63, %v1943_v15 }
0x1b9a   :  { %v1981_v27 = vadd.f32 %v3074_v16, %v1980_v18 }
0x1b9b   :  { %v1948_v38 = vsel %vm1947_vm4, %v3072_v63, %v1944_v21 }
0x1b9c   :  { %v1985_v41 = vsel %vm1984_vm5, %v3074_v16, %v1981_v27  ;;  %v1953_v47 = vsel %vm1950_vm6, %v1952_v43, %v1948_v38 }
0x1b9d   :  { %v1990_v46 = vsel %vm1987_vm7, %v1989_v44, %v1985_v41  ;;  %v1956_v12 = vmul.f32 %v1953_v47, %v4221_v49 }
0x1b9e   :  { %v1993_v54 = vmul.f32 %v1990_v46, %v4216_v60 }
0x1bfa   :  { %v1959_v45 = vpop.permute.xlu0 %1958 }
0x1bfb   :  { %v1996_v58 = vpop.permute.xlu1 %1995  ;;  %v1961_v56 = vmul.f32 %v1959_v45, %v1953_v47 }
0x1bfc   :  { %v1998_v62 = vmul.f32 %v1996_v58, %v1990_v46 }
0x1bfd   :  { %1963 = vrot.lane.b32.xlu2 %v1961_v56, %s3462_s7 }
0x1bfe   :  { %2000 = vrot.lane.b32.xlu0 %v1998_v62, %s3462_s7 }
0x1c57   :  { %v1964_v39 = vpop.permute.xlu2 %1963 }
0x1c58   :  { %v4247_v26 = vadd.f32 %v1964_v39, %v1956_v12 }
0x1c5a   :  { %3075 = vtanh.f32 %v4247_v26 }
0x1c60   :  { %v3076_v33 = vpop.eup %3075 }
0x1c61   :  { %1969 = vrot.lane.b32.xlu1 %v3076_v33, %s3459_s16 }
0x1c70   :  { %v2001_v2 = vpop.permute.xlu0 %2000 }
0x1c71   :  { %v4252_v8 = vadd.f32 %v2001_v2, %v1993_v54 }
0x1c73   :  { %3077 = vtanh.f32 %v4252_v8 }
0x1c79   :  { %v3078_v9 = vpop.eup %3077 }
0x1c7a   :  { %2006 = vrot.lane.b32.xlu2 %v3078_v9, %s3459_s16 }
0x1cd3   :  { %v1970_v5 = vpop.permute.xlu1 %1969 }
0x1cd4   :  { %v2007_v49 = vpop.permute.xlu2 %2006  ;;  %v1972_v10 = vmul.f32 %v1970_v5, %v1953_v47 }
0x1cd5   :  { %v2009_v48 = vmul.f32 %v2007_v49, %v1990_v46 }
0x1cd6   :  { %2011 = vrot.lane.b32.xlu0 %v1972_v10, %s3459_s16 }
0x1cd7   :  { %2016 = vrot.lane.b32.xlu1 %v2009_v48, %s3462_s7 }
0x1d48   :  { %v2012_v22 = vpop.permute.xlu0 %2011 }
0x1d49   :  { %2014 = vst.msk [vmem:[#allocation2 + $0x18] sm:$0xff] %vm324_vm1, %v2012_v22  ;;  %v2017_v60 = vpop.permute.xlu1 %2016 }
0x1d4a   :  { %2019 = vst.msk [vmem:[#allocation2 + $0x20] sm:$0xff] %vm482_vm11, %v2017_v60  ;;  %v2020_v17 = vsel %vm324_vm1, %v2012_v22, %v2017_v60 }
0x1d4b   :  { %v2021_v6 = vpack.c.bf16 %v2020_v17, %v2020_v17 }
0x1d4d   :  { %2798 = vmatmul.msk.bf16.vlgmr.msrb.gmra.mxu0 %vm367_vm2, %v2021_v6  ;;  %2799 = vmatmul.msk.bf16.vlgmr.msra.gmra.mxu1 %vm367_vm2, %v2021_v6 }
0x1dca   :  { %v2034_v24 = vpop.f32.mrf.mxu0  ;;  %v2047_v30 = vpop.f32.mrf.mxu1 }
0x1dcb   :  { %v2051_v29 = vadd.f32 %v2034_v24, %v4134_v3  ;;  %v2052_v52 = vadd.f32 %v2047_v30, %v4131_v42 }
0x1dcd   :  { %3079 = vtanh.f32 %v2051_v29  ;;  %v2800_v53 = vmul.f32 -1.442695, %v2051_v29  ;;  %v2801_v37 = vmul.f32 -1.442695, %v2052_v52 }
0x1dce   :  { %3081 = vtanh.f32 %v2052_v52 }
0x1dcf   :  { %3083 = vpow2.f32 %v2800_v53 }
0x1dd2   :  { %v2036_v14 = vpop.f32.mrf.mxu0  ;;  %v2049_v55 = vpop.f32.mrf.mxu1 }
0x1dd3   :  { %v3080_v19 = vpop.eup %3079 }
0x1dd4   :  { %v3082_v57 = vpop.eup %3081  ;;  %2075 = vrot.lane.b32.xlu2 %v3080_v19, %s3459_s16 }
0x1dd5   :  { %2112 = vrot.lane.b32.xlu0 %v3082_v57, %s3459_s16  ;;  %v3084_v23 = vpop.eup %3083 }
0x1dd6   :  { %v2056_v25 = vadd.f32 1.0, %v3084_v23 }
0x1dd8   :  { %3085 = vrcp.f32 %v2056_v25  ;;  %v2068_v35 = vand.u32 2147483648, %v2056_v25  ;;  %vm2062_vm9 = vweird.f32 %v2056_v25  ;;  %v2066_v7 = vand.u32 2147483647, %v2056_v25 }
0x1dd9   :  { %3087 = vpow2.f32 %v2801_v37 }
0x1dda   :  { %v2069_v13 = vor.u32 1.1754944e-38, %v2068_v35  ;;  %vm2067_vm12 = vcmp.eq.f32.partialorder %v2066_v7, 8.507059e+37 }
0x1dde   :  { %v3086_v51 = vpop.eup %3085 }
0x1ddf   :  { %v2058_v3 = vmul.f32 %v3086_v51, %v2056_v25  ;;  %v3088_v40 = vpop.eup %3087  ;;  %vm2063_vm8 = vweird.f32 %v3086_v51 }
0x1de0   :  { %v2093_v63 = vadd.f32 1.0, %v3088_v40  ;;  %vm2064_vm10 = vmor %vm2062_vm9, %vm2063_vm8 }
0x1de1   :  { %v2059_v42 = vsub.f32 1.0, %v2058_v3 }
0x1de2   :  { %3089 = vrcp.f32 %v2093_v63  ;;  %v2105_v38 = vand.u32 2147483648, %v2093_v63  ;;  %vm2099_vm14 = vweird.f32 %v2093_v63  ;;  %v2103_v41 = vand.u32 2147483647, %v2093_v63 }
0x1de3   :  { %v2060_v36 = vmul.f32 %v3086_v51, %v2059_v42 }
0x1de4   :  { %v2106_v44 = vor.u32 1.1754944e-38, %v2105_v38  ;;  %vm2104_vm0 = vcmp.eq.f32.partialorder %v2103_v41, 8.507059e+37 }
0x1de5   :  { %v2061_v16 = vadd.f32 %v3086_v51, %v2060_v36 }
0x1de7   :  { %v2065_v61 = vsel %vm2064_vm10, %v3086_v51, %v2061_v16 }
0x1de8   :  { %v2070_v18 = vsel %vm2067_vm12, %v2069_v13, %v2065_v61  ;;  %v3090_v27 = vpop.eup %3089 }
0x1de9   :  { %v2095_v28 = vmul.f32 %v3090_v27, %v2093_v63  ;;  %vm2100_vm13 = vweird.f32 %v3090_v27  ;;  %v2073_v46 = vmul.f32 %v2070_v18, %v4247_v26 }
0x1dea   :  { %vm2101_vm15 = vmor %vm2099_vm14, %vm2100_vm13 }
0x1deb   :  { %v2096_v31 = vsub.f32 1.0, %v2095_v28 }
0x1ded   :  { %v2097_v32 = vmul.f32 %v3090_v27, %v2096_v31 }
0x1def   :  { %v2098_v34 = vadd.f32 %v3090_v27, %v2097_v32 }
0x1df1   :  { %v2102_v43 = vsel %vm2101_vm15, %v3090_v27, %v2098_v34 }
0x1df2   :  { %v2107_v47 = vsel %vm2104_vm0, %v2106_v44, %v2102_v43 }
0x1df3   :  { %v2110_v62 = vmul.f32 %v2107_v47, %v4252_v8 }
0x1e2e   :  { %v2076_v15 = vpop.permute.xlu2 %2075 }
0x1e2f   :  { %v2078_v21 = vmul.f32 %v2076_v15, %v2070_v18 }
0x1e31   :  { %2080 = vrot.lane.b32.xlu1 %v2078_v21, %s3462_s7 }
0x1e47   :  { %v2113_v45 = vpop.permute.xlu0 %2112 }
0x1e48   :  { %v2115_v58 = vmul.f32 %v2113_v45, %v2107_v47 }
0x1e4a   :  { %2117 = vrot.lane.b32.xlu2 %v2115_v58, %s3462_s7 }
0x1ea3   :  { %v2081_v56 = vpop.permute.xlu1 %2080 }
0x1ea4   :  { %v4271_v12 = vadd.f32 %v2081_v56, %v2073_v46  ;;  %v2118_v39 = vpop.permute.xlu2 %2117 }
0x1ea5   :  { %v4273_v33 = vadd.f32 %v2118_v39, %v2110_v62 }
0x1ea6   :  { %3091 = vtanh.f32 %v4271_v12 }
0x1ea7   :  { %3093 = vtanh.f32 %v4273_v33 }
0x1eac   :  { %v3092_v54 = vpop.eup %3091 }
0x1ead   :  { %v3094_v2 = vpop.eup %3093  ;;  %2086 = vrot.lane.b32.xlu0 %v3092_v54, %s3459_s16 }
0x1eae   :  { %2123 = vrot.lane.b32.xlu1 %v3094_v2, %s3459_s16 }
0x1f1f   :  { %v2087_v9 = vpop.permute.xlu0 %2086 }
0x1f20   :  { %v2089_v26 = vmul.f32 %v2087_v9, %v2070_v18  ;;  %v2124_v5 = vpop.permute.xlu1 %2123 }
0x1f21   :  { %v2126_v49 = vmul.f32 %v2124_v5, %v2107_v47 }
0x1f22   :  { %2128 = vrot.lane.b32.xlu2 %v2089_v26, %s3459_s16 }
0x1f23   :  { %2133 = vrot.lane.b32.xlu0 %v2126_v49, %s3462_s7 }
0x1f7c   :  { %v2129_v8 = vpop.permute.xlu2 %2128 }
0x1f7d   :  { %2131 = vst.msk [vmem:[#allocation2 + $0x20] sm:$0xff] %vm324_vm1, %v2129_v8 }
0x1f95   :  { %v2134_v10 = vpop.permute.xlu0 %2133 }
0x1f96   :  { %2136 = vst.msk [vmem:[#allocation2 + $0x18] sm:$0xff] %vm482_vm11, %v2134_v10  ;;  %v2137_v48 = vsel %vm324_vm1, %v2129_v8, %v2134_v10 }
0x1f97   :  { %v2138_v22 = vpack.c.bf16 %v2137_v48, %v2137_v48 }
0x1f99   :  { %2802 = vmatmul.msk.bf16.vlgmr.msrb.gmra.mxu2 %vm367_vm2, %v2138_v22  ;;  %2803 = vmatmul.msk.bf16.vlgmr.msra.gmra.mxu3 %vm367_vm2, %v2138_v22 }
0x201c   :  { %v2151_v60 = vpop.f32.mrf.mxu2  ;;  %v2164_v17 = vpop.f32.mrf.mxu3 }
0x201d   :  { %v2168_v6 = vadd.f32 %v2151_v60, %v4139_v1  ;;  %v2169_v24 = vadd.f32 %v2164_v17, %v4126_v59 }
0x201f   :  { %3095 = vtanh.f32 %v2168_v6  ;;  %v2805_v55 = vmul.f32 -1.442695, %v2169_v24  ;;  %v2804_v23 = vmul.f32 -1.442695, %v2168_v6 }
0x2020   :  { %3097 = vtanh.f32 %v2169_v24 }
0x2021   :  { %3099 = vpow2.f32 %v2805_v55 }
0x2024   :  { %v2153_v30 = vpop.f32.mrf.mxu2  ;;  %v2166_v29 = vpop.f32.mrf.mxu3 }
0x2025   :  { %v3096_v52 = vpop.eup %3095 }
0x2026   :  { %v3098_v14 = vpop.eup %3097  ;;  %2192 = vrot.lane.b32.xlu1 %v3096_v52, %s3459_s16 }
0x2027   :  { %2229 = vrot.lane.b32.xlu2 %v3098_v14, %s3459_s16  ;;  %v3100_v19 = vpop.eup %3099 }
0x2028   :  { %v2210_v57 = vadd.f32 1.0, %v3100_v19 }
0x202a   :  { %3101 = vrcp.f32 %v2210_v57  ;;  %v2222_v42 = vand.u32 2147483648, %v2210_v57  ;;  %vm2216_vm4 = vweird.f32 %v2210_v57  ;;  %v2220_v36 = vand.u32 2147483647, %v2210_v57 }
0x202b   :  { %3103 = vpow2.f32 %v2804_v23 }
0x202c   :  { %v2223_v63 = vor.u32 1.1754944e-38, %v2222_v42  ;;  %vm2221_vm6 = vcmp.eq.f32.partialorder %v2220_v36, 8.507059e+37 }
0x2030   :  { %v3102_v53 = vpop.eup %3101 }
0x2031   :  { %v2212_v1 = vmul.f32 %v3102_v53, %v2210_v57  ;;  %v3104_v25 = vpop.eup %3103  ;;  %vm2217_vm3 = vweird.f32 %v3102_v53 }
0x2032   :  { %v2173_v37 = vadd.f32 1.0, %v3104_v25  ;;  %vm2218_vm5 = vmor %vm2216_vm4, %vm2217_vm3 }
0x2033   :  { %v2213_v59 = vsub.f32 1.0, %v2212_v1 }
0x2034   :  { %3105 = vrcp.f32 %v2173_v37  ;;  %v2185_v27 = vand.u32 2147483648, %v2173_v37  ;;  %vm2179_vm8 = vweird.f32 %v2173_v37  ;;  %v2183_v28 = vand.u32 2147483647, %v2173_v37 }
0x2035   :  { %v2214_v51 = vmul.f32 %v3102_v53, %v2213_v59 }
0x2036   :  { %v2186_v32 = vor.u32 1.1754944e-38, %v2185_v27  ;;  %vm2184_vm10 = vcmp.eq.f32.partialorder %v2183_v28, 8.507059e+37 }
0x2037   :  { %v2215_v3 = vadd.f32 %v3102_v53, %v2214_v51 }
0x2039   :  { %v2219_v40 = vsel %vm2218_vm5, %v3102_v53, %v2215_v3 }
0x203a   :  { %v2224_v35 = vsel %vm2221_vm6, %v2223_v63, %v2219_v40  ;;  %v3106_v7 = vpop.eup %3105 }
0x203b   :  { %v2175_v13 = vmul.f32 %v3106_v7, %v2173_v37  ;;  %vm2180_vm7 = vweird.f32 %v3106_v7  ;;  %v2227_v43 = vmul.f32 %v2224_v35, %v4273_v33 }
0x203c   :  { %vm2181_vm9 = vmor %vm2179_vm8, %vm2180_vm7 }
0x203d   :  { %v2176_v15 = vsub.f32 1.0, %v2175_v13 }
0x203f   :  { %v2177_v18 = vmul.f32 %v3106_v7, %v2176_v15 }
0x2041   :  { %v2178_v21 = vadd.f32 %v3106_v7, %v2177_v18 }
0x2043   :  { %v2182_v31 = vsel %vm2181_vm9, %v3106_v7, %v2178_v21 }
0x2044   :  { %v2187_v38 = vsel %vm2184_vm10, %v2186_v32, %v2182_v31 }
0x2045   :  { %v2190_v58 = vmul.f32 %v2187_v38, %v4271_v12 }
0x2081   :  { %v2230_v16 = vpop.permute.xlu2 %2229 }
0x2082   :  { %v2232_v61 = vmul.f32 %v2230_v16, %v2224_v35 }
0x2084   :  { %2234 = vrot.lane.b32.xlu1 %v2232_v61, %s3462_s7 }
0x2098   :  { %v2193_v34 = vpop.permute.xlu1 %2192 }
0x2099   :  { %v2195_v41 = vmul.f32 %v2193_v34, %v2187_v38 }
0x209b   :  { %2197 = vrot.lane.b32.xlu0 %v2195_v41, %s3462_s7 }
0x20f6   :  { %v2235_v44 = vpop.permute.xlu1 %2234 }
0x20f7   :  { %v4293_v45 = vadd.f32 %v2235_v44, %v2227_v43 }
0x20f9   :  { %3107 = vtanh.f32 %v4293_v45 }
0x20ff   :  { %v3108_v47 = vpop.eup %3107 }
0x2100   :  { %2240 = vrot.lane.b32.xlu0 %v3108_v47, %s3459_s16 }
0x210d   :  { %v2198_v46 = vpop.permute.xlu0 %2197 }
0x210e   :  { %v4298_v56 = vadd.f32 %v2198_v46, %v2190_v58 }
0x2110   :  { %3109 = vtanh.f32 %v4298_v56 }
0x2116   :  { %v3110_v62 = vpop.eup %3109 }
0x2117   :  { %2203 = vrot.lane.b32.xlu2 %v3110_v62, %s3459_s16 }
0x2171   :  { %v2204_v39 = vpop.permute.xlu2 %2203 }
0x2172   :  { %v2241_v33 = vpop.permute.xlu0 %2240  ;;  %v2206_v54 = vmul.f32 %v2204_v39, %v2187_v38 }
0x2173   :  { %v2243_v2 = vmul.f32 %v2241_v33, %v2224_v35  ;;  %v1465_v33 = vadd.f32 %v4206_v0, %v4114_v4 }
0x2174   :  { %2245 = vrot.lane.b32.xlu1 %v2206_v54, %s3459_s16 }
0x2175   :  { %2250 = vrot.lane.b32.xlu2 %v2243_v2, %s3462_s7 }
0x21cf   :  { %v2251_v9 = vpop.permute.xlu2 %2250 }
0x21d0   :  { %2253 = vst.msk [vmem:[#allocation2 + $0x10] sm:$0xff] %vm482_vm11, %v2251_v9 }
0x21e6   :  { %v2246_v12 = vpop.permute.xlu1 %2245 }
0x21e7   :  { %2248 = vst.msk [vmem:[#allocation2 + $0x28] sm:$0xff] %vm324_vm1, %v2246_v12  ;;  %v2254_v26 = vsel %vm324_vm1, %v2246_v12, %v2251_v9 }
0x21e8   :  { %v2255_v5 = vpack.c.bf16 %v2254_v26, %v2254_v26 }
0x21ea   :  { %2806 = vmatmul.msk.bf16.vlgmr.msra.gmra.mxu0 %vm367_vm2, %v2255_v5  ;;  %2807 = vmatmul.msk.bf16.vlgmr.msrb.gmra.mxu1 %vm367_vm2, %v2255_v5 }
0x2267   :  { %v2268_v49 = vpop.f32.mrf.mxu0  ;;  %v2281_v8 = vpop.f32.mrf.mxu1 }
0x2268   :  { %v2285_v10 = vadd.f32 %v2268_v49, %v4144_v20  ;;  %v2286_v48 = vadd.f32 %v2281_v8, %v4122_v50 }
0x226a   :  { %3111 = vtanh.f32 %v2285_v10  ;;  %v2808_v24 = vmul.f32 -1.442695, %v2285_v10  ;;  %v2809_v30 = vmul.f32 -1.442695, %v2286_v48 }
0x226b   :  { %3113 = vtanh.f32 %v2286_v48 }
0x226c   :  { %3115 = vpow2.f32 %v2808_v24 }
0x226d   :  { %3117 = vpow2.f32 %v2809_v30 }
0x226f   :  { %v2270_v22 = vpop.f32.mrf.mxu0  ;;  %v2283_v60 = vpop.f32.mrf.mxu1 }
0x2270   :  { %v3112_v17 = vpop.eup %3111 }
0x2271   :  { %v3114_v6 = vpop.eup %3113  ;;  %2309 = vrot.lane.b32.xlu0 %v3112_v17, %s3459_s16 }
0x2272   :  { %2346 = vrot.lane.b32.xlu1 %v3114_v6, %s3459_s16  ;;  %v3116_v29 = vpop.eup %3115 }
0x2273   :  { %v3118_v52 = vpop.eup %3117  ;;  %v2290_v14 = vadd.f32 1.0, %v3116_v29 }
0x2274   :  { %v2327_v20 = vadd.f32 1.0, %v3118_v52 }
0x2275   :  { %3119 = vrcp.f32 %v2290_v14  ;;  %v2302_v37 = vand.u32 2147483648, %v2290_v14  ;;  %vm2296_vm14 = vweird.f32 %v2290_v14  ;;  %v2300_v42 = vand.u32 2147483647, %v2290_v14 }
0x2276   :  { %3121 = vrcp.f32 %v2327_v20  ;;  %v2339_v3 = vand.u32 2147483648, %v2327_v20  ;;  %vm2333_vm15 = vweird.f32 %v2327_v20  ;;  %v2337_v36 = vand.u32 2147483647, %v2327_v20 }
0x2277   :  { %v2303_v16 = vor.u32 1.1754944e-38, %v2302_v37  ;;  %vm2301_vm4 = vcmp.eq.f32.partialorder %v2300_v42, 8.507059e+37 }
0x2278   :  { %v2340_v35 = vor.u32 1.1754944e-38, %v2339_v3  ;;  %vm2338_vm5 = vcmp.eq.f32.partialorder %v2337_v36, 8.507059e+37 }
0x227b   :  { %v3120_v50 = vpop.eup %3119 }
0x227c   :  { %v3122_v55 = vpop.eup %3121  ;;  %v2292_v19 = vmul.f32 %v3120_v50, %v2290_v14  ;;  %vm2297_vm12 = vweird.f32 %v3120_v50 }
0x227d   :  { %v2329_v57 = vmul.f32 %v3122_v55, %v2327_v20  ;;  %vm2334_vm13 = vweird.f32 %v3122_v55  ;;  %vm2298_vm0 = vmor %vm2296_vm14, %vm2297_vm12 }
0x227e   :  { %v2293_v53 = vsub.f32 1.0, %v2292_v19  ;;  %vm2335_vm3 = vmor %vm2333_vm15, %vm2334_vm13 }
0x227f   :  { %v2330_v23 = vsub.f32 1.0, %v2329_v57 }
0x2280   :  { %v2294_v1 = vmul.f32 %v3120_v50, %v2293_v53 }
0x2281   :  { %v2331_v59 = vmul.f32 %v3122_v55, %v2330_v23 }
0x2282   :  { %v2295_v25 = vadd.f32 %v3120_v50, %v2294_v1 }
0x2283   :  { %v2332_v51 = vadd.f32 %v3122_v55, %v2331_v59 }
0x2284   :  { %v2299_v40 = vsel %vm2298_vm0, %v3120_v50, %v2295_v25 }
0x2285   :  { %v2336_v63 = vsel %vm2335_vm3, %v3122_v55, %v2332_v51  ;;  %v2304_v61 = vsel %vm2301_vm4, %v2303_v16, %v2299_v40 }
0x2286   :  { %v2341_v15 = vsel %vm2338_vm5, %v2340_v35, %v2336_v63  ;;  %v2307_v27 = vmul.f32 %v2304_v61, %v4298_v56 }
0x2287   :  { %v2344_v34 = vmul.f32 %v2341_v15, %v4293_v45 }
0x22e3   :  { %v2310_v7 = vpop.permute.xlu0 %2309 }
0x22e4   :  { %v2347_v13 = vpop.permute.xlu1 %2346  ;;  %v2312_v18 = vmul.f32 %v2310_v7, %v2304_v61 }
0x22e5   :  { %v2349_v21 = vmul.f32 %v2347_v13, %v2341_v15 }
0x22e6   :  { %2314 = vrot.lane.b32.xlu2 %v2312_v18, %s3462_s7 }
0x22e7   :  { %2351 = vrot.lane.b32.xlu0 %v2349_v21, %s3462_s7 }
0x2340   :  { %v2315_v28 = vpop.permute.xlu2 %2314 }
0x2341   :  { %v4316_v31 = vadd.f32 %v2315_v28, %v2307_v27 }
0x2343   :  { %3123 = vtanh.f32 %v4316_v31 }
0x2349   :  { %v3124_v32 = vpop.eup %3123 }
0x234a   :  { %2320 = vrot.lane.b32.xlu1 %v3124_v32, %s3459_s16  ;;  %v2863_v32 = vld [vmem:[#allocation18 + $0x18] sm:$0xff] }
0x234b   :  { %2552 = vmatpush.bf16.msrb.mxu0 %v2863_v32 }
0x2359   :  { %v2352_v38 = vpop.permute.xlu0 %2351 }
0x235a   :  { %v4321_v41 = vadd.f32 %v2352_v38, %v2344_v34  ;;  %v2862_v34 = vld [vmem:[#allocation18 + $0x10] sm:$0xff]  ;;  %v2861_v38 = vld [vmem:[#allocation18 + $0x8] sm:$0xff] }
0x235b   :  { %2553 = vmatpush.bf16.msrb.mxu0 %v2862_v34 }
0x235c   :  { %3125 = vtanh.f32 %v4321_v41 }
0x235f   :  { %2554 = vmatpush.bf16.msrb.mxu0 %v2861_v38 }
0x2362   :  { %v3126_v43 = vpop.eup %3125 }
0x2363   :  { %2357 = vrot.lane.b32.xlu2 %v3126_v43, %s3459_s16 }
0x23bc   :  { %v2321_v44 = vpop.permute.xlu1 %2320 }
0x23bd   :  { %v2358_v47 = vpop.permute.xlu2 %2357  ;;  %v2323_v58 = vmul.f32 %v2321_v44, %v2304_v61 }
0x23be   :  { %v2360_v46 = vmul.f32 %v2358_v47, %v2341_v15 }
0x23bf   :  { %2362 = vrot.lane.b32.xlu0 %v2323_v58, %s3459_s16 }
0x23c0   :  { %2367 = vrot.lane.b32.xlu1 %v2360_v46, %s3462_s7 }
0x2431   :  { %v2363_v56 = vpop.permute.xlu0 %2362 }
0x2432   :  { %2365 = vst.msk [vmem:[#allocation2 + $0x30] sm:$0xff] %vm324_vm1, %v2363_v56  ;;  %v2368_v45 = vpop.permute.xlu1 %2367 }
0x2433   :  { %2370 = vst.msk [vmem:[#allocation2 + $0x8] sm:$0xff] %vm482_vm11, %v2368_v45  ;;  %v2371_v62 = vsel %vm324_vm1, %v2363_v56, %v2368_v45  ;;  %v2490_v45 = vld [vmem:[#allocation2 + $0x10] sm:$0xff] }
0x2434   :  { %v2372_v39 = vpack.c.bf16 %v2371_v62, %v2371_v62  ;;  %v2491_v62 = vld [vmem:[#allocation2 + $0x18] sm:$0xff] }
0x2436   :  { %2810 = vmatmul.msk.bf16.vlgmr.msra.gmra.mxu2 %vm367_vm2, %v2372_v39  ;;  %2811 = vmatmul.msk.bf16.vlgmr.msrb.gmra.mxu3 %vm367_vm2, %v2372_v39  ;;  %v2497_v39 = vpack.c.bf16 %v2491_v62, %v2490_v45 }
0x243a   :  { %v2489_v46 = vld [vmem:[#allocation2 + $0x8] sm:$0xff] }
0x24b9   :  { %v2385_v54 = vpop.f32.mrf.mxu2  ;;  %v2398_v2 = vpop.f32.mrf.mxu3 }
0x24ba   :  { %v2402_v9 = vadd.f32 %v2385_v54, %v1465_v33  ;;  %v2403_v12 = vadd.f32 %v2398_v2, %v4117_v11  ;;  %v2493_v33 = vld [vmem:[#allocation2 + $0x28] sm:$0xff]  ;;  %v2492_v54 = vld [vmem:[#allocation2 + $0x20] sm:$0xff] }
0x24bb   :  { %v2498_v2 = vpack.c.bf16 %v2493_v33, %v2492_v54 }
0x24bc   :  { %3127 = vtanh.f32 %v2402_v9  ;;  %v2813_v10 = vmul.f32 -1.442695, %v2403_v12  ;;  %v2812_v0 = vmul.f32 -1.442695, %v2402_v9  ;;  %v2494_v9 = vld [vmem:[#allocation2 + $0x30] sm:$0xff] }
0x24bd   :  { %3129 = vtanh.f32 %v2403_v12 }
0x24be   :  { %3131 = vpow2.f32 %v2813_v10 }
0x24c1   :  { %v2387_v26 = vpop.f32.mrf.mxu2  ;;  %v2400_v5 = vpop.f32.mrf.mxu3 }
0x24c2   :  { %v3128_v49 = vpop.eup %3127  ;;  %v2886_v26 = vld [vmem:[%s4382_s18] ss:$0 sm:$0xff]  ;;  %s3464_s18 = smov [#allocation20]  }
0x24c3   :  { %v3130_v8 = vpop.eup %3129  ;;  %2426 = vrot.lane.b32.xlu1 %v3128_v49, %s3459_s16  ;;  %s2590_s20 = sshll.u32 %s3464_s18, 4  ;;  %s2591_s20 = int_to_ptr.vmem [resolvable:$true] %s2590_s20 }
0x24c4   :  { %2463 = vrot.lane.b32.xlu2 %v3130_v8, %s3459_s16  ;;  %v3132_v48 = vpop.eup %3131 }
0x24c5   :  { %v2444_v22 = vadd.f32 1.0, %v3132_v48 }
0x24c7   :  { %3133 = vrcp.f32 %v2444_v22  ;;  %v2456_v29 = vand.u32 2147483648, %v2444_v22  ;;  %vm2450_vm7 = vweird.f32 %v2444_v22  ;;  %v2454_v52 = vand.u32 2147483647, %v2444_v22 }
0x24c8   :  { %3135 = vpow2.f32 %v2812_v0 }
0x24c9   :  { %v2457_v20 = vor.u32 1.1754944e-38, %v2456_v29  ;;  %vm2455_vm9 = vcmp.eq.f32.partialorder %v2454_v52, 8.507059e+37 }
0x24cd   :  { %v3134_v4 = vpop.eup %3133 }
0x24ce   :  { %v2446_v60 = vmul.f32 %v3134_v4, %v2444_v22  ;;  %v3136_v17 = vpop.eup %3135  ;;  %vm2451_vm6 = vweird.f32 %v3134_v4 }
0x24cf   :  { %v2407_v24 = vadd.f32 1.0, %v3136_v17  ;;  %vm2452_vm8 = vmor %vm2450_vm7, %vm2451_vm6 }
0x24d0   :  { %v2447_v11 = vsub.f32 1.0, %v2446_v60 }
0x24d1   :  { %3137 = vrcp.f32 %v2407_v24  ;;  %v2419_v25 = vand.u32 2147483648, %v2407_v24  ;;  %vm2413_vm12 = vweird.f32 %v2407_v24  ;;  %v2417_v51 = vand.u32 2147483647, %v2407_v24 }
0x24d2   :  { %v2448_v6 = vmul.f32 %v3134_v4, %v2447_v11 }
0x24d3   :  { %v2420_v3 = vor.u32 1.1754944e-38, %v2419_v25  ;;  %vm2418_vm14 = vcmp.eq.f32.partialorder %v2417_v51, 8.507059e+37 }
0x24d4   :  { %v2449_v30 = vadd.f32 %v3134_v4, %v2448_v6 }
0x24d6   :  { %v2453_v14 = vsel %vm2452_vm8, %v3134_v4, %v2449_v30 }
0x24d7   :  { %v2458_v55 = vsel %vm2455_vm9, %v2457_v20, %v2453_v14  ;;  %v3138_v19 = vpop.eup %3137 }
0x24d8   :  { %v2409_v53 = vmul.f32 %v3138_v19, %v2407_v24  ;;  %vm2414_vm10 = vweird.f32 %v3138_v19  ;;  %v2461_v16 = vmul.f32 %v2458_v55, %v4321_v41  ;;  %v2860_v41 = vld [vmem:[#allocation18] sm:$0xff] }
0x24d9   :  { %vm2415_vm13 = vmor %vm2413_vm12, %vm2414_vm10  ;;  %2555 = vmatpush.bf16.msrb.mxu0 %v2860_v41 }
0x24da   :  { %v2410_v23 = vsub.f32 1.0, %v2409_v53 }
0x24dc   :  { %v2411_v1 = vmul.f32 %v3138_v19, %v2410_v23 }
0x24de   :  { %v2412_v59 = vadd.f32 %v3138_v19, %v2411_v1 }
0x24e0   :  { %v2416_v37 = vsel %vm2415_vm13, %v3138_v19, %v2412_v59 }
0x24e1   :  { %v2421_v36 = vsel %vm2418_vm14, %v2420_v3, %v2416_v37 }
0x24e2   :  { %v2424_v63 = vmul.f32 %v2421_v36, %v4316_v31 }
0x251e   :  { %v2464_v50 = vpop.permute.xlu2 %2463 }
0x251f   :  { %v2466_v57 = vmul.f32 %v2464_v50, %v2458_v55 }
0x2521   :  { %2468 = vrot.lane.b32.xlu0 %v2466_v57, %s3462_s7 }
0x2535   :  { %v2427_v42 = vpop.permute.xlu1 %2426 }
0x2536   :  { %v2429_v40 = vmul.f32 %v2427_v42, %v2421_v36 }
0x2538   :  { %2431 = vrot.lane.b32.xlu2 %v2429_v40, %s3462_s7 }
0x2592   :  { %v2432_v35 = vpop.permute.xlu2 %2431 }
0x2593   :  { %v2469_v7 = vpop.permute.xlu0 %2468  ;;  %v2434_v61 = vadd.f32 %v2432_v35, %v2424_v63 }
0x2594   :  { %v2471_v13 = vadd.f32 %v2469_v7, %v2461_v16 }
0x2595   :  { %3139 = vtanh.f32 %v2434_v61 }
0x2596   :  { %3141 = vtanh.f32 %v2471_v13 }
0x259b   :  { %v3140_v15 = vpop.eup %3139 }
0x259c   :  { %v3142_v18 = vpop.eup %3141  ;;  %2437 = vrot.lane.b32.xlu2 %v3140_v15, %s3459_s16 }
0x259d   :  { %2474 = vrot.lane.b32.xlu0 %v3142_v18, %s3459_s16 }
0x25f6   :  { %v2438_v21 = vpop.permute.xlu2 %2437 }
0x25f7   :  { %v2440_v27 = vmul.f32 %v2438_v21, %v2421_v36 }
0x25f9   :  { %2479 = vrot.lane.b32.xlu0 %v2440_v27, %s3459_s16  ;;  %s2604_s16 = sshll.u32 %s3463_s15, 4  ;;  %s2605_s16 = int_to_ptr.vmem [resolvable:$true] %s2604_s16 }
0x260f   :  { %v2475_v28 = vpop.permute.xlu0 %2474 }
0x2610   :  { %v2477_v31 = vmul.f32 %v2475_v28, %v2458_v55 }
0x2612   :  { %2484 = vrot.lane.b32.xlu1 %v2477_v31, %s3462_s7 }
0x266b   :  { %v2480_v43 = vpop.permute.xlu0 %2479 }
0x266c   :  { %2482 = vst.msk [vmem:[#allocation2 + $0x38] sm:$0xff] %vm324_vm1, %v2480_v43 }
0x2673   :  { %v2495_v44 = vld [vmem:[#allocation2 + $0x38] sm:$0xff] }
0x2674   :  { %2577 = vst.msk [vmem:[#allocation21] sm:$0xff] %vm367_vm2, %v2495_v44  ;;  %v2499_v12 = vpack.c.bf16 %v2495_v44, %v2494_v9 }
0x2675   :  { %2609 = dma.vmem_to_hbm [thread:$0]  %s2605_s16, 128, %s2607_s28, [#allocation22]  }
0x2684   :  { %v2485_v47 = vpop.permute.xlu1 %2484 }
0x2685   :  { %2487 = vst.msk [vmem:[#allocation2] sm:$0xff] %vm482_vm11, %v2485_v47 }
0x268c   :  { %v2488_v58 = vld [vmem:[#allocation2] sm:$0xff] }
0x268d   :  { %v2496_v56 = vpack.c.bf16 %v2489_v46, %v2488_v58 }
0x268f   :  { %2830 = vmatmul.msk.bf16.vlgmr.msrb.gmra.mxu0 %vm367_vm2, %v2496_v56 }
0x269f   :  { %2831 = vmatmul.msk.bf16.gmra.mxu0 %vm367_vm2, %v2497_v39 }
0x26af   :  { %2832 = vmatmul.msk.bf16.gmra.mxu0 %vm367_vm2, %v2498_v2 }
0x26bf   :  { %2833 = vmatmul.msk.bf16.gmra.mxu0 %vm367_vm2, %v2499_v12 }
0x270c   :  { %v2557_v5 = vpop.f32.mrf.mxu0 }
0x270d   :  { %v2558_v49 = vadd.f32 %v2886_v26, %v2557_v5 }
0x270f   :  { %2578 = vst [vmem:[#allocation20] sm:$0xff] %v2558_v49 }
0x2714   :  { %v2559_v8 = vpop.f32.mrf.mxu0 }
0x2715   :  { %v2560_v10 = vadd.f32 %v2886_v26, %v2559_v8 }
0x2717   :  { %2579 = vst [vmem:[#allocation20 + $0x8] sm:$0xff] %v2560_v10 }
0x271c   :  { %v2562_v48 = vpop.f32.mrf.mxu0 }
0x271d   :  { %v2563_v22 = vadd.f32 %v2886_v26, %v2562_v48 }
0x271f   :  { %2580 = vst [vmem:[#allocation20 + $0x10] sm:$0xff] %v2563_v22 }
0x2724   :  { %v2564_v4 = vpop.f32.mrf.mxu0 }
0x2725   :  { %v2565_v0 = vadd.f32 %v2886_v26, %v2564_v4 }
0x2727   :  { %2581 = vst [vmem:[#allocation20 + $0x18] sm:$0xff] %v2565_v0 }
0x272c   :  { %v2567_v60 = vpop.f32.mrf.mxu0 }
0x272d   :  { %v2568_v11 = vadd.f32 %v2886_v26, %v2567_v60 }
0x272f   :  { %2582 = vst [vmem:[#allocation20 + $0x20] sm:$0xff] %v2568_v11 }
0x2734   :  { %v2569_v17 = vpop.f32.mrf.mxu0 }
0x2735   :  { %v2570_v6 = vadd.f32 %v2886_v26, %v2569_v17 }
0x2737   :  { %2583 = vst [vmem:[#allocation20 + $0x28] sm:$0xff] %v2570_v6 }
0x273c   :  { %v2572_v24 = vpop.f32.mrf.mxu0 }
0x273d   :  { %v2573_v30 = vadd.f32 %v2886_v26, %v2572_v24 }
0x273f   :  { %2584 = vst [vmem:[#allocation20 + $0x30] sm:$0xff] %v2573_v30 }
0x2744   :  { %v2574_v29 = vpop.f32.mrf.mxu0 }
0x2745   :  { %v2575_v52 = vadd.f32 %v2886_v26, %v2574_v29 }
0x2747   :  { %2585 = vst [vmem:[#allocation20 + $0x38] sm:$0xff] %v2575_v52 }
0x2748   :  { %2598 = dma.vmem_to_hbm [thread:$0]  %s2591_s20, 1024, %s2593_s0, [#allocation5], %s3456_s1, %s3456_s1, %s3457_s19  }
0x2749   :  { %3443 = dma.done.wait [#allocation5], 1024  }
0x274a   :  { %3444 = vsyncadd [#allocation5], 4294966272 }
0x274b   :  { %3445 = dma.done.wait [#allocation22], 128  }
0x274c   :  { %3446 = vsyncadd [#allocation22], 4294967168 }
0x274d   :  { %2618 = vsyncpa [#allocation4], 1 }
0x274e   :  { %2619 = vsyncpa [#allocation7], 1 }
0x274f   :  { %2620 = vsyncpa [#allocation10], 1 }
0x2750   :  { %2621 = vsyncpa [#allocation13], 1 }
0x2751   :  { %2622 = vsyncpa [#allocation16], 1 }
0x2752   :  { %2623 = vsyncpa [#allocation19], 1 }
0x2753   :  { %2624 = vsyncpa [#allocation5], 1 }
0x2754   :  { %2625 = vsyncpa [#allocation22], 1 }

</bundles_post_ra>
